<compile_context>
chip_gen: v6e
topology: v6e:2x2x1
jax: 0.10.0
libtpu: 0.0.40
codegen_flags: <defaults>
</compile_context>

<pallas_src>
import functools

import jax
import jax.numpy as jnp
from jax import lax
from jax.experimental import pallas as pl
from jax.experimental.pallas import tpu as pltpu


def _round_up(x, m):
    return ((x + m - 1) // m) * m


def _decoder_kernel(rois_ref, cls_ref, reg_ref, sel_ref, out_ref, *,
                    heat_h, heat_w, roi_wh_zoom_scale):
    """Decode one tile of rois.

    rois_ref : (TN, 4)       f32        [x1, y1, x2, y2]
    cls_ref  : (TN, HW)      f32/bf16   heatmap (num_classes == 1, squeezed)
    reg_ref  : (TN, 4*HW)    f32/bf16   regression offsets, channel-major
    sel_ref  : (4*HW, 8)     reg dtype  selector: sel[k*HW + h, k] = 1
    out_ref  : (TN, 8)       f32        [bx1, by1, bx2, by2, score, 0, 0, 0]
    """
    f32 = jnp.float32
    hw = heat_h * heat_w
    sx, sy = roi_wh_zoom_scale

    # ---- per-roi spatial argmax over the heatmap -------------------------
    heat = cls_ref[...].astype(f32)                        # (TN, HW)
    tn = heat.shape[0]
    iota = lax.broadcasted_iota(jnp.int32, (tn, hw), 1)

    m_col = jnp.max(heat, axis=-1, keepdims=True)          # (TN, 1)  scores
    # first index achieving the max (matches torch.max / jnp.argmax)
    # TODO(synk): all-NaN heatmap rows fall back to idx=hw (NaN score, dummy
    # box) which differs from torch's NaN propagation.
    idx_col = jnp.min(jnp.where(heat == m_col, iota, hw),
                      axis=-1, keepdims=True)              # (TN, 1) int32
    onehot = (iota == idx_col).astype(reg_ref.dtype)       # (TN, HW) 0/1

    # ---- fused gather of the 4 regression channels at the argmax ---------
    # reg_wide[n, k*HW + h] = reg[n, k, h].  Repeat the onehot across the 4
    # channel chunks (lane concat) and reduce all 4 channels with a single
    # MXU matmul against the constant 0/1 selector: exactly one nonzero per
    # (roi, channel) chunk, so the result is the gathered offset, exactly.
    reg_wide = reg_ref[...]                                # (TN, 4*HW)
    mask4 = jnp.concatenate([onehot, onehot, onehot, onehot], axis=-1)
    prod = reg_wide * mask4                                # (TN, 4*HW)
    offs = jnp.dot(prod, sel_ref[...],
                   preferred_element_type=f32,
                   precision=lax.Precision.HIGHEST)        # (TN, 8) f32

    # ---- box decode back to image coordinates ----------------------------
    idx_f = idx_col.astype(f32)
    idx_h = jnp.floor(idx_f / f32(heat_w))
    idx_w = idx_f - idx_h * f32(heat_w)

    rois = rois_ref[...]                                   # (TN, 4)
    x1 = rois[:, 0:1]
    y1 = rois[:, 1:2]
    x2 = rois[:, 2:3]
    y2 = rois[:, 3:4]
    rw = (x2 - x1) * f32(sx)                               # zoomed width
    rh = (y2 - y1) * f32(sy)                               # zoomed height
    zx1 = (x1 + x2) * 0.5 - rw * 0.5                       # zoomed x1
    zy1 = (y1 + y2) * 0.5 - rh * 0.5                       # zoomed y1
    bw = rw / f32(heat_w)                                  # back_scale_w
    bh = rh / f32(heat_h)                                  # back_scale_h

    bx1 = bw * (offs[:, 0:1] + idx_w + 0.5) + zx1
    by1 = bh * (offs[:, 1:2] + idx_h + 0.5) + zy1
    bx2 = bw * (offs[:, 2:3] + idx_w + 0.5) + zx1
    by2 = bh * (offs[:, 3:4] + idx_h + 0.5) + zy1

    zero = jnp.zeros_like(m_col)
    out_ref[...] = jnp.concatenate(
        [bx1, by1, bx2, by2, m_col, zero, zero, zero], axis=-1)


def heatmap_box2d_decode(rois, cls_pred, reg_pred, *,
                         score_threshold=0.0,
                         roi_wh_zoom_scale=(1.0, 1.0),
                         roi_tile=128):
    """rois: (N,4), cls_pred: (N,C,H,W), reg_pred: (N,4,H,W) -> dense outputs."""
    N, C, H, W = cls_pred.shape
    # The reference torch code broadcasts a (N, 4*C) tensor against (N, 4),
    # which is only valid for num_classes == 1.
    assert C == 1, "HeatmapBox2dDecoder implies num_classes == 1"
    assert reg_pred.shape == (N, 4, H, W)
    HW = H * W

    rois_f = rois.astype(jnp.float32)
    # Keep heatmap / regression tensors in their incoming dtype (bf16
    # passthrough halves the HBM bytes of this bandwidth-bound kernel).
    cls_flat = cls_pred.reshape(N, HW)
    reg_wide = reg_pred.reshape(N, 4 * HW)
    rdt = reg_wide.dtype

    # Constant 0/1 selector for the fused regression gather (loaded once,
    # stays resident in VMEM thanks to the constant index_map).
    sel = (jnp.arange(4 * HW, dtype=jnp.int32)[:, None] // HW
           == jnp.arange(8, dtype=jnp.int32)[None, :]).astype(rdt)

    # Tile the roi axis.  roi_tile must be a multiple of 8 (sublanes); ~128
    # balances DMA efficiency vs vreg pressure of the (TN,1) per-roi columns.
    # For very large heatmaps on v7x (64 MiB VMEM) consider reducing roi_tile.
    assert roi_tile % 8 == 0
    tile = min(roi_tile, _round_up(max(N, 8), 8))
    n_pad = _round_up(N, tile)
    if n_pad != N:
        pad = n_pad - N
        rois_f = jnp.pad(rois_f, ((0, pad), (0, 0)))
        cls_flat = jnp.pad(cls_flat, ((0, pad), (0, 0)))
        reg_wide = jnp.pad(reg_wide, ((0, pad), (0, 0)))

    kernel = functools.partial(
        _decoder_kernel, heat_h=H, heat_w=W,
        roi_wh_zoom_scale=tuple(float(s) for s in roi_wh_zoom_scale))

    packed = pl.pallas_call(
        kernel,
        out_shape=jax.ShapeDtypeStruct((n_pad, 8), jnp.float32),
        grid_spec=pltpu.PrefetchScalarGridSpec(
            num_scalar_prefetch=0,
            grid=(n_pad // tile,),
            in_specs=[
                pl.BlockSpec((tile, 4), lambda i: (i, 0)),
                pl.BlockSpec((tile, HW), lambda i: (i, 0)),
                pl.BlockSpec((tile, 4 * HW), lambda i: (i, 0)),
                pl.BlockSpec((4 * HW, 8), lambda i: (0, 0)),   # resident const
            ],
            out_specs=pl.BlockSpec((tile, 8), lambda i: (i, 0)),
        ),
        compiler_params=pltpu.CompilerParams(
            dimension_semantics=("parallel",),
            vmem_limit_bytes=32 * 1024 * 1024),
    )(rois_f, cls_flat, reg_wide, sel)

    packed = packed[:N]
    boxes = packed[:, 0:4].reshape(N, C, 4)
    scores = packed[:, 4:5]                                  # (N, C)
    labels = jnp.broadcast_to(
        jnp.arange(C, dtype=jnp.float32)[None, :], (N, C))
    valid = (scores >= jnp.float32(score_threshold)).astype(jnp.float32)

    # TODO(synk): the torch module builds ragged per-image MultipleBoxes2D
    # lists filtered by score >= threshold; that is dynamically shaped and has
    # no fixed-shape TPU equivalent, so we return dense boxes/scores/labels
    # plus the `valid` mask instead.
    return boxes, scores, labels, valid


def _reference(rois, cls_pred, reg_pred, score_threshold, scale):
    """Pure-JAX reimplementation of the torch forward (dense outputs)."""
    N, C, H, W = cls_pred.shape
    sx, sy = scale
    x1, y1, x2, y2 = rois[:, 0], rois[:, 1], rois[:, 2], rois[:, 3]
    cx = (x1 + x2) * 0.5
    cy = (y1 + y2) * 0.5
    rw = (x2 - x1) * sx
    rh = (y2 - y1) * sy
    zx1 = cx - rw * 0.5
    zy1 = cy - rh * 0.5

    lm = cls_pred.reshape(N, C, H * W)
    scores = lm.max(-1)                                   # (N, C)
    idx = jnp.argmax(lm, -1)                              # (N, C)
    idx_f = idx.astype(jnp.float32)
    ih = jnp.floor(idx_f / W)
    iw = idx_f - ih * W

    off = reg_pred.reshape(N, 4, H * W)
    mo = off[jnp.arange(N)[:, None, None],
             jnp.arange(4)[None, None, :],
             idx[:, :, None]]                             # (N, C, 4)

    bw = (rw / W)[:, None]
    bh = (rh / H)[:, None]
    boxes = jnp.stack(
        [bw * (mo[..., 0] + iw + 0.5) + zx1[:, None],
         bh * (mo[..., 1] + ih + 0.5) + zy1[:, None],
         bw * (mo[..., 2] + iw + 0.5) + zx1[:, None],
         bh * (mo[..., 3] + ih + 0.5) + zy1[:, None]],
        axis=-1)                                          # (N, C, 4)
    labels = jnp.broadcast_to(jnp.arange(C, dtype=jnp.float32)[None, :], (N, C))
    valid = (scores >= score_threshold).astype(jnp.float32)
    return boxes, scores, labels, valid


def _check(rois, cls_pred, reg_pred, score_threshold, zoom, roi_tile):
    boxes, scores, labels, valid = heatmap_box2d_decode(
        rois, cls_pred, reg_pred,
        score_threshold=score_threshold, roi_wh_zoom_scale=zoom,
        roi_tile=roi_tile)
    jax.block_until_ready((boxes, scores, labels, valid))

    rb, rs, rl, rv = _reference(rois, cls_pred, reg_pred, score_threshold, zoom)
    assert jnp.allclose(boxes, rb, atol=1e-3, rtol=1e-3), "boxes mismatch"
    assert jnp.allclose(scores, rs, atol=1e-5, rtol=1e-5), "scores mismatch"
    assert jnp.allclose(labels, rl), "labels mismatch"
    assert jnp.allclose(valid, rv), "valid mask mismatch"
    return boxes, scores


if __name__ == "__main__":
    key = jax.random.PRNGKey(0)
    k1, k2, k3, k4, k5, k6, k7, k8 = jax.random.split(key, 8)

    batch_size = 2
    rois_per_img = 8
    N = batch_size * rois_per_img        # total rois
    C = 1                                # num_classes (forced by torch broadcast)
    H = W = 16                           # heatmap spatial size

    # deterministic synthetic rois: [x1, y1, x1+w, y1+h]
    xy = jax.random.uniform(k1, (N, 2), jnp.float32, 0.0, 100.0)
    wh = jax.random.uniform(k2, (N, 2), jnp.float32, 8.0, 64.0)
    rois = jnp.concatenate([xy, xy + wh], axis=-1)        # (N, 4)

    cls_pred = jax.random.normal(k3, (N, C, H, W), jnp.float32)
    reg_pred = jax.random.normal(k4, (N, 4, H, W), jnp.float32) * 0.5

    score_threshold = 0.0
    zoom = (1.2, 1.1)

    # single-tile path
    boxes, scores = _check(rois, cls_pred, reg_pred, score_threshold, zoom,
                           roi_tile=128)

    # per-image view, mirroring the torch .view(batch_size, -1, ...) step
    _ = boxes.reshape(batch_size, rois_per_img, C, 4)
    _ = scores.reshape(batch_size, rois_per_img, C)

    # multi-tile + padded path (N=20 padded to 32, grid of 2 parallel steps)
    N2 = 20
    xy2 = jax.random.uniform(k5, (N2, 2), jnp.float32, 0.0, 100.0)
    wh2 = jax.random.uniform(k6, (N2, 2), jnp.float32, 8.0, 64.0)
    rois2 = jnp.concatenate([xy2, xy2 + wh2], axis=-1)
    cls2 = jax.random.normal(k7, (N2, C, H, W), jnp.float32)
    reg2 = jax.random.normal(k8, (N2, 4, H, W), jnp.float32) * 0.5
    _check(rois2, cls2, reg2, 0.1, zoom, roi_tile=16)

    print("KERNEL_OK")
</pallas_src>

<mosaic_0001>
module attributes {stable_mosaic.version = 11 : i64} {
  func.func @_decoder_kernel(%arg0: i32, %arg1: memref<16x4xf32, #tpu.memory_space<vmem>>, %arg2: memref<16x256xf32, #tpu.memory_space<vmem>>, %arg3: memref<16x1024xf32, #tpu.memory_space<vmem>>, %arg4: memref<1024x8xf32, #tpu.memory_space<vmem>>, %arg5: memref<16x8xf32, #tpu.memory_space<vmem>>) attributes {dimension_semantics = [#tpu.dimension_semantics<parallel>], iteration_bounds = array<i64: 1>, scalar_prefetch = 0 : i64, scratch_operands = 0 : i64, tpu.core_type = #tpu.core_type<tc>, window_params = [{transform_indices = @transform_0, window_bounds = array<i64: 16, 4>}, {transform_indices = @transform_1, window_bounds = array<i64: 16, 256>}, {transform_indices = @transform_2, window_bounds = array<i64: 16, 1024>}, {pipeline_mode = #tpu.pipeline_mode<synchronous>, transform_indices = @transform_3, window_bounds = array<i64: 1024, 8>}, {transform_indices = @transform_4, window_bounds = array<i64: 16, 8>}]} {
    %c0 = arith.constant 0 : index
    %c0_0 = arith.constant 0 : index
    %0 = vector.load %arg2[%c0, %c0_0] : memref<16x256xf32, #tpu.memory_space<vmem>>, vector<16x256xf32>
    %1 = tpu.iota {dimensions = array<i32: 1>} : vector<16x256xi32>
    %cst = arith.constant dense<0xFF800000> : vector<16xf32>
    %2 = vector.multi_reduction <maximumf>, %0, %cst [1] : vector<16x256xf32> to vector<16xf32>
    %3 = vector.shape_cast %2 : vector<16xf32> to vector<16x1xf32>
    %4 = vector.broadcast %3 : vector<16x1xf32> to vector<16x256xf32>
    %5 = arith.cmpf oeq, %0, %4 : vector<16x256xf32>
    %c256_i32 = arith.constant 256 : i32
    %6 = vector.broadcast %c256_i32 : i32 to vector<16x256xi32>
    %7 = arith.select %5, %1, %6 : vector<16x256xi1>, vector<16x256xi32>
    %cst_1 = arith.constant dense<2147483647> : vector<16xi32>
    %8 = vector.multi_reduction <minsi>, %7, %cst_1 [1] : vector<16x256xi32> to vector<16xi32>
    %9 = vector.shape_cast %8 : vector<16xi32> to vector<16x1xi32>
    %10 = vector.broadcast %9 : vector<16x1xi32> to vector<16x256xi32>
    %11 = arith.cmpi eq, %1, %10 : vector<16x256xi32>
    %12 = arith.extui %11 : vector<16x256xi1> to vector<16x256xi32>
    %13 = arith.sitofp %12 : vector<16x256xi32> to vector<16x256xf32>
    %c0_2 = arith.constant 0 : index
    %c0_3 = arith.constant 0 : index
    %14 = vector.load %arg3[%c0_2, %c0_3] : memref<16x1024xf32, #tpu.memory_space<vmem>>, vector<16x1024xf32>
    %15 = tpu.concatenate %13, %13, %13, %13 in 1 : vector<16x256xf32>, vector<16x256xf32>, vector<16x256xf32>, vector<16x256xf32> -> vector<16x1024xf32>
    %16 = arith.mulf %14, %15 : vector<16x1024xf32>
    %c0_4 = arith.constant 0 : index
    %c0_5 = arith.constant 0 : index
    %17 = vector.load %arg4[%c0_4, %c0_5] : memref<1024x8xf32, #tpu.memory_space<vmem>>, vector<1024x8xf32>
    %cst_6 = arith.constant dense<0.000000e+00> : vector<16x8xf32>
    %18 = tpu.matmul %16, %17, %cst_6 {dimension_numbers = #tpu.dot_dimension_numbers<[1], [0], [0], [1], [0, 0, 1, 1], [], []>, precision = #tpu.contract_precision<fp32>} : vector<16x1024xf32>, vector<1024x8xf32>, vector<16x8xf32> -> vector<16x8xf32>
    %19 = arith.sitofp %9 : vector<16x1xi32> to vector<16x1xf32>
    %cst_7 = arith.constant 1.600000e+01 : f32
    %20 = vector.broadcast %cst_7 : f32 to vector<16x1xf32>
    %21 = arith.divf %19, %20 : vector<16x1xf32>
    %22 = math.floor %21 : vector<16x1xf32>
    %cst_8 = arith.constant 1.600000e+01 : f32
    %23 = vector.broadcast %cst_8 : f32 to vector<16x1xf32>
    %24 = arith.mulf %22, %23 : vector<16x1xf32>
    %25 = arith.subf %19, %24 : vector<16x1xf32>
    %c0_9 = arith.constant 0 : index
    %c0_10 = arith.constant 0 : index
    %26 = vector.load %arg1[%c0_9, %c0_10] : memref<16x4xf32, #tpu.memory_space<vmem>>, vector<16x4xf32>
    %27 = vector.extract_strided_slice %26 {offsets = [0, 0], sizes = [16, 1], strides = [1, 1]} : vector<16x4xf32> to vector<16x1xf32>
    %28 = vector.extract_strided_slice %26 {offsets = [0, 1], sizes = [16, 1], strides = [1, 1]} : vector<16x4xf32> to vector<16x1xf32>
    %29 = vector.extract_strided_slice %26 {offsets = [0, 2], sizes = [16, 1], strides = [1, 1]} : vector<16x4xf32> to vector<16x1xf32>
    %30 = vector.extract_strided_slice %26 {offsets = [0, 3], sizes = [16, 1], strides = [1, 1]} : vector<16x4xf32> to vector<16x1xf32>
    %31 = arith.subf %29, %27 : vector<16x1xf32>
    %cst_11 = arith.constant 1.200000e+00 : f32
    %32 = vector.broadcast %cst_11 : f32 to vector<16x1xf32>
    %33 = arith.mulf %31, %32 : vector<16x1xf32>
    %34 = arith.subf %30, %28 : vector<16x1xf32>
    %cst_12 = arith.constant 1.100000e+00 : f32
    %35 = vector.broadcast %cst_12 : f32 to vector<16x1xf32>
    %36 = arith.mulf %34, %35 : vector<16x1xf32>
    %37 = arith.addf %27, %29 : vector<16x1xf32>
    %cst_13 = arith.constant 5.000000e-01 : f32
    %38 = vector.broadcast %cst_13 : f32 to vector<16x1xf32>
    %39 = arith.mulf %37, %38 : vector<16x1xf32>
    %cst_14 = arith.constant 5.000000e-01 : f32
    %40 = vector.broadcast %cst_14 : f32 to vector<16x1xf32>
    %41 = arith.mulf %33, %40 : vector<16x1xf32>
    %42 = arith.subf %39, %41 : vector<16x1xf32>
    %43 = arith.addf %28, %30 : vector<16x1xf32>
    %cst_15 = arith.constant 5.000000e-01 : f32
    %44 = vector.broadcast %cst_15 : f32 to vector<16x1xf32>
    %45 = arith.mulf %43, %44 : vector<16x1xf32>
    %cst_16 = arith.constant 5.000000e-01 : f32
    %46 = vector.broadcast %cst_16 : f32 to vector<16x1xf32>
    %47 = arith.mulf %36, %46 : vector<16x1xf32>
    %48 = arith.subf %45, %47 : vector<16x1xf32>
    %cst_17 = arith.constant 1.600000e+01 : f32
    %49 = vector.broadcast %cst_17 : f32 to vector<16x1xf32>
    %50 = arith.divf %33, %49 : vector<16x1xf32>
    %cst_18 = arith.constant 1.600000e+01 : f32
    %51 = vector.broadcast %cst_18 : f32 to vector<16x1xf32>
    %52 = arith.divf %36, %51 : vector<16x1xf32>
    %53 = vector.extract_strided_slice %18 {offsets = [0, 0], sizes = [16, 1], strides = [1, 1]} : vector<16x8xf32> to vector<16x1xf32>
    %54 = arith.addf %53, %25 : vector<16x1xf32>
    %cst_19 = arith.constant 5.000000e-01 : f32
    %55 = vector.broadcast %cst_19 : f32 to vector<16x1xf32>
    %56 = arith.addf %54, %55 : vector<16x1xf32>
    %57 = arith.mulf %50, %56 : vector<16x1xf32>
    %58 = arith.addf %57, %42 : vector<16x1xf32>
    %59 = vector.extract_strided_slice %18 {offsets = [0, 1], sizes = [16, 1], strides = [1, 1]} : vector<16x8xf32> to vector<16x1xf32>
    %60 = arith.addf %59, %22 : vector<16x1xf32>
    %cst_20 = arith.constant 5.000000e-01 : f32
    %61 = vector.broadcast %cst_20 : f32 to vector<16x1xf32>
    %62 = arith.addf %60, %61 : vector<16x1xf32>
    %63 = arith.mulf %52, %62 : vector<16x1xf32>
    %64 = arith.addf %63, %48 : vector<16x1xf32>
    %65 = vector.extract_strided_slice %18 {offsets = [0, 2], sizes = [16, 1], strides = [1, 1]} : vector<16x8xf32> to vector<16x1xf32>
    %66 = arith.addf %65, %25 : vector<16x1xf32>
    %cst_21 = arith.constant 5.000000e-01 : f32
    %67 = vector.broadcast %cst_21 : f32 to vector<16x1xf32>
    %68 = arith.addf %66, %67 : vector<16x1xf32>
    %69 = arith.mulf %50, %68 : vector<16x1xf32>
    %70 = arith.addf %69, %42 : vector<16x1xf32>
    %71 = vector.extract_strided_slice %18 {offsets = [0, 3], sizes = [16, 1], strides = [1, 1]} : vector<16x8xf32> to vector<16x1xf32>
    %72 = arith.addf %71, %22 : vector<16x1xf32>
    %cst_22 = arith.constant 5.000000e-01 : f32
    %73 = vector.broadcast %cst_22 : f32 to vector<16x1xf32>
    %74 = arith.addf %72, %73 : vector<16x1xf32>
    %75 = arith.mulf %52, %74 : vector<16x1xf32>
    %76 = arith.addf %75, %48 : vector<16x1xf32>
    %cst_23 = arith.constant 0.000000e+00 : f32
    %77 = vector.broadcast %cst_23 : f32 to vector<16x1xf32>
    %78 = tpu.concatenate %58, %64, %70, %76, %3, %77, %77, %77 in 1 : vector<16x1xf32>, vector<16x1xf32>, vector<16x1xf32>, vector<16x1xf32>, vector<16x1xf32>, vector<16x1xf32>, vector<16x1xf32>, vector<16x1xf32> -> vector<16x8xf32>
    %c0_24 = arith.constant 0 : index
    %c0_25 = arith.constant 0 : index
    %79 = vector.load %arg5[%c0_24, %c0_25] : memref<16x8xf32, #tpu.memory_space<vmem>>, vector<16x8xf32>
    tpu.vector_store %arg5[%c0_24, %c0_25], %78 {strides = array<i32>} : memref<16x8xf32, #tpu.memory_space<vmem>>, vector<16x8xf32>,
    return
  }
  func.func @transform_0(%arg0: i32) -> (i32, i32) {
    %c0_i32 = arith.constant 0 : i32
    %c0_i32_0 = arith.constant 0 : i32
    return %arg0, %c0_i32 : i32, i32
  }
  func.func @transform_1(%arg0: i32) -> (i32, i32) {
    %c0_i32 = arith.constant 0 : i32
    %c0_i32_0 = arith.constant 0 : i32
    return %arg0, %c0_i32 : i32, i32
  }
  func.func @transform_2(%arg0: i32) -> (i32, i32) {
    %c0_i32 = arith.constant 0 : i32
    %c0_i32_0 = arith.constant 0 : i32
    return %arg0, %c0_i32 : i32, i32
  }
  func.func @transform_3(%arg0: i32) -> (i32, i32) {
    %c0_i32 = arith.constant 0 : i32
    %c0_i32_0 = arith.constant 0 : i32
    %c0_i32_1 = arith.constant 0 : i32
    return %c0_i32, %c0_i32_0 : i32, i32
  }
  func.func @transform_4(%arg0: i32) -> (i32, i32) {
    %c0_i32 = arith.constant 0 : i32
    %c0_i32_0 = arith.constant 0 : i32
    return %arg0, %c0_i32 : i32, i32
  }
}

</mosaic_0001>

<bundles_post_ra>
// kernel: tpu_custom_call.1
= control target key start
LH: loop header
LB: loop body
LE: loop exit
PB: predicated region body
PF: predicated region fallthrough
CT: control target
= control target key end

     0   :  { %v21_v6 = vlaneseq  ;;  %s5001_s24 = smov 2   ;;  %vm4051_vm12 = vcmask 7168   ;;  %vm4054_vm13 = vcmask 15360   ;;  %vm4057_vm14 = vcmask 23552   ;;  %s8085_s1 = inlined_call_operand.vmem [shape: f32[16,256], index: 1, kind: input, shape index: {}]   ;;  %s8086_s3 = inlined_call_operand.vmem [shape: f32[1024,8], index: 3, kind: input, shape index: {}]   ;;  %s8087_s2 = inlined_call_operand.vmem [shape: f32[16,1024], index: 2, kind: input, shape index: {}]   ;;  %s8088_s0 = inlined_call_operand.vmem [shape: f32[16,4], index: 0, kind: input, shape index: {}]   ;;  %s8089_s4 = inlined_call_operand.vmem [shape: f32[16,8], index: 4, kind: output, shape index: {}]  }
   0x1   :  { %v17_v0 = vld [vmem:[%s8085_s1] sm:$0xff]  ;;  %v18_v1 = vld [vmem:[%s8085_s1 + $0x8] sm:$0xff]  ;;  %v19_v2 = vld [vmem:[%s8085_s1 + $0x10] sm:$0xff]  ;;  %vm4060_vm15 = vcmask 31744  }
   0x2   :  { %v24_v3 = vmax.f32 %v17_v0, %v18_v1  ;;  %v20_v4 = vld [vmem:[%s8085_s1 + $0x18] sm:$0xff]  ;;  %v5040_v7 = vand.u32 127, %v21_v6  ;;  %v144_v23 = vld [vmem:[%s8086_s3 + $0xf0] sm:$0xff]  ;;  %v143_v28 = vld [vmem:[%s8086_s3 + $0xe8] sm:$0xff] }
   0x3   :  { %v27_v5 = vmax.f32 %v19_v2, %v20_v4  ;;  %v145_v21 = vld [vmem:[%s8086_s3 + $0xf8] sm:$0xff]  ;;  %v5082_v26 = vand.u32 4294901760, %v144_v23  ;;  %v128_v27 = vld [vmem:[%s8086_s3 + $0x70] sm:$0xff]  ;;  %v127_v29 = vld [vmem:[%s8086_s3 + $0x68] sm:$0xff]  ;;  %v5095_v31 = vand.u32 4294901760, %v143_v28 }
   0x4   :  { %25 = vmax.xlane.f32.xlu0 %v24_v3  ;;  %v5043_v8 = vadd.s32 128, %v5040_v7  ;;  %v129_v22 = vld [vmem:[%s8086_s3 + $0x78] sm:$0xff]  ;;  %v5078_v24 = vand.u32 4294901760, %v145_v21  ;;  %v5093_v30 = vand.u32 4294901760, %v128_v27  ;;  %v5097_v32 = vand.u32 4294901760, %v127_v29  ;;  %v142_v33 = vld [vmem:[%s8086_s3 + $0xe0] sm:$0xff] }
   0x5   :  { %v5080_v25 = vand.u32 4294901760, %v129_v22  ;;  %v126_v34 = vld [vmem:[%s8086_s3 + $0x60] sm:$0xff]  ;;  %v5112_v37 = vsub.f32 %v144_v23, %v5082_v26  ;;  %v5114_v38 = vand.u32 4294901760, %v142_v33  ;;  %v5121_v40 = vsub.f32 %v143_v28, %v5095_v31  ;;  %v141_v59 = vld [vmem:[%s8086_s3 + $0xd8] sm:$0xff]  ;;  %v140_v61 = vld [vmem:[%s8086_s3 + $0xd0] sm:$0xff] }
   0x6   :  { %v5106_v35 = vsub.f32 %v145_v21, %v5078_v24  ;;  %4083 = vmatprep.subr.mxu0 %v5078_v24  ;;  %v5118_v39 = vsub.f32 %v128_v27, %v5093_v30  ;;  %v5124_v41 = vsub.f32 %v127_v29, %v5097_v32  ;;  %v5126_v42 = vand.u32 4294901760, %v126_v34  ;;  %v125_v60 = vld [vmem:[%s8086_s3 + $0x58] sm:$0xff]  ;;  %v139_v3 = vld [vmem:[%s8086_s3 + $0xc8] sm:$0xff] }
   0x7   :  { %v5109_v36 = vsub.f32 %v129_v22, %v5080_v25  ;;  %4084 = vmatpush3.msra.mxu0 %v5080_v25  ;;  %v8102_v45 = vand.u32 4294901760, %v5112_v37  ;;  %v5133_v46 = vsub.f32 %v142_v33, %v5114_v38  ;;  %v8100_v48 = vand.u32 4294901760, %v5121_v40  ;;  %v122_v22 = vld [vmem:[%s8086_s3 + $0x40] sm:$0xff] }
   0x8   :  { %28 = vmax.xlane.f32.xlu0 %v27_v5  ;;  %8385 = vst [vmem:[#allocation4_spill] sm:$0xff] %v5106_v35  ;;  %v8105_v43 = vand.u32 4294901760, %v5106_v35  ;;  %4085 = vmatprep.subr.mxu0 %v5082_v26  ;;  %v8101_v47 = vand.u32 4294901760, %v5118_v39  ;;  %v8099_v49 = vand.u32 4294901760, %v5124_v41  ;;  %v5140_v50 = vsub.f32 %v126_v34, %v5126_v42 }
   0x9   :  { %v8103_v44 = vand.u32 4294901760, %v5109_v36  ;;  %4086 = vmatpush3.msra.mxu0 %v5093_v30  ;;  %v492_v53 = vsub.f32 %v5112_v37, %v8102_v45  ;;  %v8097_v54 = vand.u32 4294901760, %v5133_v46  ;;  %v499_v56 = vsub.f32 %v5121_v40, %v8100_v48 }
   0xa   :  { %v485_v51 = vsub.f32 %v5106_v35, %v8105_v43  ;;  %4087 = vmatprep.subr.mxu0 %v5095_v31  ;;  %v380_v55 = vsub.f32 %v5118_v39, %v8101_v47  ;;  %v387_v57 = vsub.f32 %v5124_v41, %v8099_v49  ;;  %v8096_v58 = vand.u32 4294901760, %v5140_v50 }
   0xb   :  { %v373_v52 = vsub.f32 %v5109_v36, %v8103_v44  ;;  %4088 = vmatpush3.msra.mxu0 %v5097_v32  ;;  %v500_v6 = vand.u32 4294901760, %v499_v56  ;;  %v5198_v21 = vand.u32 4294901760, %v140_v61  ;;  %v5205_v28 = vand.u32 4294901760, %v139_v3 }
   0xc   :  { %v486_v62 = vand.u32 4294901760, %v485_v51  ;;  %4089 = vmatprep.subr.mxu0 %v5114_v38  ;;  %v381_v5 = vand.u32 4294901760, %v380_v55 }
   0xd   :  { %v374_v63 = vand.u32 4294901760, %v373_v52  ;;  %4090 = vmatpush3.msra.mxu0 %v5126_v42  ;;  %v5216_v51 = vsub.f32 %v140_v61, %v5198_v21  ;;  %v5225_v55 = vsub.f32 %v139_v3, %v5205_v28 }
   0xe   :  { %4121 = vmatprep.subr.mxu1 %v486_v62 }
   0xf   :  { %4122 = vmatpush3.msra.mxu1 %v374_v63  ;;  %v8092_v61 = vand.u32 4294901760, %v5216_v51 }
  0x8d   :  { %v5045_v9 = vpop.xlane.xlu0 %25 }
  0x8e   :  { %8383 = vst [vmem:[#allocation2_spill] sm:$0xff] %v5045_v9  ;;  %vm30_vm0 = vcmp.eq.f32.partialorder %v17_v0, %v5045_v9  ;;  %vm31_vm1 = vcmp.eq.f32.partialorder %v18_v1, %v5045_v9  ;;  %v493_v0 = vand.u32 4294901760, %v492_v53  ;;  %v506_v1 = vsub.f32 %v5133_v46, %v8097_v54  ;;  %v119_v54 = vld [vmem:[%s8086_s3 + $0x28] sm:$0xff] }
  0x8f   :  { %v34_v10 = vsel %vm30_vm0, %v5040_v7, 256  ;;  %v35_v11 = vsel %vm31_vm1, %v5043_v8, 256  ;;  %vm4063_vm0 = vcmask 39936   ;;  %vm4066_vm1 = vcmask 48128  }
  0x90   :  { %vm38_vm2 = vcmp.lt.s32.totalorder %v34_v10, %v35_v11  ;;  %4123 = vmatprep.subr.mxu1 %v493_v0  ;;  %v8091_v0 = vand.u32 4294901760, %v5225_v55 }
  0x91   :  { %v5051_v12 = vpop.xlane.xlu0 %28  ;;  %v5053_v13 = vsel %vm38_vm2, %v34_v10, %v35_v11  ;;  %v388_v10 = vand.u32 4294901760, %v387_v57  ;;  %v394_v11 = vsub.f32 %v5140_v50, %v8096_v58  ;;  %4124 = vmatpush3.msra.mxu1 %v381_v5  ;;  %v5230_v57 = vand.u32 4294901760, %v122_v22  ;;  %v135_v58 = vld [vmem:[%s8086_s3 + $0xa8] sm:$0xff] }
  0x92   :  { %8384 = vst [vmem:[#allocation3_spill] sm:$0xff] %v5051_v12  ;;  %vm32_vm3 = vcmp.eq.f32.partialorder %v19_v2, %v5051_v12  ;;  %vm33_vm4 = vcmp.eq.f32.partialorder %v20_v4, %v5051_v12  ;;  %v41_v14 = vshra.s32 %v5053_v13, 16  ;;  %v124_v2 = vld [vmem:[%s8086_s3 + $0x50] sm:$0xff]  ;;  %v123_v4 = vld [vmem:[%s8086_s3 + $0x48] sm:$0xff]  ;;  %4125 = vmatprep.subr.mxu1 %v500_v6  ;;  %v520_v5 = vsub.f32 %v5216_v51, %v8092_v61 }
  0x93   :  { %v36_v15 = vsel %vm32_vm3, %v5040_v7, 256  ;;  %v37_v16 = vsel %vm33_vm4, %v5043_v8, 256  ;;  %v395_v23 = vand.u32 4294901760, %v394_v11  ;;  %v5203_v27 = vand.u32 4294901760, %v124_v2  ;;  %4126 = vmatpush3.msra.mxu1 %v388_v10 }
  0x94   :  { %v5060_v17 = vcvt.s32.f32 %v41_v14  ;;  %vm54_vm5 = vcmp.lt.s32.totalorder %v36_v15, %v37_v16  ;;  %v138_v14 = vld [vmem:[%s8086_s3 + $0xc0] sm:$0xff]  ;;  %v5207_v29 = vand.u32 4294901760, %v123_v4  ;;  %v527_v11 = vsub.f32 %v5225_v55, %v8091_v0 }
  0x95   :  { %v5062_v18 = vsel %vm54_vm5, %v36_v15, %v37_v16  ;;  %v507_v15 = vand.u32 4294901760, %v506_v1  ;;  %v5194_v16 = vand.u32 4294901760, %v141_v59  ;;  %v5218_v52 = vand.u32 4294901760, %v138_v14 }
  0x96   :  { %44 = vmin.xlane.f32.xlu1 %v5060_v17  ;;  %v57_v19 = vshra.s32 %v5062_v18, 16  ;;  %v5222_v53 = vsub.f32 %v124_v2, %v5203_v27  ;;  %v5228_v56 = vsub.f32 %v123_v4, %v5207_v29  ;;  %v5244_v2 = vsub.f32 %v122_v22, %v5230_v57  ;;  %v137_v22 = vld [vmem:[%s8086_s3 + $0xb8] sm:$0xff] }
  0x97   :  { %v5210_v33 = vsub.f32 %v141_v59, %v5194_v16  ;;  %4091 = vmatprep.subr.mxu0 %v5194_v16  ;;  %v5237_v62 = vsub.f32 %v138_v14, %v5218_v52  ;;  %4127 = vmatprep.subr.mxu1 %v507_v15  ;;  %v5303_v44 = vand.u32 4294901760, %v135_v58  ;;  %vm4069_vm2 = vcmask 56320  }
  0x98   :  { %v5066_v20 = vcvt.s32.f32 %v57_v19  ;;  %v5196_v19 = vand.u32 4294901760, %v125_v60  ;;  %v8090_v63 = vand.u32 4294901760, %v5222_v53  ;;  %v8094_v1 = vand.u32 4294901760, %v5228_v56  ;;  %4128 = vmatpush3.msra.mxu1 %v395_v23  ;;  %v121_v23 = vld [vmem:[%s8086_s3 + $0x38] sm:$0xff] }
  0x99   :  { %v8095_v59 = vand.u32 4294901760, %v5210_v33  ;;  %v8098_v6 = vand.u32 4294901760, %v5237_v62  ;;  %v8104_v15 = vand.u32 4294901760, %v5244_v2  ;;  %v5297_v49 = vand.u32 4294901760, %v121_v23 }
  0x9a   :  { %60 = vmin.xlane.f32.xlu1 %v5066_v20  ;;  %v5213_v34 = vsub.f32 %v125_v60, %v5196_v19  ;;  %4092 = vmatpush3.msra.mxu0 %v5196_v19  ;;  %v408_v10 = vsub.f32 %v5222_v53, %v8090_v63  ;;  %v415_v14 = vsub.f32 %v5228_v56, %v8094_v1  ;;  %v136_v63 = vld [vmem:[%s8086_s3 + $0xb0] sm:$0xff]  ;;  %vm4072_vm3 = vcmask 64512  }
  0x9b   :  { %4093 = vmatprep.subr.mxu0 %v5198_v21  ;;  %v513_v3 = vsub.f32 %v5210_v33, %v8095_v59  ;;  %v534_v1 = vsub.f32 %v5237_v62, %v8098_v6  ;;  %v120_v59 = vld [vmem:[%s8086_s3 + $0x30] sm:$0xff]  ;;  %v5295_v6 = vand.u32 4294901760, %v137_v22  ;;  %v5299_v48 = vand.u32 4294901760, %v136_v63 }
  0x9c   :  { %v8093_v60 = vand.u32 4294901760, %v5213_v34  ;;  %4094 = vmatpush3.msra.mxu0 %v5203_v27  ;;  %v416_v47 = vand.u32 4294901760, %v415_v14  ;;  %v5301_v45 = vand.u32 4294901760, %v120_v59  ;;  %v5321_v12 = vsub.f32 %v135_v58, %v5303_v44 }
  0x9d   :  { %4095 = vmatprep.subr.mxu0 %v5205_v28  ;;  %v514_v0 = vand.u32 4294901760, %v513_v3  ;;  %v409_v3 = vand.u32 4294901760, %v408_v10  ;;  %v5305_v10 = vand.u32 4294901760, %v119_v54  ;;  %v5308_v43 = vsub.f32 %v137_v22, %v5295_v6 }
  0x9e   :  { %v401_v4 = vsub.f32 %v5213_v34, %v8093_v60  ;;  %4096 = vmatpush3.msra.mxu0 %v5207_v29  ;;  %v521_v60 = vand.u32 4294901760, %v520_v5  ;;  %v528_v5 = vand.u32 4294901760, %v527_v11  ;;  %v5314_v11 = vsub.f32 %v136_v63, %v5299_v48  ;;  %8390 = vst [vmem:[#allocation9_spill] sm:$0xff] %v5321_v12 }
  0x9f   :  { %4097 = vmatprep.subr.mxu0 %v5218_v52  ;;  %4129 = vmatprep.subr.mxu1 %v514_v0  ;;  %8386 = vst [vmem:[#allocation5_spill] sm:$0xff] %v5308_v43  ;;  %v5311_v0 = vsub.f32 %v121_v23, %v5297_v49  ;;  %v5318_v14 = vsub.f32 %v120_v59, %v5301_v45  ;;  %v8113_v58 = vand.u32 4294901760, %v5321_v12 }
  0xa0   :  { %v402_v61 = vand.u32 4294901760, %v401_v4  ;;  %v422_v4 = vsub.f32 %v5244_v2, %v8104_v15  ;;  %4098 = vmatpush3.msra.mxu0 %v5230_v57  ;;  %v535_v15 = vand.u32 4294901760, %v534_v1  ;;  %8388 = vst [vmem:[#allocation7_spill] sm:$0xff] %v5314_v11  ;;  %v8108_v1 = vand.u32 4294901760, %v5308_v43 }
  0xa1   :  { %8387 = vst [vmem:[#allocation6_spill] sm:$0xff] %v5311_v0  ;;  %4099 = vmatprep.subr.mxu0 %v5295_v6  ;;  %8389 = vst [vmem:[#allocation8_spill] sm:$0xff] %v5318_v14  ;;  %v8107_v63 = vand.u32 4294901760, %v5311_v0  ;;  %v8109_v22 = vand.u32 4294901760, %v5314_v11  ;;  %v8114_v59 = vand.u32 4294901760, %v5318_v14 }
  0xa2   :  { %4130 = vmatpush3.msra.mxu1 %v402_v61  ;;  %v423_v61 = vand.u32 4294901760, %v422_v4  ;;  %4100 = vmatpush3.msra.mxu0 %v5297_v49 }
  0xa3   :  { %4131 = vmatprep.subr.mxu1 %v521_v60  ;;  %v5324_v60 = vsub.f32 %v119_v54, %v5305_v10  ;;  %4101 = vmatprep.subr.mxu0 %v5299_v48  ;;  %v541_v54 = vsub.f32 %v5308_v43, %v8108_v1  ;;  %v436_v4 = vsub.f32 %v5318_v14, %v8114_v59 }
  0xa4   :  { %4132 = vmatpush3.msra.mxu1 %v409_v3  ;;  %4102 = vmatpush3.msra.mxu0 %v5301_v45  ;;  %v429_v3 = vsub.f32 %v5311_v0, %v8107_v63 }
  0xa5   :  { %8391 = vst [vmem:[#allocation10_spill] sm:$0xff] %v5324_v60  ;;  %4133 = vmatprep.subr.mxu1 %v528_v5  ;;  %v8117_v23 = vand.u32 4294901760, %v5324_v60  ;;  %4103 = vmatprep.subr.mxu0 %v5303_v44  ;;  %v542_v63 = vand.u32 4294901760, %v541_v54  ;;  %v437_v9 = vand.u32 4294901760, %v436_v4 }
  0xa6   :  { %4134 = vmatpush3.msra.mxu1 %v416_v47  ;;  %v548_v47 = vsub.f32 %v5314_v11, %v8109_v22  ;;  %4104 = vmatpush3.msra.mxu0 %v5305_v10  ;;  %v430_v1 = vand.u32 4294901760, %v429_v3 }
  0xa7   :  { %4135 = vmatprep.subr.mxu1 %v535_v15  ;;  %v555_v15 = vsub.f32 %v5321_v12, %v8113_v58  ;;  %v443_v5 = vsub.f32 %v5324_v60, %v8117_v23  ;;  %v40_v58 = vand.u32 65535, %v5053_v13  ;;  %v56_v23 = vand.u32 65535, %v5062_v18 }
  0xa8   :  { %4136 = vmatpush3.msra.mxu1 %v423_v61  ;;  %v549_v22 = vand.u32 4294901760, %v548_v47 }
  0xa9   :  { %4137 = vmatprep.subr.mxu1 %v542_v63  ;;  %v556_v61 = vand.u32 4294901760, %v555_v15  ;;  %v444_v11 = vand.u32 4294901760, %v443_v5  ;;  %v42_v12 = vcvt.s32.f32 %v40_v58  ;;  %v117_v58 = vld [vmem:[%s8086_s3 + $0x18] sm:$0xff]  ;;  %v132_v15 = vld [vmem:[%s8086_s3 + $0x90] sm:$0xff] }
  0xaa   :  { %4138 = vmatpush3.msra.mxu1 %v430_v1  ;;  %v134_v1 = vld [vmem:[%s8086_s3 + $0xa0] sm:$0xff]  ;;  %v5390_v47 = vand.u32 4294901760, %v117_v58 }
  0xab   :  { %4139 = vmatprep.subr.mxu1 %v549_v22  ;;  %v5364_v63 = vand.u32 4294901760, %v134_v1 }
  0xac   :  { %4140 = vmatpush3.msra.mxu1 %v437_v9  ;;  %v118_v9 = vld [vmem:[%s8086_s3 + $0x20] sm:$0xff]  ;;  %8395 = vst [vmem:[#allocation14_spill] sm:$0xff] %v5390_v47 }
  0xad   :  { %4141 = vmatprep.subr.mxu1 %v556_v61  ;;  %v5371_v22 = vand.u32 4294901760, %v118_v9  ;;  %4105 = vmatprep.subr.mxu0 %v5364_v63  ;;  %v5403_v61 = vsub.f32 %v117_v58, %v5390_v47  ;;  %v131_v58 = vld [vmem:[%s8086_s3 + $0x88] sm:$0xff] }
  0xae   :  { %4142 = vmatpush3.msra.mxu1 %v444_v11  ;;  %v58_v11 = vcvt.s32.f32 %v56_v23 }
  0xaf   :  { %v5388_v3 = vsub.f32 %v118_v9, %v5371_v22  ;;  %4106 = vmatpush3.msra.mxu0 %v5371_v22  ;;  %8397 = vst [vmem:[#allocation16_spill] sm:$0xff] %v5403_v61 }
  0xb1   :  { %8394 = vst [vmem:[#allocation13_spill] sm:$0xff] %v5388_v3  ;;  %v8129_v5 = vand.u32 4294901760, %v5388_v3 }
 0x11f   :  { %v5356_v59 = vpop.xlane.xlu1 %44 }
 0x120   :  { %vm46_vm6 = vcmp.eq.f32.partialorder %v5060_v17, %v5356_v59  ;;  %v5379_v17 = vsub.f32 %v134_v1, %v5364_v63  ;;  %v116_v1 = vld [vmem:[%s8086_s3 + $0x10] sm:$0xff] }
 0x121   :  { %v47_v54 = vsel %vm46_vm6, %v42_v12, inf  ;;  %v133_v12 = vld [vmem:[%s8086_s3 + $0x98] sm:$0xff] }
 0x122   :  { %48 = vmin.xlane.f32.xlu0 %v47_v54  ;;  %8392 = vst [vmem:[#allocation11_spill] sm:$0xff] %v5379_v17  ;;  %v5381_v18 = vand.u32 4294901760, %v133_v12  ;;  %v5405_v54 = vand.u32 4294901760, %v132_v15 }
 0x123   :  { %v5369_v13 = vpop.xlane.xlu1 %60 }
 0x124   :  { %vm62_vm7 = vcmp.eq.f32.partialorder %v5066_v20, %v5369_v13  ;;  %8393 = vst [vmem:[#allocation12_spill] sm:$0xff] %v5381_v18  ;;  %v8124_v20 = vand.u32 4294901760, %v5379_v17  ;;  %v5395_v4 = vsub.f32 %v133_v12, %v5381_v18  ;;  %4107 = vmatprep.subr.mxu0 %v5381_v18  ;;  %8398 = vst [vmem:[#allocation17_spill] sm:$0xff] %v5405_v54  ;;  %v5415_v12 = vand.u32 4294901760, %v116_v1 }
 0x125   :  { %v63_v23 = vsel %vm62_vm7, %v58_v11, inf  ;;  %4108 = vmatpush3.msra.mxu0 %v5390_v47  ;;  %v5425_v14 = vsub.f32 %v132_v15, %v5405_v54  ;;  %v5427_v47 = vand.u32 4294901760, %v131_v58  ;;  %v130_v15 = vld [vmem:[%s8086_s3 + $0x80] sm:$0xff]  ;;  %v8402_v18 = vand.u32 4294901760, %v5403_v61 }
 0x126   :  { %64 = vmin.xlane.f32.xlu1 %v63_v23  ;;  %8396 = vst [vmem:[#allocation15_spill] sm:$0xff] %v5395_v4  ;;  %v562_v9 = vsub.f32 %v5379_v17, %v8124_v20  ;;  %8399 = vst [vmem:[#allocation18_spill] sm:$0xff] %v5415_v12  ;;  %v450_v23 = vsub.f32 %v5388_v3, %v8129_v5  ;;  %v115_v20 = vld [vmem:[%s8086_s3 + $0x8] sm:$0xff]  ;;  %4109 = vmatprep.subr.mxu0 %v5405_v54  ;;  %v8401_v17 = vand.u32 4294901760, %v5395_v4 }
 0x127   :  { %8400 = vst [vmem:[#allocation19_spill] sm:$0xff] %v5427_v47  ;;  %v5437_v5 = vsub.f32 %v116_v1, %v5415_v12  ;;  %v5439_v60 = vand.u32 4294901760, %v115_v20  ;;  %4110 = vmatpush3.msra.mxu0 %v5415_v12  ;;  %v8146_v54 = vand.u32 4294901760, %v5425_v14  ;;  %v114_v1 = vld [vmem:[%s8086_s3] sm:$0xff]  ;;  %v5460_v43 = vand.u32 4294901760, %v130_v15 }
 0x128   :  { %v563_v11 = vand.u32 4294901760, %v562_v9  ;;  %v569_v0 = vsub.f32 %v5395_v4, %v8401_v17  ;;  %v451_v3 = vand.u32 4294901760, %v450_v23  ;;  %v457_v9 = vsub.f32 %v5403_v61, %v8402_v18  ;;  %4111 = vmatprep.subr.mxu0 %v5427_v47 }
 0x129   :  { %v5450_v17 = vsub.f32 %v131_v58, %v5427_v47  ;;  %v8147_v12 = vand.u32 4294901760, %v5437_v5  ;;  %v5458_v23 = vsub.f32 %v115_v20, %v5439_v60  ;;  %4112 = vmatpush3.msra.mxu0 %v5439_v60  ;;  %v576_v58 = vsub.f32 %v5425_v14, %v8146_v54 }
 0x12a   :  { %4143 = vmatprep.subr.mxu1 %v563_v11  ;;  %v570_v4 = vand.u32 4294901760, %v569_v0  ;;  %v458_v18 = vand.u32 4294901760, %v457_v9  ;;  %v5467_v47 = vand.u32 4294901760, %v114_v1  ;;  %v5474_v11 = vsub.f32 %v130_v15, %v5460_v43  ;;  %4113 = vmatprep.subr.mxu0 %v5460_v43 }
 0x12b   :  { %8403 = vst [vmem:[#allocation20_spill] sm:$0xff] %v5458_v23  ;;  %4144 = vmatpush3.msra.mxu1 %v451_v3  ;;  %v8148_v61 = vand.u32 4294901760, %v5450_v17  ;;  %v464_v0 = vsub.f32 %v5437_v5, %v8147_v12  ;;  %v8149_v20 = vand.u32 4294901760, %v5458_v23  ;;  %v577_v3 = vand.u32 4294901760, %v576_v58 }
 0x12c   :  { %4145 = vmatprep.subr.mxu1 %v570_v4  ;;  %v5481_v54 = vsub.f32 %v114_v1, %v5467_v47  ;;  %4114 = vmatpush3.msra.mxu0 %v5467_v47  ;;  %v8153_v15 = vand.u32 4294901760, %v5474_v11 }
 0x12d   :  { %4146 = vmatpush3.msra.mxu1 %v458_v18  ;;  %v583_v9 = vsub.f32 %v5450_v17, %v8148_v61  ;;  %v465_v4 = vand.u32 4294901760, %v464_v0  ;;  %v471_v12 = vsub.f32 %v5458_v23, %v8149_v20  ;;  %4159 = vmatprep.subr.mxu0 %v5106_v35  ;;  %v67_v35 = vcvt.f32.s32 %v5369_v13 }
 0x12e   :  { %4147 = vmatprep.subr.mxu1 %v577_v3  ;;  %v8154_v58 = vand.u32 4294901760, %v5481_v54  ;;  %v590_v1 = vsub.f32 %v5474_v11, %v8153_v15  ;;  %v51_v3 = vcvt.f32.s32 %v5356_v59  ;;  %v82_v59 = vld [vmem:[%s8087_s2] sm:$0xff]  ;;  %v5000_v13 = vmov 0.0  }
 0x12f   :  { %v584_v18 = vand.u32 4294901760, %v583_v9  ;;  %4148 = vmatpush3.msra.mxu1 %v465_v4  ;;  %v472_v61 = vand.u32 4294901760, %v471_v12 }
 0x130   :  { %v478_v0 = vsub.f32 %v5481_v54, %v8154_v58  ;;  %v591_v20 = vand.u32 4294901760, %v590_v1  ;;  %v52_v12 = vshll.u32 %v51_v3, 16 }
 0x131   :  { %4149 = vmatprep.subr.mxu1 %v584_v18 }
 0x132   :  { %4150 = vmatpush3.msra.mxu1 %v472_v61  ;;  %v479_v23 = vand.u32 4294901760, %v478_v0 }
 0x133   :  { %4151 = vmatprep.subr.mxu1 %v591_v20  ;;  %v68_v20 = vshll.u32 %v67_v35, 16 }
 0x134   :  { %4152 = vmatpush3.msra.mxu1 %v479_v23  ;;  %v83_v23 = vld [vmem:[%s8087_s2 + $0x8] sm:$0xff] }
 0x135   :  { %4197 = vmatprep.subr.mxu1 %v5078_v24 }
 0x1ab   :  { %v49_v9 = vpop.xlane.xlu0 %48 }
 0x1ac   :  { %v50_v4 = vcvt.f32.s32 %v49_v9 }
 0x1ae   :  { %v5499_v15 = vadd.s32 %v52_v12, %v50_v4  ;;  %v91_v4 = vld [vmem:[%s8087_s2 + $0x48] sm:$0xff] }
 0x1af   :  { %v65_v18 = vpop.xlane.xlu1 %64 }
 0x1b0   :  { %8404 = vst [vmem:[#allocation21_spill] sm:$0xff] %v5499_v15  ;;  %vm70_vm8 = vcmp.eq.s32.totalorder %v5040_v7, %v5499_v15  ;;  %vm71_vm9 = vcmp.eq.s32.totalorder %v5043_v8, %v5499_v15  ;;  %v66_v61 = vcvt.f32.s32 %v65_v18  ;;  %v90_v18 = vld [vmem:[%s8087_s2 + $0x40] sm:$0xff] }
 0x1b1   :  { %v5511_v1 = vsel %vm70_vm8, 1.0, %v5000_v13  ;;  %v5513_v0 = vsel %vm71_vm9, 1.0, %v5000_v13 }
 0x1b2   :  { %8405 = vst [vmem:[#allocation22_spill] sm:$0xff] %v5511_v1  ;;  %8406 = vst [vmem:[#allocation23_spill] sm:$0xff] %v5513_v0  ;;  %v5515_v3 = vadd.s32 %v68_v20, %v66_v61  ;;  %v99_v9 = vmul.f32 %v5513_v0, %v83_v23  ;;  %v98_v12 = vmul.f32 %v5511_v1, %v82_v59  ;;  %v8425_v0 = vld [vmem:[#allocation13_spill] sm:$0xff] }
 0x1b4   :  { %8407 = vst [vmem:[#allocation24_spill] sm:$0xff] %v5515_v3  ;;  %vm72_vm10 = vcmp.eq.s32.totalorder %v5040_v7, %v5515_v3  ;;  %vm73_vm11 = vcmp.eq.s32.totalorder %v5043_v8, %v5515_v3  ;;  %v5529_v35 = vand.u32 4294901760, %v99_v9  ;;  %v5535_v59 = vand.u32 4294901760, %v98_v12 }
 0x1b5   :  { %v5531_v61 = vsel %vm72_vm10, 1.0, %v5000_v13  ;;  %v5533_v23 = vsel %vm73_vm11, 1.0, %v5000_v13 }
 0x1b6   :  { %8408 = vst [vmem:[#allocation25_spill] sm:$0xff] %v5531_v61  ;;  %8409 = vst [vmem:[#allocation26_spill] sm:$0xff] %v5533_v23  ;;  %594 = vmatprep.mubr.f32.mxu1 %v5529_v35  ;;  %v107_v20 = vmul.f32 %v5533_v23, %v91_v4  ;;  %v106_v58 = vmul.f32 %v5531_v61, %v90_v18  ;;  %v339_v15 = vsub.f32 %v99_v9, %v5529_v35 }
 0x1b7   :  { %8410 = vst [vmem:[#allocation27_spill] sm:$0xff] %v5535_v59  ;;  %596 = vmatmul.mubr.f32.vlgmr.msra.gmra.mxu1 %v5535_v59  ;;  %v5543_v7 = vsub.f32 %v98_v12, %v5535_v59  ;;  %v8424_v59 = vld [vmem:[#allocation11_spill] sm:$0xff] }
 0x1b8   :  { %4198 = vmatpush3.msra.mxu1 %v5080_v25  ;;  %v5546_v8 = vand.u32 4294901760, %v107_v20  ;;  %v5548_v13 = vand.u32 4294901760, %v106_v58  ;;  %v340_v3 = vand.u32 4294901760, %v339_v15 }
 0x1b9   :  { %4199 = vmatprep.subr.mxu1 %v5082_v26  ;;  %v8165_v4 = vand.u32 4294901760, %v5543_v7 }
 0x1ba   :  { %8411 = vst [vmem:[#allocation28_spill] sm:$0xff] %v5546_v8  ;;  %8412 = vst [vmem:[#allocation29_spill] sm:$0xff] %v5548_v13  ;;  %4200 = vmatpush3.msra.mxu1 %v5093_v30  ;;  %601 = vmatprep.mubr.f32.mxu1 %v5546_v8  ;;  %v341_v9 = vsub.f32 %v339_v15, %v340_v3  ;;  %v5555_v18 = vsub.f32 %v107_v20, %v5546_v8  ;;  %v8423_v8 = vld [vmem:[#allocation10_spill] sm:$0xff] }
 0x1bb   :  { %v5558_v12 = vsub.f32 %v106_v58, %v5548_v13  ;;  %4201 = vmatprep.subr.mxu1 %v5095_v31  ;;  %603 = vmatmul.mubr.f32.gmra.mxu1 %v5548_v13  ;;  %v347_v61 = vsub.f32 %v5543_v7, %v8165_v4 }
 0x1bc   :  { %4202 = vmatpush3.msra.mxu1 %v5097_v32  ;;  %854 = vmatprep.mubr.f32.mxu1 %v340_v3  ;;  %v342_v23 = vand.u32 4294901760, %v341_v9  ;;  %v8167_v1 = vand.u32 4294901760, %v5555_v18  ;;  %v8417_v9 = vld [vmem:[#allocation7_spill] sm:$0xff] }
 0x1bd   :  { %v8166_v20 = vand.u32 4294901760, %v5558_v12  ;;  %4203 = vmatprep.subr.mxu1 %v5114_v38  ;;  %v348_v58 = vand.u32 4294901760, %v347_v61 }
 0x1be   :  { %4204 = vmatpush3.msra.mxu1 %v5126_v42  ;;  %343 = vmatprep.mubr.f32.mxu0 %v342_v23  ;;  %v356_v13 = vsub.f32 %v5555_v18, %v8167_v1  ;;  %v8414_v23 = vld [vmem:[#allocation12_spill] sm:$0xff]  ;;  %v8422_v1 = vld [vmem:[#allocation19_spill] sm:$0xff] }
 0x1bf   :  { %v362_v4 = vsub.f32 %v5558_v12, %v8166_v20  ;;  %4205 = vmatprep.subr.mxu1 %v5194_v16  ;;  %349 = vmatmul.mubr.f32.vlgmr.msra.gmra.mxu0 %v348_v58  ;;  %v8418_v58 = vld [vmem:[#allocation17_spill] sm:$0xff] }
 0x1c0   :  { %4160 = vmatpush3.msra.mxu0 %v5109_v36  ;;  %4206 = vmatpush3.msra.mxu1 %v5196_v19  ;;  %v357_v3 = vand.u32 4294901760, %v356_v13  ;;  %v8415_v13 = vld [vmem:[#allocation6_spill] sm:$0xff]  ;;  %v8421_v20 = vld [vmem:[#allocation9_spill] sm:$0xff] }
 0x1c1   :  { %v363_v61 = vand.u32 4294901760, %v362_v4  ;;  %4161 = vmatprep.subr.mxu0 %v5112_v37  ;;  %4207 = vmatprep.subr.mxu1 %v5198_v21  ;;  %v8416_v4 = vld [vmem:[#allocation14_spill] sm:$0xff] }
 0x1c2   :  { %4162 = vmatpush3.msra.mxu0 %v5118_v39  ;;  %4208 = vmatpush3.msra.mxu1 %v5203_v27 }
 0x1c3   :  { %358 = vmatprep.mubr.f32.mxu0 %v357_v3  ;;  %4163 = vmatprep.subr.mxu0 %v5121_v40  ;;  %v8419_v3 = vld [vmem:[#allocation8_spill] sm:$0xff] }
 0x1c4   :  { %4209 = vmatprep.subr.mxu1 %v5205_v28  ;;  %364 = vmatmul.mubr.f32.gmra.mxu0 %v363_v61  ;;  %v8420_v61 = vld [vmem:[#allocation18_spill] sm:$0xff] }
 0x1c5   :  { %4164 = vmatpush3.msra.mxu0 %v5124_v41  ;;  %4210 = vmatpush3.msra.mxu1 %v5207_v29 }
 0x1c6   :  { %4165 = vmatprep.subr.mxu0 %v5133_v46  ;;  %738 = vmatprep.mubr.f32.mxu0 %v339_v15  ;;  %v8413_v15 = vld [vmem:[#allocation5_spill] sm:$0xff] }
 0x1c7   :  { %4211 = vmatprep.subr.mxu1 %v5218_v52  ;;  %4166 = vmatpush3.msra.mxu0 %v5140_v50 }
 0x1c8   :  { %4212 = vmatpush3.msra.mxu1 %v5230_v57  ;;  %4167 = vmatprep.subr.mxu0 %v5210_v33 }
 0x1c9   :  { %4213 = vmatprep.subr.mxu1 %v5295_v6  ;;  %4168 = vmatpush3.msra.mxu0 %v5213_v34 }
 0x1ca   :  { %4214 = vmatpush3.msra.mxu1 %v5297_v49  ;;  %4169 = vmatprep.subr.mxu0 %v5216_v51 }
 0x1cb   :  { %4215 = vmatprep.subr.mxu1 %v5299_v48  ;;  %4170 = vmatpush3.msra.mxu0 %v5222_v53 }
 0x1cc   :  { %4216 = vmatpush3.msra.mxu1 %v5301_v45  ;;  %4171 = vmatprep.subr.mxu0 %v5225_v55 }
 0x1cd   :  { %4217 = vmatprep.subr.mxu1 %v5303_v44  ;;  %4172 = vmatpush3.msra.mxu0 %v5228_v56 }
 0x1ce   :  { %4218 = vmatpush3.msra.mxu1 %v5305_v10  ;;  %4173 = vmatprep.subr.mxu0 %v5237_v62 }
 0x1cf   :  { %4219 = vmatprep.subr.mxu1 %v5364_v63  ;;  %4174 = vmatpush3.msra.mxu0 %v5244_v2 }
 0x1d0   :  { %4220 = vmatpush3.msra.mxu1 %v5371_v22  ;;  %4175 = vmatprep.subr.mxu0 %v8413_v15 }
 0x1d1   :  { %4221 = vmatprep.subr.mxu1 %v8414_v23  ;;  %4176 = vmatpush3.msra.mxu0 %v8415_v13 }
 0x1d2   :  { %4222 = vmatpush3.msra.mxu1 %v8416_v4  ;;  %4177 = vmatprep.subr.mxu0 %v8417_v9 }
 0x1d3   :  { %4223 = vmatprep.subr.mxu1 %v8418_v58  ;;  %4178 = vmatpush3.msra.mxu0 %v8419_v3  ;;  %v8426_v58 = vld [vmem:[#allocation15_spill] sm:$0xff] }
 0x1d4   :  { %4224 = vmatpush3.msra.mxu1 %v8420_v61  ;;  %4179 = vmatprep.subr.mxu0 %v8421_v20  ;;  %v8427_v61 = vand.u32 4294901760, %v5543_v7 }
 0x1d5   :  { %4225 = vmatprep.subr.mxu1 %v8422_v1  ;;  %4180 = vmatpush3.msra.mxu0 %v8423_v8  ;;  %v8428_v1 = vld [vmem:[#allocation16_spill] sm:$0xff]  ;;  %v8429_v8 = vand.u32 4294901760, %v5555_v18 }
 0x1d6   :  { %4226 = vmatpush3.msra.mxu1 %v5439_v60  ;;  %4181 = vmatprep.subr.mxu0 %v8424_v59 }
 0x1d7   :  { %4227 = vmatprep.subr.mxu1 %v5460_v43  ;;  %4182 = vmatpush3.msra.mxu0 %v8425_v0 }
 0x1d8   :  { %4228 = vmatpush3.msra.mxu1 %v5467_v47  ;;  %4183 = vmatprep.subr.mxu0 %v8426_v58 }
 0x1d9   :  { %858 = vmatmul.mubr.f32.vlgmr.msra.gmra.mxu1 %v8427_v61  ;;  %4273 = vmatprep.subr.mxu1 %v5078_v24  ;;  %v8430_v61 = vand.u32 4294901760, %v5558_v12  ;;  %v8431_v24 = vld [vmem:[#allocation20_spill] sm:$0xff] }
 0x1da   :  { %4184 = vmatpush3.msra.mxu0 %v8428_v1  ;;  %865 = vmatprep.mubr.f32.mxu1 %v8429_v8  ;;  %v175_v8 = vld [vmem:[%s8086_s3 + $0x1e8] sm:$0xff] }
 0x1db   :  { %4274 = vmatpush3.msra.mxu1 %v5080_v25  ;;  %4185 = vmatprep.subr.mxu0 %v5425_v14  ;;  %v177_v25 = vld [vmem:[%s8086_s3 + $0x1f8] sm:$0xff] }
 0x1dc   :  { %4275 = vmatprep.subr.mxu1 %v5082_v26  ;;  %4186 = vmatpush3.msra.mxu0 %v5437_v5  ;;  %v8432_v26 = vld [vmem:[#allocation4_spill] sm:$0xff] }
 0x1dd   :  { %4276 = vmatpush3.msra.mxu1 %v5093_v30  ;;  %4187 = vmatprep.subr.mxu0 %v5450_v17  ;;  %v8433_v30 = vand.u32 4294901760, %v8432_v26  ;;  %v8444_v26 = vand.u32 4294901760, %v5216_v51  ;;  %v172_v51 = vld [vmem:[%s8086_s3 + $0x1d0] sm:$0xff] }
 0x1de   :  { %869 = vmatmul.mubr.f32.gmra.mxu1 %v8430_v61  ;;  %4277 = vmatprep.subr.mxu1 %v5095_v31  ;;  %v8434_v31 = vand.u32 4294901760, %v5109_v36  ;;  %v176_v36 = vld [vmem:[%s8086_s3 + $0x1f0] sm:$0xff]  ;;  %v5712_v61 = vand.u32 4294901760, %v175_v8 }
 0x1df   :  { %4188 = vmatpush3.msra.mxu0 %v8431_v24  ;;  %4278 = vmatpush3.msra.mxu1 %v5097_v32  ;;  %v5656_v32 = vand.u32 4294901760, %v177_v25 }
 0x1e0   :  { %1146 = vmatprep.mubr.f32.mxu1 %v5529_v35  ;;  %4189 = vmatprep.subr.mxu0 %v5474_v11 }
 0x1e1   :  { %4279 = vmatprep.subr.mxu1 %v5114_v38  ;;  %4190 = vmatpush3.msra.mxu0 %v5481_v54  ;;  %v161_v38 = vld [vmem:[%s8086_s3 + $0x178] sm:$0xff] }
 0x1e2   :  { %4280 = vmatpush3.msra.mxu1 %v5126_v42  ;;  %741 = vmatmul.mubr.f32.vlgmr.msra.gmra.mxu0 %v5543_v7  ;;  %v8435_v42 = vand.u32 4294901760, %v5112_v37  ;;  %v5672_v7 = vand.u32 4294901760, %v161_v38  ;;  %v160_v37 = vld [vmem:[%s8086_s3 + $0x170] sm:$0xff] }
 0x1e3   :  { %4235 = vmatprep.subr.mxu0 %v8433_v30  ;;  %4281 = vmatprep.subr.mxu1 %v5194_v16  ;;  %v8436_v16 = vand.u32 4294901760, %v5118_v39  ;;  %v5681_v39 = vsub.f32 %v177_v25, %v5656_v32 }
 0x1e4   :  { %747 = vmatprep.mubr.f32.mxu0 %v5555_v18  ;;  %4236 = vmatpush3.msra.mxu0 %v8434_v31  ;;  %v5703_v18 = vsub.f32 %v161_v38, %v5672_v7  ;;  %v8446_v31 = vand.u32 4294901760, %v5222_v53  ;;  %v5757_v53 = vsub.f32 %v175_v8, %v5712_v61  ;;  %v8451_v8 = vand.u32 4294901760, %v5237_v62 }
 0x1e5   :  { %4282 = vmatpush3.msra.mxu1 %v5196_v19  ;;  %4237 = vmatprep.subr.mxu0 %v8435_v42  ;;  %v8437_v19 = vand.u32 4294901760, %v5121_v40  ;;  %v8439_v40 = vand.u32 4294901760, %v5133_v46  ;;  %v8441_v46 = vand.u32 4294901760, %v5210_v33  ;;  %v173_v33 = vld [vmem:[%s8086_s3 + $0x1d8] sm:$0xff]  ;;  %v8447_v42 = vand.u32 4294901760, %v5225_v55 }
 0x1e6   :  { %4283 = vmatprep.subr.mxu1 %v5198_v21  ;;  %4238 = vmatpush3.msra.mxu0 %v8436_v16  ;;  %v8438_v21 = vand.u32 4294901760, %v5124_v41  ;;  %v159_v41 = vld [vmem:[%s8086_s3 + $0x168] sm:$0xff]  ;;  %v8176_v38 = vand.u32 4294901760, %v5703_v18  ;;  %8448 = vst [vmem:[#allocation6_spill] sm:$0xff] %v5757_v53  ;;  %v5759_v16 = vand.u32 4294901760, %v173_v33 }
 0x1e7   :  { %4284 = vmatpush3.msra.mxu1 %v5203_v27  ;;  %750 = vmatmul.mubr.f32.gmra.mxu0 %v5558_v12  ;;  %v5686_v27 = vand.u32 4294901760, %v176_v36  ;;  %v8178_v12 = vand.u32 4294901760, %v5681_v39 }
 0x1e8   :  { %4239 = vmatprep.subr.mxu0 %v8437_v19  ;;  %4285 = vmatprep.subr.mxu1 %v5205_v28  ;;  %v5694_v28 = vand.u32 4294901760, %v160_v37  ;;  %v5794_v62 = vsub.f32 %v5703_v18, %v8176_v38  ;;  %v8465_v38 = vld [vmem:[#allocation18_spill] sm:$0xff] }
 0x1e9   :  { %4240 = vmatpush3.msra.mxu0 %v8438_v21  ;;  %1035 = vmatprep.mubr.f32.mxu0 %v5529_v35  ;;  %v8440_v35 = vand.u32 4294901760, %v5140_v50  ;;  %v158_v50 = vld [vmem:[%s8086_s3 + $0x160] sm:$0xff]  ;;  %v5721_v25 = vsub.f32 %v176_v36, %v5686_v27  ;;  %v156_v36 = vld [vmem:[%s8086_s3 + $0x150] sm:$0xff]  ;;  %v171_v21 = vld [vmem:[%s8086_s3 + $0x1c8] sm:$0xff] }
 0x1ea   :  { %4286 = vmatpush3.msra.mxu1 %v5207_v29  ;;  %4241 = vmatprep.subr.mxu0 %v8439_v40  ;;  %v174_v29 = vld [vmem:[%s8086_s3 + $0x1e0] sm:$0xff]  ;;  %v5732_v30 = vsub.f32 %v160_v37, %v5694_v28  ;;  %v5783_v40 = vand.u32 4294901760, %v172_v51 }
 0x1eb   :  { %4287 = vmatprep.subr.mxu1 %v5218_v52  ;;  %4242 = vmatpush3.msra.mxu0 %v8440_v35  ;;  %v8442_v52 = vand.u32 4294901760, %v5213_v34  ;;  %8443 = vst [vmem:[#allocation5_spill] sm:$0xff] %v5721_v25  ;;  %v157_v34 = vld [vmem:[%s8086_s3 + $0x158] sm:$0xff]  ;;  %v8174_v55 = vand.u32 4294901760, %v5721_v25  ;;  %v8453_v35 = vand.u32 4294901760, %v5244_v2 }
 0x1ec   :  { %4288 = vmatpush3.msra.mxu1 %v5230_v57  ;;  %4243 = vmatprep.subr.mxu0 %v8441_v46  ;;  %v5723_v57 = vand.u32 4294901760, %v159_v41  ;;  %8445 = vst [vmem:[#allocation12_spill] sm:$0xff] %v5732_v30  ;;  %v5771_v19 = vand.u32 4294901760, %v157_v34  ;;  %v170_v46 = vld [vmem:[%s8086_s3 + $0x1c0] sm:$0xff] }
 0x1ed   :  { %4289 = vmatprep.subr.mxu1 %v5295_v6  ;;  %4244 = vmatpush3.msra.mxu0 %v8442_v52  ;;  %v5734_v6 = vand.u32 4294901760, %v174_v29  ;;  %v8177_v52 = vand.u32 4294901760, %v5757_v53 }
 0x1ee   :  { %4290 = vmatpush3.msra.mxu1 %v5297_v49  ;;  %4245 = vmatprep.subr.mxu0 %v8444_v26  ;;  %v5743_v49 = vand.u32 4294901760, %v158_v50  ;;  %v5769_v37 = vsub.f32 %v159_v41, %v5723_v57  ;;  %v155_v41 = vld [vmem:[%s8086_s3 + $0x148] sm:$0xff]  ;;  %v5813_v26 = vsub.f32 %v173_v33, %v5759_v16  ;;  %v154_v33 = vld [vmem:[%s8086_s3 + $0x140] sm:$0xff] }
 0x1ef   :  { %4291 = vmatprep.subr.mxu1 %v5299_v48  ;;  %4246 = vmatpush3.msra.mxu0 %v8446_v31  ;;  %v5754_v48 = vsub.f32 %v5681_v39, %v8178_v12  ;;  %v5815_v31 = vand.u32 4294901760, %v171_v21 }
 0x1f0   :  { %4292 = vmatpush3.msra.mxu1 %v5301_v45  ;;  %4247 = vmatprep.subr.mxu0 %v8447_v42  ;;  %v8449_v45 = vand.u32 4294901760, %v5228_v56  ;;  %8450 = vst [vmem:[#allocation14_spill] sm:$0xff] %v5769_v37  ;;  %v5781_v56 = vsub.f32 %v174_v29, %v5734_v6  ;;  %v5799_v29 = vand.u32 4294901760, %v156_v36  ;;  %8456 = vst [vmem:[#allocation9_spill] sm:$0xff] %v5813_v26  ;;  %v8181_v42 = vand.u32 4294901760, %v5769_v37 }
 0x1f1   :  { %4293 = vmatprep.subr.mxu1 %v5303_v44  ;;  %v8175_v44 = vand.u32 4294901760, %v5732_v30  ;;  %v1404_v2 = vand.u32 4294901760, %v5754_v48  ;;  %v5827_v48 = vsub.f32 %v157_v34, %v5771_v19  ;;  %v5844_v34 = vsub.f32 %v172_v51, %v5783_v40 }
 0x1f2   :  { %4248 = vmatpush3.msra.mxu0 %v8449_v45  ;;  %4294 = vmatpush3.msra.mxu1 %v5305_v10  ;;  %8452 = vst [vmem:[#allocation7_spill] sm:$0xff] %v5781_v56  ;;  %v5797_v10 = vsub.f32 %v158_v50, %v5743_v49  ;;  %v85_v50 = vld [vmem:[%s8087_s2 + $0x18] sm:$0xff]  ;;  %v5829_v45 = vand.u32 4294901760, %v155_v41  ;;  %v8466_v51 = vand.u32 4294901760, %v8421_v20  ;;  %v8469_v20 = vld [vmem:[#allocation10_spill] sm:$0xff] }
 0x1f3   :  { %4249 = vmatprep.subr.mxu0 %v8451_v8  ;;  %4295 = vmatprep.subr.mxu1 %v5364_v63  ;;  %v8455_v63 = vand.u32 4294901760, %v8413_v15  ;;  %v5823_v15 = vsub.f32 %v5721_v25, %v8174_v55  ;;  %8458 = vst [vmem:[#allocation11_spill] sm:$0xff] %v5827_v48  ;;  %v8179_v8 = vand.u32 4294901760, %v5781_v56  ;;  %8460 = vst [vmem:[#allocation13_spill] sm:$0xff] %v5844_v34 }
 0x1f4   :  { %4250 = vmatpush3.msra.mxu0 %v8453_v35  ;;  %8454 = vst [vmem:[#allocation8_spill] sm:$0xff] %v5797_v10  ;;  %4296 = vmatpush3.msra.mxu1 %v5371_v22  ;;  %v8457_v22 = vand.u32 4294901760, %v8415_v13  ;;  %v5840_v13 = vsub.f32 %v5732_v30, %v8175_v44  ;;  %v5846_v35 = vand.u32 4294901760, %v170_v46  ;;  %v8180_v55 = vand.u32 4294901760, %v5797_v10 }
 0x1f5   :  { %4251 = vmatprep.subr.mxu0 %v8455_v63  ;;  %4297 = vmatprep.subr.mxu1 %v8414_v23  ;;  %v8459_v23 = vand.u32 4294901760, %v8417_v9  ;;  %v8461_v63 = vld [vmem:[#allocation17_spill] sm:$0xff]  ;;  %v8463_v9 = vld [vmem:[#allocation23_spill] sm:$0xff]  ;;  %v5855_v44 = vsub.f32 %v156_v36, %v5799_v29  ;;  %v5885_v12 = vsub.f32 %v155_v41, %v5829_v45 }
 0x1f6   :  { %4252 = vmatpush3.msra.mxu0 %v8457_v22  ;;  %4298 = vmatpush3.msra.mxu1 %v8416_v4  ;;  %v8462_v22 = vand.u32 4294901760, %v8419_v3  ;;  %v1292_v4 = vand.u32 4294901760, %v5794_v62  ;;  %v5867_v62 = vsub.f32 %v171_v21, %v5815_v31  ;;  %v169_v36 = vld [vmem:[%s8086_s3 + $0x1b8] sm:$0xff]  ;;  %v8182_v21 = vand.u32 4294901760, %v5827_v48 }
 0x1f7   :  { %4253 = vmatprep.subr.mxu0 %v8459_v23  ;;  %4299 = vmatprep.subr.mxu1 %v8461_v63  ;;  %v101_v23 = vmul.f32 %v8463_v9, %v85_v50  ;;  %8464 = vst [vmem:[#allocation15_spill] sm:$0xff] %v5855_v44  ;;  %v5863_v63 = vsub.f32 %v5757_v53, %v8177_v52  ;;  %v5869_v50 = vand.u32 4294901760, %v154_v33  ;;  %8471 = vst [vmem:[#allocation20_spill] sm:$0xff] %v5885_v12  ;;  %v153_v41 = vld [vmem:[%s8086_s3 + $0x138] sm:$0xff] }
 0x1f8   :  { %4254 = vmatpush3.msra.mxu0 %v8462_v22  ;;  %4300 = vmatpush3.msra.mxu1 %v8465_v38  ;;  %8467 = vst [vmem:[#allocation16_spill] sm:$0xff] %v5867_v62  ;;  %v8468_v38 = vld [vmem:[#allocation19_spill] sm:$0xff]  ;;  %v8470_v22 = vand.u32 4294901760, %v8469_v20  ;;  %v5881_v52 = vsub.f32 %v5769_v37, %v8181_v42  ;;  %v8472_v3 = vand.u32 4294901760, %v8424_v59  ;;  %v8481_v42 = vld [vmem:[#allocation28_spill] sm:$0xff]  ;;  %v146_v37 = vld [vmem:[%s8086_s3 + $0x100] sm:$0xff] }
 0x1f9   :  { %4255 = vmatprep.subr.mxu0 %v8466_v51  ;;  %4301 = vmatprep.subr.mxu1 %v8468_v38  ;;  %v1411_v51 = vand.u32 4294901760, %v5823_v15  ;;  %v1299_v38 = vand.u32 4294901760, %v5840_v13  ;;  %v5894_v15 = vsub.f32 %v5781_v56, %v8179_v8  ;;  %v5906_v59 = vand.u32 4294901760, %v101_v23  ;;  %v168_v8 = vld [vmem:[%s8086_s3 + $0x1b0] sm:$0xff]  ;;  %v8479_v20 = vld [vmem:[#allocation27_spill] sm:$0xff] }
 0x1fa   :  { %4256 = vmatpush3.msra.mxu0 %v8470_v22  ;;  %4302 = vmatpush3.msra.mxu1 %v5439_v60  ;;  %v5898_v22 = vsub.f32 %v170_v46, %v5846_v35  ;;  %v8474_v60 = vand.u32 4294901760, %v8425_v0  ;;  %v5911_v13 = vsub.f32 %v5797_v10, %v8180_v55  ;;  %v5914_v46 = vand.u32 4294901760, %v169_v36 }
 0x1fb   :  { %4257 = vmatprep.subr.mxu0 %v8472_v3  ;;  %4303 = vmatprep.subr.mxu1 %v5460_v43  ;;  %8475 = vst [vmem:[#allocation17_spill] sm:$0xff] %v5906_v59  ;;  %v8476_v43 = vand.u32 4294901760, %v8426_v58  ;;  %v1418_v0 = vand.u32 4294901760, %v5863_v63  ;;  %v5930_v3 = vsub.f32 %v154_v33, %v5869_v50  ;;  %v5937_v58 = vsub.f32 %v5827_v48, %v8182_v21  ;;  %v167_v48 = vld [vmem:[%s8086_s3 + $0x1a8] sm:$0xff] }
 0x1fc   :  { %8473 = vst [vmem:[#allocation4_spill] sm:$0xff] %v5898_v22  ;;  %4258 = vmatpush3.msra.mxu0 %v8474_v60  ;;  %4304 = vmatpush3.msra.mxu1 %v5467_v47  ;;  %v8477_v60 = vand.u32 4294901760, %v5813_v26  ;;  %v1306_v47 = vand.u32 4294901760, %v5881_v52  ;;  %v8480_v33 = vand.u32 4294901760, %v8428_v1  ;;  %v8482_v52 = vand.u32 4294901760, %v5844_v34 }
 0x1fd   :  { %4259 = vmatprep.subr.mxu0 %v8476_v43  ;;  %8478 = vst [vmem:[#allocation18_spill] sm:$0xff] %v5930_v3  ;;  %1148 = vmatmul.mubr.f32.vlgmr.msra.gmra.mxu1 %v8479_v20  ;;  %v5940_v43 = vand.u32 4294901760, %v153_v41  ;;  %v5955_v9 = vand.u32 4294901760, %v168_v8  ;;  %v8483_v1 = vand.u32 4294901760, %v5425_v14  ;;  %v5972_v63 = vsub.f32 %v169_v36, %v5914_v46  ;;  %v166_v36 = vld [vmem:[%s8086_s3 + $0x1a0] sm:$0xff] }
 0x1fe   :  { %v5926_v55 = vsub.f32 %v5813_v26, %v8477_v60  ;;  %4349 = vmatprep.subr.mxu1 %v1404_v2  ;;  %v152_v60 = vld [vmem:[%s8086_s3 + $0x130] sm:$0xff]  ;;  %4260 = vmatpush3.msra.mxu0 %v8480_v33  ;;  %v1425_v2 = vand.u32 4294901760, %v5894_v15  ;;  %v5952_v21 = vsub.f32 %v5844_v34, %v8482_v52  ;;  %v1313_v33 = vand.u32 4294901760, %v5911_v13 }
 0x1ff   :  { %1153 = vmatprep.mubr.f32.mxu1 %v8481_v42  ;;  %4350 = vmatpush3.msra.mxu1 %v1292_v4  ;;  %v8484_v15 = vand.u32 4294901760, %v5855_v44  ;;  %v5969_v52 = vsub.f32 %v101_v23, %v5906_v59  ;;  %8485 = vst [vmem:[#allocation19_spill] sm:$0xff] %v5972_v63  ;;  %v151_v4 = vld [vmem:[%s8086_s3 + $0x128] sm:$0xff]  ;;  %v8486_v14 = vand.u32 4294901760, %v5437_v5  ;;  %v1320_v5 = vand.u32 4294901760, %v5937_v58 }
 0x200   :  { %4261 = vmatprep.subr.mxu0 %v8483_v1  ;;  %4351 = vmatprep.subr.mxu1 %v1411_v51  ;;  %v1432_v13 = vand.u32 4294901760, %v5926_v55  ;;  %v8487_v1 = vand.u32 4294901760, %v5867_v62  ;;  %v8488_v51 = vand.u32 4294901760, %v5450_v17  ;;  %v8489_v55 = vand.u32 4294901760, %v5885_v12 }
 0x201   :  { %v5966_v26 = vsub.f32 %v5855_v44, %v8484_v15  ;;  %4262 = vmatpush3.msra.mxu0 %v8486_v14  ;;  %v5986_v44 = vand.u32 4294901760, %v152_v60  ;;  %4352 = vmatpush3.msra.mxu1 %v1299_v38  ;;  %v6002_v23 = vand.u32 4294901760, %v167_v48  ;;  %v8491_v38 = vld [vmem:[#allocation29_spill] sm:$0xff]  ;;  %v1439_v17 = vand.u32 4294901760, %v5952_v21 }
 0x202   :  { %v5983_v15 = vsub.f32 %v5867_v62, %v8487_v1  ;;  %4263 = vmatprep.subr.mxu0 %v8488_v51  ;;  %v5997_v14 = vsub.f32 %v5885_v12, %v8489_v55  ;;  %v6000_v1 = vsub.f32 %v153_v41, %v5940_v43  ;;  %v150_v62 = vld [vmem:[%s8086_s3 + $0x120] sm:$0xff]  ;;  %1155 = vmatmul.mubr.f32.gmra.mxu1 %v8491_v38  ;;  %v8492_v58 = vand.u32 4294901760, %v5898_v22  ;;  %v165_v12 = vld [vmem:[%s8086_s3 + $0x198] sm:$0xff] }
 0x203   :  { %4353 = vmatprep.subr.mxu1 %v1418_v0  ;;  %v6015_v55 = vsub.f32 %v168_v8, %v5955_v9  ;;  %v6017_v41 = vand.u32 4294901760, %v151_v4  ;;  %v8494_v34 = vand.u32 4294901760, %v8431_v24  ;;  %v1327_v21 = vand.u32 4294901760, %v5966_v26  ;;  %v149_v8 = vld [vmem:[%s8086_s3 + $0x118] sm:$0xff]  ;;  %1512 = vmatprep.mubr.f32.mxu1 %v5906_v59  ;;  %v164_v0 = vld [vmem:[%s8086_s3 + $0x190] sm:$0xff] }
 0x204   :  { %8490 = vst [vmem:[#allocation10_spill] sm:$0xff] %v6000_v1  ;;  %v6012_v51 = vsub.f32 %v5898_v22, %v8492_v58  ;;  %4354 = vmatpush3.msra.mxu1 %v1306_v47  ;;  %v6027_v22 = vand.u32 4294901760, %v166_v36  ;;  %v8495_v10 = vand.u32 4294901760, %v5474_v11  ;;  %v1446_v24 = vand.u32 4294901760, %v5983_v15 }
 0x205   :  { %8493 = vst [vmem:[#allocation27_spill] sm:$0xff] %v6015_v55  ;;  %4264 = vmatpush3.msra.mxu0 %v8494_v34  ;;  %v8496_v34 = vand.u32 4294901760, %v5930_v3  ;;  %v6042_v47 = vsub.f32 %v152_v60, %v5986_v44  ;;  %v6044_v58 = vand.u32 4294901760, %v150_v62  ;;  %4355 = vmatprep.subr.mxu1 %v1425_v2  ;;  %v8497_v11 = vand.u32 4294901760, %v5481_v54  ;;  %v148_v60 = vld [vmem:[%s8086_s3 + $0x110] sm:$0xff] }
 0x206   :  { %4265 = vmatprep.subr.mxu0 %v8495_v10  ;;  %v1334_v10 = vand.u32 4294901760, %v5997_v14  ;;  %v6056_v59 = vand.u32 4294901760, %v165_v12  ;;  %4356 = vmatpush3.msra.mxu1 %v1313_v33  ;;  %v1453_v2 = vand.u32 4294901760, %v6012_v51  ;;  %v6065_v14 = vsub.f32 %v151_v4, %v6017_v41 }
 0x207   :  { %v6039_v26 = vsub.f32 %v5930_v3, %v8496_v34  ;;  %4266 = vmatpush3.msra.mxu0 %v8497_v11  ;;  %v6054_v34 = vsub.f32 %v167_v48, %v6002_v23  ;;  %v6067_v11 = vand.u32 4294901760, %v149_v8  ;;  %v163_v48 = vld [vmem:[%s8086_s3 + $0x188] sm:$0xff]  ;;  %4357 = vmatprep.subr.mxu1 %v1432_v13  ;;  %v8500_v33 = vand.u32 4294901760, %v5969_v52 }
 0x208   :  { %1037 = vmatmul.mubr.f32.vlgmr.msra.gmra.mxu0 %v8479_v20  ;;  %8498 = vst [vmem:[#allocation28_spill] sm:$0xff] %v6065_v14  ;;  %4311 = vmatprep.subr.mxu0 %v5656_v32  ;;  %v8501_v51 = vand.u32 4294901760, %v5972_v63  ;;  %v6080_v4 = vsub.f32 %v166_v36, %v6027_v22  ;;  %v6082_v15 = vand.u32 4294901760, %v164_v0  ;;  %v147_v3 = vld [vmem:[%s8086_s3 + $0x108] sm:$0xff]  ;;  %v6092_v56 = vsub.f32 %v150_v62, %v6044_v58  ;;  %v162_v36 = vld [vmem:[%s8086_s3 + $0x180] sm:$0xff] }
 0x209   :  { %8499 = vst [vmem:[#allocation29_spill] sm:$0xff] %v6067_v11  ;;  %v1259_v20 = vsub.f32 %v5969_v52, %v8500_v33  ;;  %1042 = vmatprep.mubr.f32.mxu0 %v8481_v42  ;;  %4312 = vmatpush3.msra.mxu0 %v5672_v7  ;;  %v1341_v13 = vand.u32 4294901760, %v6039_v26  ;;  %v8506_v42 = vand.u32 4294901760, %v6000_v1  ;;  %v6105_v33 = vsub.f32 %v165_v12, %v6056_v59 }
 0x20a   :  { %v1459_v54 = vsub.f32 %v5972_v63, %v8501_v51  ;;  %8502 = vst [vmem:[#allocation30_spill] sm:$0xff] %v6080_v4  ;;  %8503 = vst [vmem:[#allocation31_spill] sm:$0xff] %v6082_v15  ;;  %v6094_v51 = vand.u32 4294901760, %v148_v60  ;;  %4358 = vmatpush3.msra.mxu1 %v1320_v5  ;;  %4313 = vmatprep.subr.mxu0 %v5686_v27  ;;  %v6107_v62 = vand.u32 4294901760, %v163_v48  ;;  %v8508_v5 = vand.u32 4294901760, %v6015_v55 }
 0x20b   :  { %8504 = vst [vmem:[#allocation32_spill] sm:$0xff] %v6092_v56  ;;  %v1347_v63 = vsub.f32 %v6000_v1, %v8506_v42  ;;  %8507 = vst [vmem:[#allocation34_spill] sm:$0xff] %v6105_v33  ;;  %4359 = vmatprep.subr.mxu1 %v1439_v17  ;;  %4314 = vmatpush3.msra.mxu0 %v5694_v28  ;;  %v6118_v26 = vsub.f32 %v149_v8, %v6067_v11  ;;  %v6120_v12 = vand.u32 4294901760, %v147_v3 }
 0x20c   :  { %8505 = vst [vmem:[#allocation33_spill] sm:$0xff] %v6094_v51  ;;  %v1466_v53 = vsub.f32 %v6015_v55, %v8508_v5  ;;  %4360 = vmatpush3.msra.mxu1 %v1327_v21  ;;  %1044 = vmatmul.mubr.f32.gmra.mxu0 %v8491_v38  ;;  %v1260_v1 = vand.u32 4294901760, %v1259_v20  ;;  %v6125_v17 = vsub.f32 %v164_v0, %v6082_v15  ;;  %v6127_v25 = vand.u32 4294901760, %v162_v36 }
 0x20d   :  { %4315 = vmatprep.subr.mxu0 %v5712_v61  ;;  %4361 = vmatprep.subr.mxu1 %v1446_v24  ;;  %v8510_v5 = vand.u32 4294901760, %v6042_v47  ;;  %v6135_v21 = vsub.f32 %v148_v60, %v6094_v51  ;;  %v6137_v38 = vand.u32 4294901760, %v146_v37  ;;  %v1460_v0 = vand.u32 4294901760, %v1459_v54 }
 0x20e   :  { %8509 = vst [vmem:[#allocation35_spill] sm:$0xff] %v6125_v17  ;;  %4316 = vmatpush3.msra.mxu0 %v5723_v57  ;;  %1261 = vmatprep.mubr.f32.mxu0 %v1260_v1  ;;  %v8511_v20 = vand.u32 4294901760, %v6054_v34  ;;  %v6145_v55 = vsub.f32 %v163_v48, %v6107_v62  ;;  %v1348_v60 = vand.u32 4294901760, %v1347_v63  ;;  %v6153_v54 = vsub.f32 %v147_v3, %v6120_v12 }
 0x20f   :  { %v1354_v8 = vsub.f32 %v6042_v47, %v8510_v5  ;;  %4362 = vmatpush3.msra.mxu1 %v1334_v10  ;;  %4317 = vmatprep.subr.mxu0 %v5734_v6  ;;  %v8512_v5 = vand.u32 4294901760, %v6065_v14  ;;  %v8513_v48 = vand.u32 4294901760, %v6080_v4  ;;  %v6161_v63 = vsub.f32 %v162_v36, %v6127_v25 }
 0x210   :  { %v1473_v30 = vsub.f32 %v6054_v34, %v8511_v20  ;;  %4363 = vmatprep.subr.mxu1 %v1453_v2  ;;  %4318 = vmatpush3.msra.mxu0 %v5743_v49  ;;  %v1467_v20 = vand.u32 4294901760, %v1466_v53  ;;  %v8514_v3 = vand.u32 4294901760, %v6092_v56  ;;  %v6169_v53 = vsub.f32 %v146_v37, %v6137_v38 }
 0x211   :  { %v1361_v42 = vsub.f32 %v6065_v14, %v8512_v5  ;;  %v1480_v10 = vsub.f32 %v6080_v4, %v8513_v48  ;;  %4364 = vmatpush3.msra.mxu1 %v1341_v13  ;;  %4319 = vmatprep.subr.mxu0 %v5759_v16  ;;  %v1355_v5 = vand.u32 4294901760, %v1354_v8  ;;  %v84_v48 = vld [vmem:[%s8087_s2 + $0x10] sm:$0xff]  ;;  %v8515_v36 = vand.u32 4294901760, %v6105_v33 }
 0x212   :  { %v1368_v2 = vsub.f32 %v6092_v56, %v8514_v3  ;;  %4365 = vmatprep.subr.mxu1 %v1460_v0  ;;  %4320 = vmatpush3.msra.mxu0 %v5771_v19  ;;  %v1474_v13 = vand.u32 4294901760, %v1473_v30  ;;  %v8516_v37 = vand.u32 4294901760, %v6118_v26  ;;  %v8517_v0 = vand.u32 4294901760, %v6125_v17 }
 0x213   :  { %v1487_v8 = vsub.f32 %v6105_v33, %v8515_v36  ;;  %4366 = vmatpush3.msra.mxu1 %v1348_v60  ;;  %4321 = vmatprep.subr.mxu0 %v5783_v40  ;;  %v1362_v3 = vand.u32 4294901760, %v1361_v42  ;;  %v1481_v30 = vand.u32 4294901760, %v1480_v10  ;;  %v93_v42 = vld [vmem:[%s8087_s2 + $0x58] sm:$0xff]  ;;  %v8518_v60 = vld [vmem:[#allocation22_spill] sm:$0xff]  ;;  %v8225_v56 = vand.u32 4294901760, %v6169_v53 }
 0x214   :  { %v1375_v1 = vsub.f32 %v6118_v26, %v8516_v37  ;;  %4367 = vmatprep.subr.mxu1 %v1467_v20  ;;  %4322 = vmatpush3.msra.mxu0 %v5799_v29  ;;  %v1494_v36 = vsub.f32 %v6125_v17, %v8517_v0  ;;  %v100_v33 = vmul.f32 %v8518_v60, %v84_v48  ;;  %v1369_v37 = vand.u32 4294901760, %v1368_v2  ;;  %v8522_v60 = vld [vmem:[#allocation26_spill] sm:$0xff] }
 0x215   :  { %4368 = vmatpush3.msra.mxu1 %v1355_v5  ;;  %4323 = vmatprep.subr.mxu0 %v5815_v31  ;;  %v8519_v20 = vand.u32 4294901760, %v6135_v21  ;;  %v1488_v0 = vand.u32 4294901760, %v1487_v8  ;;  %v8520_v24 = vand.u32 4294901760, %v6145_v55  ;;  %v8521_v2 = vand.u32 4294901760, %v6153_v54 }
 0x216   :  { %4369 = vmatprep.subr.mxu1 %v1474_v13  ;;  %4324 = vmatpush3.msra.mxu0 %v5829_v45  ;;  %v1376_v5 = vand.u32 4294901760, %v1375_v1  ;;  %v92_v13 = vld [vmem:[%s8087_s2 + $0x50] sm:$0xff]  ;;  %v1495_v8 = vand.u32 4294901760, %v1494_v36 }
 0x217   :  { %v1382_v10 = vsub.f32 %v6135_v21, %v8519_v20  ;;  %v1501_v17 = vsub.f32 %v6145_v55, %v8520_v24  ;;  %4370 = vmatpush3.msra.mxu1 %v1362_v3  ;;  %4325 = vmatprep.subr.mxu0 %v5846_v35  ;;  %v1389_v48 = vsub.f32 %v6153_v54, %v8521_v2  ;;  %v8523_v24 = vand.u32 4294901760, %v6161_v63 }
 0x218   :  { %v109_v20 = vmul.f32 %v8522_v60, %v93_v42  ;;  %4371 = vmatprep.subr.mxu1 %v1481_v30  ;;  %4326 = vmatpush3.msra.mxu0 %v5869_v50  ;;  %v1396_v42 = vsub.f32 %v6169_v53, %v8225_v56  ;;  %v6218_v2 = vand.u32 4294901760, %v100_v33  ;;  %v8525_v60 = vld [vmem:[#allocation25_spill] sm:$0xff] }
 0x219   :  { %v1508_v3 = vsub.f32 %v6161_v63, %v8523_v24  ;;  %4372 = vmatpush3.msra.mxu1 %v1369_v37  ;;  %4327 = vmatprep.subr.mxu0 %v5914_v46  ;;  %v1383_v1 = vand.u32 4294901760, %v1382_v10  ;;  %v1502_v30 = vand.u32 4294901760, %v1501_v17  ;;  %v108_v36 = vmul.f32 %v8525_v60, %v92_v13  ;;  %v8542_v60 = vld [vmem:[#allocation18_spill] sm:$0xff] }
 0x21a   :  { %8524 = vst [vmem:[#allocation36_spill] sm:$0xff] %v6218_v2  ;;  %4373 = vmatprep.subr.mxu1 %v1488_v0  ;;  %4328 = vmatpush3.msra.mxu0 %v5940_v43  ;;  %v1390_v24 = vand.u32 4294901760, %v1389_v48  ;;  %v6223_v37 = vand.u32 4294901760, %v109_v20  ;;  %v1397_v56 = vand.u32 4294901760, %v1396_v42  ;;  %v6228_v0 = vsub.f32 %v100_v33, %v6218_v2 }
 0x21b   :  { %4374 = vmatpush3.msra.mxu1 %v1376_v5  ;;  %4329 = vmatprep.subr.mxu0 %v5955_v9  ;;  %v1509_v10 = vand.u32 4294901760, %v1508_v3  ;;  %v6231_v17 = vand.u32 4294901760, %v108_v36  ;;  %v8528_v3 = vand.u32 4294901760, %v5969_v52 }
 0x21c   :  { %8526 = vst [vmem:[#allocation37_spill] sm:$0xff] %v6223_v37  ;;  %4375 = vmatprep.subr.mxu1 %v1495_v8  ;;  %4330 = vmatpush3.msra.mxu0 %v5986_v44  ;;  %v6235_v5 = vsub.f32 %v109_v20, %v6223_v37  ;;  %v8228_v33 = vand.u32 4294901760, %v6228_v0 }
 0x21d   :  { %4376 = vmatpush3.msra.mxu1 %v1383_v1  ;;  %4331 = vmatprep.subr.mxu0 %v6002_v23  ;;  %8527 = vst [vmem:[#allocation38_spill] sm:$0xff] %v6231_v17  ;;  %v6243_v48 = vsub.f32 %v108_v36, %v6231_v17  ;;  %v8529_v36 = vld [vmem:[#allocation5_spill] sm:$0xff] }
 0x21e   :  { %4377 = vmatprep.subr.mxu1 %v1502_v30  ;;  %4332 = vmatpush3.msra.mxu0 %v6017_v41  ;;  %v8227_v20 = vand.u32 4294901760, %v6235_v5 }
 0x21f   :  { %4378 = vmatpush3.msra.mxu1 %v1390_v24  ;;  %4333 = vmatprep.subr.mxu0 %v6027_v22  ;;  %v8226_v13 = vand.u32 4294901760, %v6243_v48 }
 0x220   :  { %4379 = vmatprep.subr.mxu1 %v1509_v10  ;;  %4334 = vmatpush3.msra.mxu0 %v6044_v58  ;;  %v1274_v8 = vsub.f32 %v6235_v5, %v8227_v20  ;;  %v8530_v10 = vld [vmem:[#allocation12_spill] sm:$0xff] }
 0x221   :  { %4380 = vmatpush3.msra.mxu1 %v1397_v56  ;;  %4335 = vmatprep.subr.mxu0 %v6056_v59  ;;  %v1265_v56 = vsub.f32 %v6228_v0, %v8228_v33  ;;  %v1280_v42 = vsub.f32 %v6243_v48, %v8226_v13  ;;  %v8539_v13 = vld [vmem:[#allocation16_spill] sm:$0xff] }
 0x222   :  { %1514 = vmatmul.mubr.f32.vlgmr.msra.gmra.mxu1 %v6218_v2  ;;  %4425 = vmatprep.subr.mxu1 %v5656_v32  ;;  %v1275_v30 = vand.u32 4294901760, %v1274_v8  ;;  %v8532_v8 = vld [vmem:[#allocation14_spill] sm:$0xff]  ;;  %v8540_v20 = vld [vmem:[#allocation20_spill] sm:$0xff]  ;;  %v8545_v2 = vld [vmem:[#allocation27_spill] sm:$0xff] }
 0x223   :  { %4336 = vmatpush3.msra.mxu0 %v6067_v11  ;;  %1519 = vmatprep.mubr.f32.mxu1 %v6223_v37  ;;  %v1266_v1 = vand.u32 4294901760, %v1265_v56  ;;  %v1281_v24 = vand.u32 4294901760, %v1280_v42  ;;  %v8531_v56 = vld [vmem:[#allocation6_spill] sm:$0xff]  ;;  %v8535_v42 = vld [vmem:[#allocation9_spill] sm:$0xff]  ;;  %v8541_v33 = vld [vmem:[#allocation4_spill] sm:$0xff] }
 0x224   :  { %4426 = vmatpush3.msra.mxu1 %v5672_v7  ;;  %4337 = vmatprep.subr.mxu0 %v6082_v15  ;;  %v8544_v37 = vld [vmem:[#allocation10_spill] sm:$0xff] }
 0x225   :  { %4427 = vmatprep.subr.mxu1 %v5686_v27  ;;  %4338 = vmatpush3.msra.mxu0 %v6094_v51 }
 0x226   :  { %4428 = vmatpush3.msra.mxu1 %v5694_v28  ;;  %4339 = vmatprep.subr.mxu0 %v6107_v62 }
 0x227   :  { %1521 = vmatmul.mubr.f32.gmra.mxu1 %v6231_v17  ;;  %4429 = vmatprep.subr.mxu1 %v5712_v61  ;;  %v8543_v17 = vld [vmem:[#allocation19_spill] sm:$0xff] }
 0x228   :  { %4340 = vmatpush3.msra.mxu0 %v6120_v12  ;;  %4430 = vmatpush3.msra.mxu1 %v5723_v57 }
 0x229   :  { %1772 = vmatprep.mubr.f32.mxu1 %v8528_v3  ;;  %4341 = vmatprep.subr.mxu0 %v6127_v25  ;;  %v8533_v3 = vld [vmem:[#allocation7_spill] sm:$0xff] }
 0x22a   :  { %4431 = vmatprep.subr.mxu1 %v5734_v6  ;;  %4342 = vmatpush3.msra.mxu0 %v6137_v38 }
 0x22b   :  { %4432 = vmatpush3.msra.mxu1 %v5743_v49  ;;  %1267 = vmatmul.mubr.f32.vlgmr.msra.gmra.mxu0 %v1266_v1  ;;  %v8534_v1 = vld [vmem:[#allocation8_spill] sm:$0xff] }
 0x22c   :  { %4387 = vmatprep.subr.mxu0 %v5681_v39  ;;  %4433 = vmatprep.subr.mxu1 %v5759_v16 }
 0x22d   :  { %1276 = vmatprep.mubr.f32.mxu0 %v1275_v30  ;;  %4388 = vmatpush3.msra.mxu0 %v5703_v18  ;;  %v8536_v30 = vld [vmem:[#allocation11_spill] sm:$0xff] }
 0x22e   :  { %4434 = vmatpush3.msra.mxu1 %v5771_v19  ;;  %4389 = vmatprep.subr.mxu0 %v8529_v36 }
 0x22f   :  { %4435 = vmatprep.subr.mxu1 %v5783_v40  ;;  %4390 = vmatpush3.msra.mxu0 %v8530_v10 }
 0x230   :  { %4436 = vmatpush3.msra.mxu1 %v5799_v29  ;;  %1282 = vmatmul.mubr.f32.gmra.mxu0 %v1281_v24  ;;  %v8537_v24 = vld [vmem:[#allocation13_spill] sm:$0xff] }
 0x231   :  { %4391 = vmatprep.subr.mxu0 %v8531_v56  ;;  %4437 = vmatprep.subr.mxu1 %v5815_v31 }
 0x232   :  { %4392 = vmatpush3.msra.mxu0 %v8532_v8  ;;  %1656 = vmatprep.mubr.f32.mxu0 %v5969_v52  ;;  %v8538_v52 = vld [vmem:[#allocation15_spill] sm:$0xff] }
 0x233   :  { %4438 = vmatpush3.msra.mxu1 %v5829_v45  ;;  %4393 = vmatprep.subr.mxu0 %v8533_v3 }
 0x234   :  { %4439 = vmatprep.subr.mxu1 %v5846_v35  ;;  %4394 = vmatpush3.msra.mxu0 %v8534_v1 }
 0x235   :  { %4440 = vmatpush3.msra.mxu1 %v5869_v50  ;;  %4395 = vmatprep.subr.mxu0 %v8535_v42 }
 0x236   :  { %4441 = vmatprep.subr.mxu1 %v5914_v46  ;;  %4396 = vmatpush3.msra.mxu0 %v8536_v30 }
 0x237   :  { %4442 = vmatpush3.msra.mxu1 %v5940_v43  ;;  %4397 = vmatprep.subr.mxu0 %v8537_v24 }
 0x238   :  { %4443 = vmatprep.subr.mxu1 %v5955_v9  ;;  %4398 = vmatpush3.msra.mxu0 %v8538_v52 }
 0x239   :  { %4444 = vmatpush3.msra.mxu1 %v5986_v44  ;;  %4399 = vmatprep.subr.mxu0 %v8539_v13 }
 0x23a   :  { %4445 = vmatprep.subr.mxu1 %v6002_v23  ;;  %4400 = vmatpush3.msra.mxu0 %v8540_v20 }
 0x23b   :  { %4446 = vmatpush3.msra.mxu1 %v6017_v41  ;;  %4401 = vmatprep.subr.mxu0 %v8541_v33 }
 0x23c   :  { %4447 = vmatprep.subr.mxu1 %v6027_v22  ;;  %4402 = vmatpush3.msra.mxu0 %v8542_v60 }
 0x23d   :  { %4448 = vmatpush3.msra.mxu1 %v6044_v58  ;;  %4403 = vmatprep.subr.mxu0 %v8543_v17 }
 0x23e   :  { %4449 = vmatprep.subr.mxu1 %v6056_v59  ;;  %4404 = vmatpush3.msra.mxu0 %v8544_v37 }
 0x23f   :  { %4450 = vmatpush3.msra.mxu1 %v6067_v11  ;;  %4405 = vmatprep.subr.mxu0 %v8545_v2  ;;  %v8546_v11 = vld [vmem:[#allocation32_spill] sm:$0xff] }
 0x240   :  { %4451 = vmatprep.subr.mxu1 %v6082_v15  ;;  %4406 = vmatpush3.msra.mxu0 %v6042_v47  ;;  %v8547_v15 = vld [vmem:[#allocation34_spill] sm:$0xff] }
 0x241   :  { %4452 = vmatpush3.msra.mxu1 %v6094_v51  ;;  %4407 = vmatprep.subr.mxu0 %v6054_v34  ;;  %v8548_v51 = vand.u32 4294901760, %v6228_v0 }
 0x242   :  { %4453 = vmatprep.subr.mxu1 %v6107_v62  ;;  %4408 = vmatpush3.msra.mxu0 %v6065_v14  ;;  %v8549_v14 = vand.u32 4294901760, %v6235_v5 }
 0x243   :  { %4454 = vmatpush3.msra.mxu1 %v6120_v12  ;;  %4409 = vmatprep.subr.mxu0 %v6080_v4  ;;  %v8550_v4 = vld [vmem:[#allocation35_spill] sm:$0xff] }
 0x244   :  { %4455 = vmatprep.subr.mxu1 %v6127_v25  ;;  %4410 = vmatpush3.msra.mxu0 %v8546_v11 }
 0x245   :  { %4456 = vmatpush3.msra.mxu1 %v6137_v38  ;;  %4411 = vmatprep.subr.mxu0 %v8547_v15 }
 0x246   :  { %1776 = vmatmul.mubr.f32.vlgmr.msra.gmra.mxu1 %v8548_v51  ;;  %4501 = vmatprep.subr.mxu1 %v5656_v32  ;;  %v8551_v51 = vand.u32 4294901760, %v6243_v48  ;;  %v87_v32 = vld [vmem:[%s8087_s2 + $0x28] sm:$0xff] }
 0x247   :  { %4412 = vmatpush3.msra.mxu0 %v6118_v26  ;;  %1783 = vmatprep.mubr.f32.mxu1 %v8549_v14 }
 0x248   :  { %4502 = vmatpush3.msra.mxu1 %v5672_v7  ;;  %4413 = vmatprep.subr.mxu0 %v8550_v4  ;;  %v8552_v7 = vld [vmem:[#allocation17_spill] sm:$0xff] }
 0x249   :  { %4503 = vmatprep.subr.mxu1 %v5686_v27  ;;  %4414 = vmatpush3.msra.mxu0 %v6135_v21  ;;  %v8553_v27 = vld [vmem:[#allocation23_spill] sm:$0xff] }
 0x24a   :  { %4504 = vmatpush3.msra.mxu1 %v5694_v28  ;;  %4415 = vmatprep.subr.mxu0 %v6145_v55  ;;  %v103_v28 = vmul.f32 %v8553_v27, %v87_v32 }
 0x24b   :  { %1787 = vmatmul.mubr.f32.gmra.mxu1 %v8551_v51  ;;  %4505 = vmatprep.subr.mxu1 %v5712_v61  ;;  %v8554_v61 = vand.u32 4294901760, %v5681_v39  ;;  %v8558_v39 = vand.u32 4294901760, %v8530_v10  ;;  %v8562_v10 = vand.u32 4294901760, %v8534_v1  ;;  %v8564_v1 = vand.u32 4294901760, %v8536_v30  ;;  %v205_v30 = vld [vmem:[%s8086_s3 + $0x2d8] sm:$0xff] }
 0x24c   :  { %4416 = vmatpush3.msra.mxu0 %v6153_v54  ;;  %4506 = vmatpush3.msra.mxu1 %v5723_v57  ;;  %v8555_v57 = vand.u32 4294901760, %v5703_v18  ;;  %v6363_v14 = vand.u32 4294901760, %v103_v28  ;;  %v193_v18 = vld [vmem:[%s8086_s3 + $0x278] sm:$0xff] }
 0x24d   :  { %2064 = vmatprep.mubr.f32.mxu1 %v8552_v7  ;;  %4417 = vmatprep.subr.mxu0 %v6161_v63 }
 0x24e   :  { %4507 = vmatprep.subr.mxu1 %v5734_v6  ;;  %4418 = vmatpush3.msra.mxu0 %v6169_v53  ;;  %v8556_v6 = vand.u32 4294901760, %v8529_v36  ;;  %8557 = vst [vmem:[#allocation5_spill] sm:$0xff] %v6363_v14  ;;  %v207_v36 = vld [vmem:[%s8086_s3 + $0x2e8] sm:$0xff] }
 0x24f   :  { %4508 = vmatpush3.msra.mxu1 %v5743_v49  ;;  %1659 = vmatmul.mubr.f32.vlgmr.msra.gmra.mxu0 %v6228_v0  ;;  %v209_v49 = vld [vmem:[%s8086_s3 + $0x2f8] sm:$0xff]  ;;  %v8560_v0 = vand.u32 4294901760, %v8532_v8  ;;  %v8563_v8 = vand.u32 4294901760, %v8535_v42  ;;  %v6420_v32 = vand.u32 4294901760, %v207_v36 }
 0x250   :  { %4463 = vmatprep.subr.mxu0 %v8554_v61  ;;  %4509 = vmatprep.subr.mxu1 %v5759_v16  ;;  %v8559_v16 = vand.u32 4294901760, %v8531_v56  ;;  %v8566_v61 = vand.u32 4294901760, %v8538_v52 }
 0x251   :  { %1665 = vmatprep.mubr.f32.mxu0 %v6235_v5  ;;  %4464 = vmatpush3.msra.mxu0 %v8555_v57  ;;  %v6388_v5 = vsub.f32 %v103_v28, %v6363_v14 }
 0x252   :  { %4510 = vmatpush3.msra.mxu1 %v5771_v19  ;;  %4465 = vmatprep.subr.mxu0 %v8556_v6  ;;  %v6376_v19 = vand.u32 4294901760, %v209_v49  ;;  %v8568_v6 = vand.u32 4294901760, %v8539_v13  ;;  %v6466_v13 = vand.u32 4294901760, %v205_v30 }
 0x253   :  { %4511 = vmatprep.subr.mxu1 %v5783_v40  ;;  %4466 = vmatpush3.msra.mxu0 %v8558_v39  ;;  %v208_v40 = vld [vmem:[%s8086_s3 + $0x2f0] sm:$0xff]  ;;  %v8242_v42 = vand.u32 4294901760, %v6388_v5 }
 0x254   :  { %4512 = vmatpush3.msra.mxu1 %v5799_v29  ;;  %1668 = vmatmul.mubr.f32.gmra.mxu0 %v6243_v48  ;;  %v192_v29 = vld [vmem:[%s8086_s3 + $0x270] sm:$0xff]  ;;  %v6393_v48 = vand.u32 4294901760, %v193_v18  ;;  %v6401_v56 = vand.u32 4294901760, %v208_v40 }
 0x255   :  { %4467 = vmatprep.subr.mxu0 %v8559_v16  ;;  %4513 = vmatprep.subr.mxu1 %v5815_v31  ;;  %v8561_v31 = vand.u32 4294901760, %v8533_v3  ;;  %v6410_v3 = vsub.f32 %v209_v49, %v6376_v19  ;;  %v6412_v51 = vand.u32 4294901760, %v192_v29  ;;  %v204_v39 = vld [vmem:[%s8086_s3 + $0x2d0] sm:$0xff] }
 0x256   :  { %4468 = vmatpush3.msra.mxu0 %v8560_v0  ;;  %1953 = vmatprep.mubr.f32.mxu0 %v8552_v7  ;;  %v8565_v7 = vand.u32 4294901760, %v8537_v24  ;;  %v6430_v28 = vsub.f32 %v193_v18, %v6393_v48  ;;  %v6441_v57 = vsub.f32 %v208_v40, %v6401_v56  ;;  %v189_v24 = vld [vmem:[%s8086_s3 + $0x258] sm:$0xff]  ;;  %v8570_v18 = vand.u32 4294901760, %v8540_v20  ;;  %v188_v16 = vld [vmem:[%s8086_s3 + $0x250] sm:$0xff] }
 0x257   :  { %4514 = vmatpush3.msra.mxu1 %v5829_v45  ;;  %4469 = vmatprep.subr.mxu0 %v8561_v31  ;;  %v191_v45 = vld [vmem:[%s8086_s3 + $0x268] sm:$0xff]  ;;  %v8241_v49 = vand.u32 4294901760, %v6410_v3  ;;  %v6474_v40 = vsub.f32 %v6388_v5, %v8242_v42  ;;  %v8587_v42 = vand.u32 4294901760, %v6054_v34 }
 0x258   :  { %4515 = vmatprep.subr.mxu1 %v5846_v35  ;;  %4470 = vmatpush3.msra.mxu0 %v8562_v10  ;;  %v206_v35 = vld [vmem:[%s8086_s3 + $0x2e0] sm:$0xff]  ;;  %8567 = vst [vmem:[#allocation12_spill] sm:$0xff] %v6441_v57  ;;  %v8240_v20 = vand.u32 4294901760, %v6430_v28  ;;  %v203_v31 = vld [vmem:[%s8086_s3 + $0x2c8] sm:$0xff]  ;;  %v6495_v10 = vand.u32 4294901760, %v204_v39 }
 0x259   :  { %4516 = vmatpush3.msra.mxu1 %v5869_v50  ;;  %4471 = vmatprep.subr.mxu0 %v8563_v8  ;;  %v190_v50 = vld [vmem:[%s8086_s3 + $0x260] sm:$0xff]  ;;  %v8576_v8 = vand.u32 4294901760, %v8543_v17 }
 0x25a   :  { %4517 = vmatprep.subr.mxu1 %v5914_v46  ;;  %4472 = vmatpush3.msra.mxu0 %v8564_v1  ;;  %v6432_v46 = vand.u32 4294901760, %v191_v45  ;;  %v6455_v52 = vand.u32 4294901760, %v190_v50  ;;  %v6510_v1 = vand.u32 4294901760, %v188_v16 }
 0x25b   :  { %4518 = vmatpush3.msra.mxu1 %v5940_v43  ;;  %4473 = vmatprep.subr.mxu0 %v8565_v7  ;;  %v6443_v43 = vand.u32 4294901760, %v206_v35  ;;  %v202_v7 = vld [vmem:[%s8086_s3 + $0x2c0] sm:$0xff] }
 0x25c   :  { %4519 = vmatprep.subr.mxu1 %v5955_v9  ;;  %4474 = vmatpush3.msra.mxu0 %v8566_v61  ;;  %v6453_v9 = vsub.f32 %v192_v29, %v6412_v51  ;;  %v6481_v0 = vsub.f32 %v191_v45, %v6432_v46  ;;  %v6483_v29 = vand.u32 4294901760, %v189_v24  ;;  %v187_v45 = vld [vmem:[%s8086_s3 + $0x248] sm:$0xff]  ;;  %v6520_v61 = vsub.f32 %v205_v30, %v6466_v13 }
 0x25d   :  { %4520 = vmatpush3.msra.mxu1 %v5986_v44  ;;  %4475 = vmatprep.subr.mxu0 %v8568_v6  ;;  %v6464_v44 = vsub.f32 %v207_v36, %v6420_v32  ;;  %v8574_v36 = vand.u32 4294901760, %v8542_v60  ;;  %v6522_v6 = vand.u32 4294901760, %v203_v31  ;;  %v6535_v30 = vand.u32 4294901760, %v187_v45 }
 0x25e   :  { %8569 = vst [vmem:[#allocation6_spill] sm:$0xff] %v6453_v9  ;;  %4521 = vmatprep.subr.mxu1 %v6002_v23  ;;  %4476 = vmatpush3.msra.mxu0 %v8570_v18  ;;  %v8572_v23 = vand.u32 4294901760, %v8541_v33  ;;  %8573 = vst [vmem:[#allocation7_spill] sm:$0xff] %v6481_v0  ;;  %v6493_v33 = vsub.f32 %v206_v35, %v6443_v43  ;;  %v8245_v60 = vand.u32 4294901760, %v6453_v9  ;;  %v8580_v18 = vld [vmem:[#allocation29_spill] sm:$0xff] }
 0x25f   :  { %8571 = vst [vmem:[#allocation14_spill] sm:$0xff] %v6464_v44  ;;  %4522 = vmatpush3.msra.mxu1 %v6017_v41  ;;  %v8243_v41 = vand.u32 4294901760, %v6441_v57  ;;  %v6508_v35 = vsub.f32 %v190_v50, %v6455_v52  ;;  %v8244_v17 = vand.u32 4294901760, %v6464_v44  ;;  %8579 = vst [vmem:[#allocation11_spill] sm:$0xff] %v6520_v61 }
 0x260   :  { %4477 = vmatprep.subr.mxu0 %v8572_v23  ;;  %4523 = vmatprep.subr.mxu1 %v6027_v22  ;;  %8575 = vst [vmem:[#allocation8_spill] sm:$0xff] %v6493_v33  ;;  %v2321_v22 = vsub.f32 %v6410_v3, %v8241_v49  ;;  %v8581_v23 = vand.u32 4294901760, %v8545_v2  ;;  %v8584_v2 = vand.u32 4294901760, %v6042_v47  ;;  %v8586_v49 = vld [vmem:[#allocation33_spill] sm:$0xff]  ;;  %v2216_v47 = vsub.f32 %v6453_v9, %v8245_v60 }
 0x261   :  { %4478 = vmatpush3.msra.mxu0 %v8574_v36  ;;  %4524 = vmatpush3.msra.mxu1 %v6044_v58  ;;  %8577 = vst [vmem:[#allocation9_spill] sm:$0xff] %v6508_v35  ;;  %v8578_v58 = vand.u32 4294901760, %v8544_v37  ;;  %v8247_v37 = vand.u32 4294901760, %v6481_v0  ;;  %v6533_v36 = vsub.f32 %v189_v24, %v6483_v29  ;;  %v6548_v24 = vsub.f32 %v204_v39, %v6495_v10  ;;  %v8589_v39 = vld [vmem:[#allocation28_spill] sm:$0xff]  ;;  %v8603_v60 = vld [vmem:[#allocation37_spill] sm:$0xff] }
 0x262   :  { %4479 = vmatprep.subr.mxu0 %v8576_v8  ;;  %4525 = vmatprep.subr.mxu1 %v6056_v59  ;;  %v2209_v59 = vsub.f32 %v6430_v28, %v8240_v20  ;;  %v186_v8 = vld [vmem:[%s8086_s3 + $0x240] sm:$0xff]  ;;  %v6550_v20 = vand.u32 4294901760, %v202_v7  ;;  %v8590_v50 = vand.u32 4294901760, %v8589_v39  ;;  %v2335_v34 = vsub.f32 %v6464_v44, %v8244_v17 }
 0x263   :  { %4480 = vmatpush3.msra.mxu0 %v8578_v58  ;;  %4526 = vmatpush3.msra.mxu1 %v8580_v18  ;;  %8582 = vst [vmem:[#allocation13_spill] sm:$0xff] %v6533_v36  ;;  %v8583_v58 = vld [vmem:[#allocation31_spill] sm:$0xff]  ;;  %v2328_v18 = vsub.f32 %v6441_v57, %v8243_v41  ;;  %8585 = vst [vmem:[#allocation15_spill] sm:$0xff] %v6548_v24  ;;  %v6560_v41 = vsub.f32 %v188_v16, %v6510_v1  ;;  %v201_v16 = vld [vmem:[%s8086_s3 + $0x2b8] sm:$0xff] }
 0x264   :  { %4481 = vmatprep.subr.mxu0 %v8581_v23  ;;  %4527 = vmatprep.subr.mxu1 %v8583_v58  ;;  %v8246_v23 = vand.u32 4294901760, %v6493_v33  ;;  %v2322_v58 = vand.u32 4294901760, %v2321_v22  ;;  %v6572_v22 = vand.u32 4294901760, %v186_v8  ;;  %v2223_v17 = vsub.f32 %v6481_v0, %v8247_v37  ;;  %v8599_v37 = vld [vmem:[#allocation36_spill] sm:$0xff] }
 0x265   :  { %4482 = vmatpush3.msra.mxu0 %v8584_v2  ;;  %4528 = vmatpush3.msra.mxu1 %v8586_v49  ;;  %8588 = vst [vmem:[#allocation16_spill] sm:$0xff] %v6560_v41  ;;  %v6570_v49 = vsub.f32 %v203_v31, %v6522_v6  ;;  %v6585_v31 = vsub.f32 %v187_v45, %v6535_v30  ;;  %v2329_v2 = vand.u32 4294901760, %v2328_v18  ;;  %v185_v45 = vld [vmem:[%s8086_s3 + $0x238] sm:$0xff]  ;;  %v8598_v18 = vand.u32 4294901760, %v6508_v35 }
 0x266   :  { %4483 = vmatprep.subr.mxu0 %v8587_v42  ;;  %4529 = vmatprep.subr.mxu1 %v6107_v62  ;;  %v8592_v62 = vld [vmem:[#allocation30_spill] sm:$0xff]  ;;  %v8595_v42 = vand.u32 4294901760, %v8546_v11  ;;  %v2217_v11 = vand.u32 4294901760, %v2216_v47  ;;  %v6638_v27 = vand.u32 4294901760, %v185_v45 }
 0x267   :  { %4484 = vmatpush3.msra.mxu0 %v8590_v50  ;;  %8591 = vst [vmem:[#allocation20_spill] sm:$0xff] %v6570_v49  ;;  %4530 = vmatpush3.msra.mxu1 %v6120_v12  ;;  %v8593_v39 = vand.u32 4294901760, %v8592_v62  ;;  %v2210_v50 = vand.u32 4294901760, %v2209_v59  ;;  %8594 = vst [vmem:[#allocation4_spill] sm:$0xff] %v6585_v31  ;;  %v6593_v12 = vsub.f32 %v6493_v33, %v8246_v23  ;;  %v6611_v23 = vand.u32 4294901760, %v201_v16  ;;  %v181_v33 = vld [vmem:[%s8086_s3 + $0x218] sm:$0xff] }
 0x268   :  { %4531 = vmatprep.subr.mxu1 %v6127_v25  ;;  %v6597_v62 = vsub.f32 %v202_v7, %v6550_v20  ;;  %v8597_v25 = vand.u32 4294901760, %v8547_v15  ;;  %v200_v7 = vld [vmem:[%s8086_s3 + $0x2b0] sm:$0xff]  ;;  %v8600_v15 = vand.u32 4294901760, %v6520_v61  ;;  %v8602_v59 = vand.u32 4294901760, %v6118_v26 }
 0x269   :  { %4485 = vmatprep.subr.mxu0 %v8593_v39  ;;  %4532 = vmatpush3.msra.mxu1 %v6137_v38  ;;  %v2336_v38 = vand.u32 4294901760, %v2335_v34  ;;  %v184_v39 = vld [vmem:[%s8086_s3 + $0x230] sm:$0xff]  ;;  %v8604_v34 = vand.u32 4294901760, %v6533_v36  ;;  %v8605_v26 = vand.u32 4294901760, %v8550_v4 }
 0x26a   :  { %4486 = vmatpush3.msra.mxu0 %v8595_v42  ;;  %8596 = vst [vmem:[#allocation18_spill] sm:$0xff] %v6597_v62  ;;  %v6608_v42 = vsub.f32 %v6508_v35, %v8598_v18  ;;  %2066 = vmatmul.mubr.f32.vlgmr.msra.gmra.mxu1 %v8599_v37  ;;  %v6620_v47 = vsub.f32 %v6520_v61, %v8600_v15  ;;  %v8612_v35 = vld [vmem:[#allocation38_spill] sm:$0xff] }
 0x26b   :  { %4487 = vmatprep.subr.mxu0 %v8597_v25  ;;  %4577 = vmatprep.subr.mxu1 %v2322_v58  ;;  %v6624_v18 = vsub.f32 %v186_v8, %v6572_v22  ;;  %v2224_v58 = vand.u32 4294901760, %v2223_v17  ;;  %v6635_v15 = vsub.f32 %v6533_v36, %v8604_v34  ;;  %v199_v8 = vld [vmem:[%s8086_s3 + $0x2a8] sm:$0xff]  ;;  %v8606_v17 = vand.u32 4294901760, %v6548_v24 }
 0x26c   :  { %4488 = vmatpush3.msra.mxu0 %v8602_v59  ;;  %2071 = vmatprep.mubr.f32.mxu1 %v8603_v60  ;;  %v2343_v59 = vand.u32 4294901760, %v6593_v12  ;;  %v6652_v25 = vand.u32 4294901760, %v200_v7  ;;  %v183_v36 = vld [vmem:[%s8086_s3 + $0x228] sm:$0xff]  ;;  %v2231_v4 = vand.u32 4294901760, %v6608_v42  ;;  %v8608_v12 = vand.u32 4294901760, %v6560_v41 }
 0x26d   :  { %8601 = vst [vmem:[#allocation19_spill] sm:$0xff] %v6624_v18  ;;  %4578 = vmatpush3.msra.mxu1 %v2210_v50  ;;  %4489 = vmatprep.subr.mxu0 %v8605_v26  ;;  %v6649_v61 = vsub.f32 %v6548_v24, %v8606_v17  ;;  %v8607_v50 = vand.u32 4294901760, %v6135_v21  ;;  %v6666_v17 = vsub.f32 %v201_v16, %v6611_v23  ;;  %v6668_v34 = vand.u32 4294901760, %v184_v39  ;;  %v198_v24 = vld [vmem:[%s8086_s3 + $0x2a0] sm:$0xff]  ;;  %v197_v16 = vld [vmem:[%s8086_s3 + $0x298] sm:$0xff] }
 0x26e   :  { %4579 = vmatprep.subr.mxu1 %v2329_v2  ;;  %v6663_v26 = vsub.f32 %v6560_v41, %v8608_v12  ;;  %v8610_v21 = vand.u32 4294901760, %v6145_v55  ;;  %v2350_v2 = vand.u32 4294901760, %v6620_v47  ;;  %v8611_v42 = vand.u32 4294901760, %v6570_v49  ;;  %v182_v41 = vld [vmem:[%s8086_s3 + $0x220] sm:$0xff]  ;;  %2073 = vmatmul.mubr.f32.gmra.mxu1 %v8612_v35 }
 0x26f   :  { %4490 = vmatpush3.msra.mxu0 %v8607_v50  ;;  %8609 = vst [vmem:[#allocation10_spill] sm:$0xff] %v6666_v17  ;;  %4580 = vmatpush3.msra.mxu1 %v2217_v11  ;;  %v6682_v12 = vand.u32 4294901760, %v199_v8  ;;  %v2238_v55 = vand.u32 4294901760, %v6635_v15  ;;  %v8613_v11 = vand.u32 4294901760, %v6585_v31  ;;  %v8616_v15 = vand.u32 4294901760, %v6597_v62 }
 0x270   :  { %4491 = vmatprep.subr.mxu0 %v8610_v21  ;;  %v6679_v50 = vsub.f32 %v6570_v49, %v8611_v42  ;;  %4581 = vmatprep.subr.mxu1 %v2336_v38  ;;  %v6695_v21 = vsub.f32 %v185_v45, %v6638_v27  ;;  %v6697_v42 = vand.u32 4294901760, %v183_v36  ;;  %v8615_v49 = vand.u32 4294901760, %v6153_v54 }
 0x271   :  { %v6692_v47 = vsub.f32 %v6585_v31, %v8613_v11  ;;  %4582 = vmatpush3.msra.mxu1 %v2224_v58  ;;  %v2357_v38 = vand.u32 4294901760, %v6649_v61  ;;  %v6708_v11 = vsub.f32 %v6597_v62, %v8616_v15  ;;  %v6711_v45 = vsub.f32 %v200_v7, %v6652_v25  ;;  %2430 = vmatprep.mubr.f32.mxu1 %v6363_v14  ;;  %v196_v15 = vld [vmem:[%s8086_s3 + $0x290] sm:$0xff] }
 0x272   :  { %8614 = vst [vmem:[#allocation27_spill] sm:$0xff] %v6695_v21  ;;  %4492 = vmatpush3.msra.mxu0 %v8615_v49  ;;  %v6713_v31 = vand.u32 4294901760, %v198_v24  ;;  %v8619_v54 = vand.u32 4294901760, %v6161_v63  ;;  %v2245_v61 = vand.u32 4294901760, %v6663_v26  ;;  %v6724_v58 = vsub.f32 %v184_v39, %v6668_v34  ;;  %4583 = vmatprep.subr.mxu1 %v2343_v59  ;;  %v180_v14 = vld [vmem:[%s8086_s3 + $0x210] sm:$0xff] }
 0x273   :  { %8617 = vst [vmem:[#allocation32_spill] sm:$0xff] %v6711_v45  ;;  %v6726_v7 = vand.u32 4294901760, %v182_v41  ;;  %v8621_v62 = vand.u32 4294901760, %v6169_v53  ;;  %v2364_v63 = vand.u32 4294901760, %v6679_v50  ;;  %v6740_v39 = vsub.f32 %v199_v8, %v6682_v12  ;;  %4584 = vmatpush3.msra.mxu1 %v2231_v4  ;;  %v195_v8 = vld [vmem:[%s8086_s3 + $0x288] sm:$0xff] }
 0x274   :  { %8618 = vst [vmem:[#allocation34_spill] sm:$0xff] %v6713_v31  ;;  %4493 = vmatprep.subr.mxu0 %v8619_v54  ;;  %8620 = vst [vmem:[#allocation35_spill] sm:$0xff] %v6724_v58  ;;  %v8622_v54 = vand.u32 4294901760, %v6624_v18  ;;  %v6742_v49 = vand.u32 4294901760, %v197_v16  ;;  %v2252_v53 = vand.u32 4294901760, %v6692_v47  ;;  %v6751_v59 = vsub.f32 %v183_v36, %v6697_v42  ;;  %4585 = vmatprep.subr.mxu1 %v2350_v2  ;;  %v179_v36 = vld [vmem:[%s8086_s3 + $0x208] sm:$0xff] }
 0x275   :  { %4494 = vmatpush3.msra.mxu0 %v8621_v62  ;;  %v6753_v50 = vand.u32 4294901760, %v181_v33  ;;  %v2371_v4 = vand.u32 4294901760, %v6708_v11  ;;  %v6762_v47 = vsub.f32 %v198_v24, %v6713_v31  ;;  %v8625_v62 = vand.u32 4294901760, %v6666_v17  ;;  %4586 = vmatpush3.msra.mxu1 %v2238_v55 }
 0x276   :  { %v6737_v26 = vsub.f32 %v6624_v18, %v8622_v54  ;;  %1955 = vmatmul.mubr.f32.vlgmr.msra.gmra.mxu0 %v8599_v37  ;;  %8623 = vst [vmem:[#allocation17_spill] sm:$0xff] %v6751_v59  ;;  %4539 = vmatprep.subr.mxu0 %v6376_v19  ;;  %v6764_v54 = vand.u32 4294901760, %v196_v15  ;;  %v6776_v37 = vsub.f32 %v182_v41, %v6726_v7  ;;  %v6778_v24 = vand.u32 4294901760, %v180_v14  ;;  %v194_v18 = vld [vmem:[%s8086_s3 + $0x280] sm:$0xff] }
 0x277   :  { %8624 = vst [vmem:[#allocation29_spill] sm:$0xff] %v6762_v47  ;;  %1960 = vmatprep.mubr.f32.mxu0 %v8603_v60  ;;  %4540 = vmatpush3.msra.mxu0 %v6393_v48  ;;  %v2377_v2 = vsub.f32 %v6666_v17, %v8625_v62  ;;  %v6787_v62 = vsub.f32 %v197_v16, %v6742_v49  ;;  %v6789_v11 = vand.u32 4294901760, %v195_v8  ;;  %v178_v41 = vld [vmem:[%s8086_s3 + $0x200] sm:$0xff]  ;;  %v8628_v55 = vand.u32 4294901760, %v6695_v21 }
 0x278   :  { %8626 = vst [vmem:[#allocation31_spill] sm:$0xff] %v6778_v24  ;;  %4541 = vmatprep.subr.mxu0 %v6401_v56  ;;  %v2259_v60 = vand.u32 4294901760, %v6737_v26  ;;  %4587 = vmatprep.subr.mxu1 %v2357_v38  ;;  %v6800_v0 = vsub.f32 %v181_v33, %v6753_v50  ;;  %v6802_v16 = vand.u32 4294901760, %v179_v36  ;;  %v8629_v44 = vand.u32 4294901760, %v6711_v45 }
 0x279   :  { %8627 = vst [vmem:[#allocation33_spill] sm:$0xff] %v6787_v62  ;;  %4542 = vmatpush3.msra.mxu0 %v6412_v51  ;;  %v2265_v17 = vsub.f32 %v6695_v21, %v8628_v55  ;;  %4588 = vmatpush3.msra.mxu1 %v2245_v61  ;;  %v6810_v57 = vsub.f32 %v196_v15, %v6764_v54  ;;  %v6812_v55 = vand.u32 4294901760, %v194_v18  ;;  %v8631_v33 = vand.u32 4294901760, %v6724_v58 }
 0x27a   :  { %1962 = vmatmul.mubr.f32.gmra.mxu0 %v8612_v35  ;;  %v2384_v38 = vsub.f32 %v6711_v45, %v8629_v44  ;;  %4543 = vmatprep.subr.mxu0 %v6420_v32  ;;  %v6820_v26 = vsub.f32 %v180_v14, %v6778_v24  ;;  %v6822_v44 = vand.u32 4294901760, %v178_v41  ;;  %v8632_v15 = vand.u32 4294901760, %v6474_v40 }
 0x27b   :  { %8630 = vst [vmem:[#allocation28_spill] sm:$0xff] %v6810_v57  ;;  %4589 = vmatprep.subr.mxu1 %v2364_v63  ;;  %v2272_v61 = vsub.f32 %v6724_v58, %v8631_v33  ;;  %4544 = vmatpush3.msra.mxu0 %v6432_v46  ;;  %v2378_v9 = vand.u32 4294901760, %v2377_v2  ;;  %v8633_v45 = vand.u32 4294901760, %v6740_v39  ;;  %v8286_v21 = vand.u32 4294901760, %v6787_v62 }
 0x27c   :  { %2179 = vmatprep.mubr.f32.mxu0 %v8632_v15  ;;  %v6832_v33 = vsub.f32 %v195_v8, %v6789_v11  ;;  %4590 = vmatpush3.msra.mxu1 %v2252_v53  ;;  %v2266_v14 = vand.u32 4294901760, %v2265_v17  ;;  %v8634_v35 = vand.u32 4294901760, %v6751_v59  ;;  %v6840_v2 = vsub.f32 %v179_v36, %v6802_v16 }
 0x27d   :  { %v2391_v63 = vsub.f32 %v6740_v39, %v8633_v45  ;;  %4545 = vmatprep.subr.mxu0 %v6443_v43  ;;  %4591 = vmatprep.subr.mxu1 %v2371_v4  ;;  %v2385_v45 = vand.u32 4294901760, %v2384_v38  ;;  %v8635_v8 = vand.u32 4294901760, %v6762_v47  ;;  %v6848_v17 = vsub.f32 %v194_v18, %v6812_v55 }
 0x27e   :  { %v2279_v58 = vsub.f32 %v6751_v59, %v8634_v35  ;;  %4546 = vmatpush3.msra.mxu0 %v6455_v52  ;;  %4592 = vmatpush3.msra.mxu1 %v2259_v60  ;;  %v2273_v35 = vand.u32 4294901760, %v2272_v61  ;;  %v8636_v36 = vand.u32 4294901760, %v6776_v37  ;;  %v6856_v38 = vsub.f32 %v178_v41, %v6822_v44 }
 0x27f   :  { %v2398_v53 = vsub.f32 %v6762_v47, %v8635_v8  ;;  %4547 = vmatprep.subr.mxu0 %v6466_v13  ;;  %v86_v8 = vld [vmem:[%s8087_s2 + $0x20] sm:$0xff]  ;;  %4593 = vmatprep.subr.mxu1 %v2378_v9  ;;  %v2392_v18 = vand.u32 4294901760, %v2391_v63  ;;  %v2405_v60 = vsub.f32 %v6787_v62, %v8286_v21  ;;  %v8637_v41 = vand.u32 4294901760, %v6800_v0 }
 0x280   :  { %v2286_v4 = vsub.f32 %v6776_v37, %v8636_v36  ;;  %4548 = vmatpush3.msra.mxu0 %v6483_v29  ;;  %4594 = vmatpush3.msra.mxu1 %v2266_v14  ;;  %v2280_v36 = vand.u32 4294901760, %v2279_v58  ;;  %v8638_v63 = vand.u32 4294901760, %v6810_v57  ;;  %v95_v58 = vld [vmem:[%s8087_s2 + $0x68] sm:$0xff]  ;;  %v8639_v14 = vld [vmem:[#allocation22_spill] sm:$0xff]  ;;  %v8291_v15 = vand.u32 4294901760, %v6856_v38 }
 0x281   :  { %4549 = vmatprep.subr.mxu0 %v6495_v10  ;;  %v2293_v40 = vsub.f32 %v6800_v0, %v8637_v41  ;;  %4595 = vmatprep.subr.mxu1 %v2385_v45  ;;  %v2399_v9 = vand.u32 4294901760, %v2398_v53  ;;  %v102_v62 = vmul.f32 %v8639_v14, %v86_v8  ;;  %v8640_v45 = vand.u32 4294901760, %v6820_v26  ;;  %v8643_v14 = vld [vmem:[#allocation26_spill] sm:$0xff] }
 0x282   :  { %4550 = vmatpush3.msra.mxu0 %v6510_v1  ;;  %v2412_v21 = vsub.f32 %v6810_v57, %v8638_v63  ;;  %4596 = vmatpush3.msra.mxu1 %v2273_v35  ;;  %v2287_v41 = vand.u32 4294901760, %v2286_v4  ;;  %v2406_v63 = vand.u32 4294901760, %v2405_v60  ;;  %v8641_v61 = vand.u32 4294901760, %v6832_v33 }
 0x283   :  { %4551 = vmatprep.subr.mxu0 %v6522_v6  ;;  %v2300_v53 = vsub.f32 %v6820_v26, %v8640_v45  ;;  %4597 = vmatprep.subr.mxu1 %v2392_v18  ;;  %v2294_v35 = vand.u32 4294901760, %v2293_v40  ;;  %v8642_v4 = vand.u32 4294901760, %v6840_v2  ;;  %v111_v45 = vmul.f32 %v8643_v14, %v95_v58  ;;  %v94_v18 = vld [vmem:[%s8087_s2 + $0x60] sm:$0xff]  ;;  %v8646_v14 = vld [vmem:[#allocation25_spill] sm:$0xff] }
 0x284   :  { %4552 = vmatpush3.msra.mxu0 %v6535_v30  ;;  %v2419_v57 = vsub.f32 %v6832_v33, %v8641_v61  ;;  %4598 = vmatpush3.msra.mxu1 %v2280_v36  ;;  %v2413_v60 = vand.u32 4294901760, %v2412_v21  ;;  %v8644_v61 = vand.u32 4294901760, %v6848_v17  ;;  %v2314_v58 = vsub.f32 %v6856_v38, %v8291_v15 }
 0x285   :  { %4553 = vmatprep.subr.mxu0 %v6550_v20  ;;  %v2307_v8 = vsub.f32 %v6840_v2, %v8642_v4  ;;  %4599 = vmatprep.subr.mxu1 %v2399_v9  ;;  %v2301_v40 = vand.u32 4294901760, %v2300_v53  ;;  %v6905_v4 = vand.u32 4294901760, %v102_v62  ;;  %v110_v21 = vmul.f32 %v8646_v14, %v94_v18  ;;  %v8663_v14 = vld [vmem:[#allocation18_spill] sm:$0xff] }
 0x286   :  { %4554 = vmatpush3.msra.mxu0 %v6572_v22  ;;  %v2426_v36 = vsub.f32 %v6848_v17, %v8644_v61  ;;  %4600 = vmatpush3.msra.mxu1 %v2287_v41  ;;  %v2420_v9 = vand.u32 4294901760, %v2419_v57  ;;  %v6910_v41 = vand.u32 4294901760, %v111_v45  ;;  %v2315_v15 = vand.u32 4294901760, %v2314_v58 }
 0x287   :  { %4555 = vmatprep.subr.mxu0 %v6611_v23  ;;  %8645 = vst [vmem:[#allocation30_spill] sm:$0xff] %v6905_v4  ;;  %4601 = vmatprep.subr.mxu1 %v2406_v63  ;;  %v2308_v61 = vand.u32 4294901760, %v2307_v8  ;;  %v6915_v63 = vsub.f32 %v102_v62, %v6905_v4  ;;  %v6918_v57 = vand.u32 4294901760, %v110_v21 }
 0x288   :  { %4556 = vmatpush3.msra.mxu0 %v6638_v27  ;;  %4602 = vmatpush3.msra.mxu1 %v2294_v35  ;;  %8647 = vst [vmem:[#allocation36_spill] sm:$0xff] %v6910_v41  ;;  %v2427_v53 = vand.u32 4294901760, %v2426_v36  ;;  %v6922_v35 = vsub.f32 %v111_v45, %v6910_v41  ;;  %v8649_v36 = vand.u32 4294901760, %v6388_v5 }
 0x289   :  { %4557 = vmatprep.subr.mxu0 %v6652_v25  ;;  %4603 = vmatprep.subr.mxu1 %v2413_v60  ;;  %8648 = vst [vmem:[#allocation37_spill] sm:$0xff] %v6918_v57  ;;  %v8294_v62 = vand.u32 4294901760, %v6915_v63  ;;  %v6930_v8 = vsub.f32 %v110_v21, %v6918_v57  ;;  %v8650_v21 = vld [vmem:[#allocation12_spill] sm:$0xff] }
 0x28a   :  { %4558 = vmatpush3.msra.mxu0 %v6668_v34  ;;  %4604 = vmatpush3.msra.mxu1 %v2301_v40  ;;  %v8293_v45 = vand.u32 4294901760, %v6922_v35 }
 0x28b   :  { %4559 = vmatprep.subr.mxu0 %v6682_v12  ;;  %4605 = vmatprep.subr.mxu1 %v2420_v9  ;;  %v8292_v18 = vand.u32 4294901760, %v6930_v8 }
 0x28c   :  { %4560 = vmatpush3.msra.mxu0 %v6697_v42  ;;  %4606 = vmatpush3.msra.mxu1 %v2308_v61  ;;  %v2192_v60 = vsub.f32 %v6922_v35, %v8293_v45  ;;  %v6990_v45 = vld [vmem:[%s8088_s0] sm:$0xff] }
 0x28d   :  { %4561 = vmatprep.subr.mxu0 %v6713_v31  ;;  %4607 = vmatprep.subr.mxu1 %v2427_v53  ;;  %v2198_v58 = vsub.f32 %v6930_v8, %v8292_v18  ;;  %v8651_v53 = vld [vmem:[#allocation6_spill] sm:$0xff]  ;;  %v8660_v18 = vld [vmem:[#allocation20_spill] sm:$0xff]  ;;  %8661 = vst [vmem:[#allocation38_spill] sm:$0xff] %v6990_v45 }
 0x28e   :  { %4562 = vmatpush3.msra.mxu0 %v6726_v7  ;;  %4608 = vmatpush3.msra.mxu1 %v2315_v15  ;;  %v2183_v15 = vsub.f32 %v6915_v63, %v8294_v62  ;;  %v2193_v9 = vand.u32 4294901760, %v2192_v60  ;;  %v8653_v60 = vld [vmem:[#allocation7_spill] sm:$0xff]  ;;  %v8662_v62 = vld [vmem:[#allocation4_spill] sm:$0xff] }
 0x28f   :  { %4563 = vmatprep.subr.mxu0 %v6742_v49  ;;  %2432 = vmatmul.mubr.f32.vlgmr.msra.gmra.mxu1 %v6905_v4  ;;  %v2199_v61 = vand.u32 4294901760, %v2198_v58  ;;  %v8656_v58 = vld [vmem:[#allocation11_spill] sm:$0xff] }
 0x290   :  { %4653 = vmatprep.subr.mxu1 %v6376_v19  ;;  %4564 = vmatpush3.msra.mxu0 %v6753_v50  ;;  %v2184_v40 = vand.u32 4294901760, %v2183_v15  ;;  %v8652_v15 = vld [vmem:[#allocation14_spill] sm:$0xff]  ;;  %v7006_v4 = vld [vmem:[%s8088_s0 + $0x8] sm:$0xff] }
 0x291   :  { %2437 = vmatprep.mubr.f32.mxu1 %v6910_v41  ;;  %4654 = vmatpush3.msra.mxu1 %v6393_v48  ;;  %v8665_v41 = vld [vmem:[#allocation10_spill] sm:$0xff]  ;;  %8666 = vst [vmem:[#allocation12_spill] sm:$0xff] %v7006_v4 }
 0x292   :  { %4565 = vmatprep.subr.mxu0 %v6764_v54  ;;  %4655 = vmatprep.subr.mxu1 %v6401_v56 }
 0x293   :  { %4566 = vmatpush3.msra.mxu0 %v6778_v24  ;;  %4656 = vmatpush3.msra.mxu1 %v6412_v51 }
 0x294   :  { %4567 = vmatprep.subr.mxu0 %v6789_v11  ;;  %2439 = vmatmul.mubr.f32.gmra.mxu1 %v6918_v57  ;;  %v8664_v57 = vld [vmem:[#allocation19_spill] sm:$0xff] }
 0x295   :  { %4657 = vmatprep.subr.mxu1 %v6420_v32  ;;  %4568 = vmatpush3.msra.mxu0 %v6802_v16 }
 0x296   :  { %4658 = vmatpush3.msra.mxu1 %v6432_v46  ;;  %2690 = vmatprep.mubr.f32.mxu1 %v8649_v36  ;;  %v8654_v36 = vld [vmem:[#allocation8_spill] sm:$0xff] }
 0x297   :  { %4569 = vmatprep.subr.mxu0 %v6812_v55  ;;  %4659 = vmatprep.subr.mxu1 %v6443_v43 }
 0x298   :  { %4570 = vmatpush3.msra.mxu0 %v6822_v44  ;;  %4660 = vmatpush3.msra.mxu1 %v6455_v52 }
 0x299   :  { %2185 = vmatmul.mubr.f32.vlgmr.msra.gmra.mxu0 %v2184_v40  ;;  %4615 = vmatprep.subr.mxu0 %v6410_v3  ;;  %v8655_v40 = vld [vmem:[#allocation9_spill] sm:$0xff] }
 0x29a   :  { %4661 = vmatprep.subr.mxu1 %v6466_v13  ;;  %2194 = vmatprep.mubr.f32.mxu0 %v2193_v9  ;;  %v8657_v9 = vld [vmem:[#allocation13_spill] sm:$0xff] }
 0x29b   :  { %4616 = vmatpush3.msra.mxu0 %v6430_v28  ;;  %4662 = vmatpush3.msra.mxu1 %v6483_v29 }
 0x29c   :  { %4617 = vmatprep.subr.mxu0 %v8650_v21  ;;  %4663 = vmatprep.subr.mxu1 %v6495_v10 }
 0x29d   :  { %4618 = vmatpush3.msra.mxu0 %v8651_v53  ;;  %4664 = vmatpush3.msra.mxu1 %v6510_v1 }
 0x29e   :  { %2200 = vmatmul.mubr.f32.gmra.mxu0 %v2199_v61  ;;  %4619 = vmatprep.subr.mxu0 %v8652_v15  ;;  %v8658_v61 = vld [vmem:[#allocation15_spill] sm:$0xff] }
 0x29f   :  { %4665 = vmatprep.subr.mxu1 %v6522_v6  ;;  %4620 = vmatpush3.msra.mxu0 %v8653_v60 }
 0x2a0   :  { %2574 = vmatprep.mubr.f32.mxu0 %v6388_v5  ;;  %4666 = vmatpush3.msra.mxu1 %v6535_v30  ;;  %v8659_v5 = vld [vmem:[#allocation16_spill] sm:$0xff] }
 0x2a1   :  { %4621 = vmatprep.subr.mxu0 %v8654_v36  ;;  %4667 = vmatprep.subr.mxu1 %v6550_v20 }
 0x2a2   :  { %4622 = vmatpush3.msra.mxu0 %v8655_v40  ;;  %4668 = vmatpush3.msra.mxu1 %v6572_v22 }
 0x2a3   :  { %4623 = vmatprep.subr.mxu0 %v8656_v58  ;;  %4669 = vmatprep.subr.mxu1 %v6611_v23 }
 0x2a4   :  { %4624 = vmatpush3.msra.mxu0 %v8657_v9  ;;  %4670 = vmatpush3.msra.mxu1 %v6638_v27 }
 0x2a5   :  { %4625 = vmatprep.subr.mxu0 %v8658_v61  ;;  %4671 = vmatprep.subr.mxu1 %v6652_v25 }
 0x2a6   :  { %4626 = vmatpush3.msra.mxu0 %v8659_v5  ;;  %4672 = vmatpush3.msra.mxu1 %v6668_v34 }
 0x2a7   :  { %4627 = vmatprep.subr.mxu0 %v8660_v18  ;;  %4673 = vmatprep.subr.mxu1 %v6682_v12 }
 0x2a8   :  { %4628 = vmatpush3.msra.mxu0 %v8662_v62  ;;  %4674 = vmatpush3.msra.mxu1 %v6697_v42 }
 0x2a9   :  { %4629 = vmatprep.subr.mxu0 %v8663_v14  ;;  %4675 = vmatprep.subr.mxu1 %v6713_v31  ;;  %v8667_v14 = vld [vmem:[#allocation27_spill] sm:$0xff]  ;;  %v8668_v31 = vld [vmem:[#allocation32_spill] sm:$0xff] }
 0x2aa   :  { %3929 = vrot.lane.b32.xlu0 %v6990_v45, %s5001_s24  ;;  %4630 = vmatpush3.msra.mxu0 %v8664_v57  ;;  %v8669_v45 = vld [vmem:[#allocation35_spill] sm:$0xff] }
 0x2ab   :  { %4676 = vmatpush3.msra.mxu1 %v6726_v7  ;;  %4631 = vmatprep.subr.mxu0 %v8665_v41 }
 0x2ac   :  { %4677 = vmatprep.subr.mxu1 %v6742_v49  ;;  %4632 = vmatpush3.msra.mxu0 %v8667_v14 }
 0x2ad   :  { %4678 = vmatpush3.msra.mxu1 %v6753_v50  ;;  %4633 = vmatprep.subr.mxu0 %v8668_v31 }
 0x2ae   :  { %4679 = vmatprep.subr.mxu1 %v6764_v54  ;;  %3931 = vrot.lane.b32.xlu1 %v7006_v4, %s5001_s24  ;;  %v8670_v4 = vld [vmem:[#allocation33_spill] sm:$0xff] }
 0x2af   :  { %4634 = vmatpush3.msra.mxu0 %v8669_v45  ;;  %4680 = vmatpush3.msra.mxu1 %v6778_v24  ;;  %v8671_v24 = vand.u32 4294901760, %v6915_v63 }
 0x2b0   :  { %4635 = vmatprep.subr.mxu0 %v6740_v39  ;;  %4681 = vmatprep.subr.mxu1 %v6789_v11 }
 0x2b1   :  { %4636 = vmatpush3.msra.mxu0 %v6751_v59  ;;  %4682 = vmatpush3.msra.mxu1 %v6802_v16  ;;  %v8672_v59 = vand.u32 4294901760, %v6922_v35 }
 0x2b2   :  { %4637 = vmatprep.subr.mxu0 %v6762_v47  ;;  %4683 = vmatprep.subr.mxu1 %v6812_v55  ;;  %v8673_v47 = vld [vmem:[#allocation28_spill] sm:$0xff] }
 0x2b3   :  { %4638 = vmatpush3.msra.mxu0 %v6776_v37  ;;  %4684 = vmatpush3.msra.mxu1 %v6822_v44 }
 0x2b4   :  { %4639 = vmatprep.subr.mxu0 %v8670_v4  ;;  %2694 = vmatmul.mubr.f32.vlgmr.msra.gmra.mxu1 %v8671_v24  ;;  %v8674_v24 = vand.u32 4294901760, %v6930_v8 }
 0x2b5   :  { %4729 = vmatprep.subr.mxu1 %v6376_v19  ;;  %4640 = vmatpush3.msra.mxu0 %v6800_v0  ;;  %v89_v19 = vld [vmem:[%s8087_s2 + $0x38] sm:$0xff] }
 0x2b6   :  { %2701 = vmatprep.mubr.f32.mxu1 %v8672_v59  ;;  %4730 = vmatpush3.msra.mxu1 %v6393_v48  ;;  %v8675_v48 = vld [vmem:[#allocation5_spill] sm:$0xff] }
 0x2b7   :  { %4641 = vmatprep.subr.mxu0 %v8673_v47  ;;  %4731 = vmatprep.subr.mxu1 %v6401_v56  ;;  %v8676_v56 = vld [vmem:[#allocation23_spill] sm:$0xff] }
 0x2b8   :  { %4642 = vmatpush3.msra.mxu0 %v6820_v26  ;;  %4732 = vmatpush3.msra.mxu1 %v6412_v51  ;;  %v105_v51 = vmul.f32 %v8676_v56, %v89_v19 }
 0x2b9   :  { %4643 = vmatprep.subr.mxu0 %v6832_v33  ;;  %2705 = vmatmul.mubr.f32.gmra.mxu1 %v8674_v24 }
 0x2ba   :  { %4733 = vmatprep.subr.mxu1 %v6420_v32  ;;  %4644 = vmatpush3.msra.mxu0 %v6840_v2  ;;  %v8677_v32 = vand.u32 4294901760, %v6410_v3  ;;  %v7064_v59 = vand.u32 4294901760, %v105_v51  ;;  %v8681_v3 = vand.u32 4294901760, %v8651_v53  ;;  %v8685_v53 = vand.u32 4294901760, %v8655_v40 }
 0x2bb   :  { %4734 = vmatpush3.msra.mxu1 %v6432_v46  ;;  %2982 = vmatprep.mubr.f32.mxu1 %v8675_v48  ;;  %v8678_v46 = vand.u32 4294901760, %v6430_v28  ;;  %v225_v28 = vld [vmem:[%s8086_s3 + $0x378] sm:$0xff]  ;;  %v8687_v40 = vand.u32 4294901760, %v8657_v9 }
 0x2bc   :  { %4645 = vmatprep.subr.mxu0 %v6848_v17  ;;  %4735 = vmatprep.subr.mxu1 %v6443_v43  ;;  %v8679_v43 = vand.u32 4294901760, %v8650_v21  ;;  %8680 = vst [vmem:[#allocation6_spill] sm:$0xff] %v7064_v59  ;;  %v239_v21 = vld [vmem:[%s8086_s3 + $0x3e8] sm:$0xff]  ;;  %v237_v9 = vld [vmem:[%s8086_s3 + $0x3d8] sm:$0xff] }
 0x2bd   :  { %4646 = vmatpush3.msra.mxu0 %v6856_v38  ;;  %4736 = vmatpush3.msra.mxu1 %v6455_v52  ;;  %v241_v52 = vld [vmem:[%s8086_s3 + $0x3f8] sm:$0xff]  ;;  %v7121_v19 = vand.u32 4294901760, %v239_v21 }
 0x2be   :  { %2577 = vmatmul.mubr.f32.vlgmr.msra.gmra.mxu0 %v6915_v63  ;;  %4691 = vmatprep.subr.mxu0 %v8677_v32  ;;  %v8683_v63 = vand.u32 4294901760, %v8653_v60  ;;  %v8686_v60 = vand.u32 4294901760, %v8656_v58 }
 0x2bf   :  { %4737 = vmatprep.subr.mxu1 %v6466_v13  ;;  %2583 = vmatprep.mubr.f32.mxu0 %v6922_v35  ;;  %v8682_v13 = vand.u32 4294901760, %v8652_v15  ;;  %v7089_v35 = vsub.f32 %v105_v51, %v7064_v59  ;;  %v8689_v51 = vand.u32 4294901760, %v8659_v5 }
 0x2c0   :  { %4692 = vmatpush3.msra.mxu0 %v8678_v46  ;;  %4738 = vmatpush3.msra.mxu1 %v6483_v29  ;;  %v7077_v29 = vand.u32 4294901760, %v241_v52  ;;  %v8691_v46 = vand.u32 4294901760, %v8660_v18  ;;  %v7167_v18 = vand.u32 4294901760, %v237_v9 }
 0x2c1   :  { %4693 = vmatprep.subr.mxu0 %v8679_v43  ;;  %4739 = vmatprep.subr.mxu1 %v6495_v10  ;;  %v240_v10 = vld [vmem:[%s8086_s3 + $0x3f0] sm:$0xff]  ;;  %v8312_v58 = vand.u32 4294901760, %v7089_v35 }
 0x2c2   :  { %4694 = vmatpush3.msra.mxu0 %v8681_v3  ;;  %4740 = vmatpush3.msra.mxu1 %v6510_v1  ;;  %v224_v1 = vld [vmem:[%s8086_s3 + $0x370] sm:$0xff]  ;;  %v7102_v15 = vand.u32 4294901760, %v240_v10  ;;  %v8693_v3 = vand.u32 4294901760, %v8662_v62 }
 0x2c3   :  { %2586 = vmatmul.mubr.f32.gmra.mxu0 %v6930_v8  ;;  %4695 = vmatprep.subr.mxu0 %v8682_v13  ;;  %v7094_v8 = vand.u32 4294901760, %v225_v28  ;;  %v7113_v24 = vand.u32 4294901760, %v224_v1  ;;  %v7175_v13 = vsub.f32 %v7089_v35, %v8312_v58 }
 0x2c4   :  { %4741 = vmatprep.subr.mxu1 %v6522_v6  ;;  %4696 = vmatpush3.msra.mxu0 %v8683_v63  ;;  %v8684_v6 = vand.u32 4294901760, %v8654_v36  ;;  %v7111_v36 = vsub.f32 %v241_v52, %v7077_v29  ;;  %v7142_v32 = vsub.f32 %v240_v10, %v7102_v15  ;;  %v236_v52 = vld [vmem:[%s8086_s3 + $0x3d0] sm:$0xff] }
 0x2c5   :  { %2871 = vmatprep.mubr.f32.mxu0 %v8675_v48  ;;  %4742 = vmatpush3.msra.mxu1 %v6535_v30  ;;  %v223_v30 = vld [vmem:[%s8086_s3 + $0x368] sm:$0xff]  ;;  %v8688_v48 = vand.u32 4294901760, %v8658_v61  ;;  %v7131_v56 = vsub.f32 %v225_v28, %v7094_v8  ;;  %v221_v61 = vld [vmem:[%s8086_s3 + $0x358] sm:$0xff]  ;;  %v220_v28 = vld [vmem:[%s8086_s3 + $0x350] sm:$0xff] }
 0x2c6   :  { %4697 = vmatprep.subr.mxu0 %v8684_v6  ;;  %4743 = vmatprep.subr.mxu1 %v6550_v20  ;;  %v238_v20 = vld [vmem:[%s8086_s3 + $0x3e0] sm:$0xff]  ;;  %8690 = vst [vmem:[#allocation14_spill] sm:$0xff] %v7142_v32  ;;  %v8310_v43 = vand.u32 4294901760, %v7111_v36  ;;  %v235_v6 = vld [vmem:[%s8086_s3 + $0x3c8] sm:$0xff] }
 0x2c7   :  { %4698 = vmatpush3.msra.mxu0 %v8685_v53  ;;  %4744 = vmatpush3.msra.mxu1 %v6572_v22  ;;  %v222_v22 = vld [vmem:[%s8086_s3 + $0x360] sm:$0xff]  ;;  %v8309_v62 = vand.u32 4294901760, %v7131_v56  ;;  %v8699_v53 = vand.u32 4294901760, %v8664_v57 }
 0x2c8   :  { %4699 = vmatprep.subr.mxu0 %v8686_v60  ;;  %4745 = vmatprep.subr.mxu1 %v6611_v23  ;;  %v7133_v23 = vand.u32 4294901760, %v223_v30  ;;  %v7156_v5 = vand.u32 4294901760, %v222_v22  ;;  %v3239_v57 = vsub.f32 %v7111_v36, %v8310_v43  ;;  %v8710_v43 = vand.u32 4294901760, %v6740_v39 }
 0x2c9   :  { %4700 = vmatpush3.msra.mxu0 %v8687_v40  ;;  %4746 = vmatpush3.msra.mxu1 %v6638_v27  ;;  %v7144_v27 = vand.u32 4294901760, %v238_v20  ;;  %v7196_v40 = vand.u32 4294901760, %v236_v52 }
 0x2ca   :  { %4701 = vmatprep.subr.mxu0 %v8688_v48  ;;  %4747 = vmatprep.subr.mxu1 %v6652_v25  ;;  %v7154_v25 = vsub.f32 %v224_v1, %v7113_v24  ;;  %v7182_v63 = vsub.f32 %v223_v30, %v7133_v23  ;;  %v7184_v1 = vand.u32 4294901760, %v221_v61  ;;  %v219_v30 = vld [vmem:[%s8086_s3 + $0x348] sm:$0xff]  ;;  %v8701_v48 = vand.u32 4294901760, %v8665_v41 }
 0x2cb   :  { %4702 = vmatpush3.msra.mxu0 %v8689_v51  ;;  %4748 = vmatpush3.msra.mxu1 %v6668_v34  ;;  %v7165_v34 = vsub.f32 %v239_v21, %v7121_v19  ;;  %v8698_v21 = vld [vmem:[#allocation34_spill] sm:$0xff]  ;;  %v7194_v60 = vsub.f32 %v238_v20, %v7144_v27  ;;  %v7209_v20 = vsub.f32 %v222_v22, %v7156_v5  ;;  %v8718_v22 = vand.u32 4294901760, %v6776_v37 }
 0x2cc   :  { %4703 = vmatprep.subr.mxu0 %v8691_v46  ;;  %8692 = vst [vmem:[#allocation7_spill] sm:$0xff] %v7154_v25  ;;  %4749 = vmatprep.subr.mxu1 %v6682_v12  ;;  %v8695_v12 = vld [vmem:[#allocation18_spill] sm:$0xff]  ;;  %8697 = vst [vmem:[#allocation9_spill] sm:$0xff] %v7182_v63  ;;  %v8314_v51 = vand.u32 4294901760, %v7154_v25  ;;  %v7211_v46 = vand.u32 4294901760, %v220_v28  ;;  %v8720_v37 = vand.u32 4294901760, %v8670_v4 }
 0x2cd   :  { %4704 = vmatpush3.msra.mxu0 %v8693_v3  ;;  %8694 = vst [vmem:[#allocation8_spill] sm:$0xff] %v7165_v34  ;;  %4750 = vmatpush3.msra.mxu1 %v6697_v42  ;;  %v8696_v10 = vand.u32 4294901760, %v8695_v12  ;;  %v8311_v42 = vand.u32 4294901760, %v7142_v32  ;;  %8700 = vst [vmem:[#allocation11_spill] sm:$0xff] %v7194_v60  ;;  %v234_v3 = vld [vmem:[%s8086_s3 + $0x3c0] sm:$0xff]  ;;  %v8313_v41 = vand.u32 4294901760, %v7165_v34  ;;  %v7221_v12 = vsub.f32 %v237_v9, %v7167_v18 }
 0x2ce   :  { %4751 = vmatprep.subr.mxu1 %v8698_v21  ;;  %8702 = vst [vmem:[#allocation13_spill] sm:$0xff] %v7209_v20  ;;  %v8705_v21 = vand.u32 4294901760, %v8668_v31  ;;  %v7236_v9 = vand.u32 4294901760, %v219_v30  ;;  %v8707_v31 = vand.u32 4294901760, %v8669_v45  ;;  %v3134_v45 = vsub.f32 %v7154_v25, %v8314_v51 }
 0x2cf   :  { %4705 = vmatprep.subr.mxu0 %v8696_v10  ;;  %4752 = vmatpush3.msra.mxu1 %v6726_v7  ;;  %v8703_v7 = vand.u32 4294901760, %v8667_v14  ;;  %8704 = vst [vmem:[#allocation15_spill] sm:$0xff] %v7221_v12  ;;  %v7223_v10 = vand.u32 4294901760, %v235_v6  ;;  %v8317_v14 = vand.u32 4294901760, %v7182_v63  ;;  %v3253_v39 = vsub.f32 %v7165_v34, %v8313_v41 }
 0x2d0   :  { %4706 = vmatpush3.msra.mxu0 %v8699_v53  ;;  %4753 = vmatprep.subr.mxu1 %v6742_v49  ;;  %v3127_v49 = vsub.f32 %v7131_v56, %v8309_v62  ;;  %v7234_v53 = vsub.f32 %v221_v61, %v7184_v1  ;;  %v7249_v61 = vsub.f32 %v236_v52, %v7196_v40  ;;  %v8709_v62 = vld [vmem:[#allocation31_spill] sm:$0xff]  ;;  %v8712_v52 = vld [vmem:[#allocation17_spill] sm:$0xff]  ;;  %v8722_v4 = vand.u32 4294901760, %v7221_v12 }
 0x2d1   :  { %4707 = vmatprep.subr.mxu0 %v8701_v48  ;;  %4754 = vmatpush3.msra.mxu1 %v6753_v50  ;;  %v218_v48 = vld [vmem:[%s8086_s3 + $0x340] sm:$0xff]  ;;  %v3246_v50 = vsub.f32 %v7142_v32, %v8311_v42  ;;  %v7261_v42 = vsub.f32 %v220_v28, %v7211_v46  ;;  %v8713_v58 = vand.u32 4294901760, %v8712_v52  ;;  %v233_v28 = vld [vmem:[%s8086_s3 + $0x3b8] sm:$0xff]  ;;  %v3141_v41 = vsub.f32 %v7182_v63, %v8317_v14  ;;  %v216_v14 = vld [vmem:[%s8086_s3 + $0x330] sm:$0xff] }
 0x2d2   :  { %4708 = vmatpush3.msra.mxu0 %v8703_v7  ;;  %8706 = vst [vmem:[#allocation16_spill] sm:$0xff] %v7234_v53  ;;  %4755 = vmatprep.subr.mxu1 %v6764_v54  ;;  %v8315_v7 = vand.u32 4294901760, %v7194_v60  ;;  %8708 = vst [vmem:[#allocation20_spill] sm:$0xff] %v7249_v61  ;;  %v3240_v54 = vand.u32 4294901760, %v3239_v57  ;;  %v7273_v57 = vand.u32 4294901760, %v218_v48  ;;  %v8320_v51 = vand.u32 4294901760, %v7234_v53 }
 0x2d3   :  { %4709 = vmatprep.subr.mxu0 %v8705_v21  ;;  %v7251_v21 = vand.u32 4294901760, %v234_v3  ;;  %4756 = vmatpush3.msra.mxu1 %v8709_v62  ;;  %8711 = vst [vmem:[#allocation4_spill] sm:$0xff] %v7261_v42  ;;  %v7271_v62 = vsub.f32 %v235_v6, %v7223_v10  ;;  %v7286_v6 = vsub.f32 %v219_v30, %v7236_v9  ;;  %v217_v30 = vld [vmem:[%s8086_s3 + $0x338] sm:$0xff] }
 0x2d4   :  { %4710 = vmatpush3.msra.mxu0 %v8707_v31  ;;  %v8316_v31 = vand.u32 4294901760, %v7209_v20  ;;  %4757 = vmatprep.subr.mxu1 %v6789_v11  ;;  %v8715_v11 = vld [vmem:[#allocation29_spill] sm:$0xff] }
 0x2d5   :  { %4711 = vmatprep.subr.mxu0 %v8710_v43  ;;  %8714 = vst [vmem:[#allocation19_spill] sm:$0xff] %v7271_v62  ;;  %4758 = vmatpush3.msra.mxu1 %v6802_v16  ;;  %v8716_v52 = vand.u32 4294901760, %v8715_v11  ;;  %8717 = vst [vmem:[#allocation10_spill] sm:$0xff] %v7286_v6  ;;  %v3247_v43 = vand.u32 4294901760, %v3246_v50  ;;  %v7294_v16 = vsub.f32 %v7194_v60, %v8315_v7  ;;  %v8721_v7 = vld [vmem:[#allocation30_spill] sm:$0xff]  ;;  %v8724_v50 = vand.u32 4294901760, %v6800_v0 }
 0x2d6   :  { %4712 = vmatpush3.msra.mxu0 %v8713_v58  ;;  %v3128_v58 = vand.u32 4294901760, %v3127_v49  ;;  %4759 = vmatprep.subr.mxu1 %v6812_v55  ;;  %v7298_v11 = vsub.f32 %v234_v3, %v7251_v21  ;;  %v3135_v55 = vand.u32 4294901760, %v3134_v45  ;;  %v232_v3 = vld [vmem:[%s8086_s3 + $0x3b0] sm:$0xff]  ;;  %v7321_v45 = vsub.f32 %v7221_v12, %v8722_v4  ;;  %v213_v60 = vld [vmem:[%s8086_s3 + $0x318] sm:$0xff] }
 0x2d7   :  { %4713 = vmatprep.subr.mxu0 %v8716_v52  ;;  %4760 = vmatpush3.msra.mxu1 %v6822_v44  ;;  %v7312_v52 = vand.u32 4294901760, %v233_v28  ;;  %v3254_v44 = vand.u32 4294901760, %v3253_v39  ;;  %v8725_v49 = vld [vmem:[#allocation36_spill] sm:$0xff]  ;;  %v7336_v39 = vsub.f32 %v7234_v53, %v8320_v51  ;;  %v8726_v0 = vand.u32 4294901760, %v8673_v47  ;;  %v215_v53 = vld [vmem:[%s8086_s3 + $0x328] sm:$0xff] }
 0x2d8   :  { %4714 = vmatpush3.msra.mxu0 %v8718_v22  ;;  %8719 = vst [vmem:[#allocation27_spill] sm:$0xff] %v7298_v11  ;;  %v7309_v22 = vsub.f32 %v7209_v20, %v8316_v31  ;;  %2984 = vmatmul.mubr.f32.vlgmr.msra.gmra.mxu1 %v8721_v7  ;;  %v7325_v31 = vsub.f32 %v218_v48, %v7273_v57  ;;  %v231_v48 = vld [vmem:[%s8086_s3 + $0x3a8] sm:$0xff]  ;;  %v7353_v4 = vand.u32 4294901760, %v232_v3  ;;  %v7369_v51 = vand.u32 4294901760, %v216_v14  ;;  %v8733_v20 = vld [vmem:[#allocation37_spill] sm:$0xff] }
 0x2d9   :  { %4715 = vmatprep.subr.mxu0 %v8720_v37  ;;  %4805 = vmatprep.subr.mxu1 %v3240_v54  ;;  %v3142_v54 = vand.u32 4294901760, %v3141_v41  ;;  %v7339_v37 = vand.u32 4294901760, %v217_v30  ;;  %v8727_v41 = vand.u32 4294901760, %v7249_v61 }
 0x2da   :  { %8723 = vst [vmem:[#allocation32_spill] sm:$0xff] %v7325_v31  ;;  %4716 = vmatpush3.msra.mxu0 %v8724_v50  ;;  %2989 = vmatprep.mubr.f32.mxu1 %v8725_v49  ;;  %v3261_v50 = vand.u32 4294901760, %v7294_v16  ;;  %v3149_v47 = vand.u32 4294901760, %v7309_v22  ;;  %v8729_v16 = vand.u32 4294901760, %v7261_v42  ;;  %v8732_v22 = vand.u32 4294901760, %v7271_v62 }
 0x2db   :  { %4806 = vmatpush3.msra.mxu1 %v3128_v58  ;;  %4717 = vmatprep.subr.mxu0 %v8726_v0  ;;  %v7350_v12 = vsub.f32 %v7249_v61, %v8727_v41  ;;  %v8728_v58 = vand.u32 4294901760, %v6820_v26  ;;  %v7367_v41 = vsub.f32 %v233_v28, %v7312_v52  ;;  %v230_v61 = vld [vmem:[%s8086_s3 + $0x3a0] sm:$0xff]  ;;  %v8731_v26 = vand.u32 4294901760, %v6832_v33  ;;  %v229_v28 = vld [vmem:[%s8086_s3 + $0x398] sm:$0xff] }
 0x2dc   :  { %4807 = vmatprep.subr.mxu1 %v3247_v43  ;;  %v7364_v0 = vsub.f32 %v7261_v42, %v8729_v16  ;;  %v3268_v43 = vand.u32 4294901760, %v7321_v45  ;;  %v7383_v16 = vand.u32 4294901760, %v231_v48  ;;  %v214_v42 = vld [vmem:[%s8086_s3 + $0x320] sm:$0xff]  ;;  %2991 = vmatmul.mubr.f32.gmra.mxu1 %v8733_v20  ;;  %v3156_v33 = vand.u32 4294901760, %v7336_v39 }
 0x2dd   :  { %4718 = vmatpush3.msra.mxu0 %v8728_v58  ;;  %8730 = vst [vmem:[#allocation35_spill] sm:$0xff] %v7367_v41  ;;  %4808 = vmatpush3.msra.mxu1 %v3135_v55  ;;  %v7380_v58 = vsub.f32 %v7271_v62, %v8732_v22  ;;  %v8734_v55 = vand.u32 4294901760, %v7286_v6  ;;  %v7398_v22 = vand.u32 4294901760, %v215_v53  ;;  %v8737_v62 = vand.u32 4294901760, %v6840_v2 }
 0x2de   :  { %4719 = vmatprep.subr.mxu0 %v8731_v26  ;;  %4809 = vmatprep.subr.mxu1 %v3254_v44  ;;  %v7396_v26 = vsub.f32 %v217_v30, %v7339_v37  ;;  %v3275_v44 = vand.u32 4294901760, %v7350_v12  ;;  %v8738_v39 = vand.u32 4294901760, %v7298_v11  ;;  %v7412_v30 = vsub.f32 %v232_v3, %v7353_v4 }
 0x2df   :  { %v7393_v45 = vsub.f32 %v7286_v6, %v8734_v55  ;;  %8736 = vst [vmem:[#allocation28_spill] sm:$0xff] %v7398_v22  ;;  %4720 = vmatpush3.msra.mxu0 %v8737_v62  ;;  %4810 = vmatpush3.msra.mxu1 %v3142_v54  ;;  %v7414_v6 = vand.u32 4294901760, %v230_v61  ;;  %v8740_v2 = vand.u32 4294901760, %v6848_v17  ;;  %v3163_v12 = vand.u32 4294901760, %v7364_v0 }
 0x2e0   :  { %8735 = vst [vmem:[#allocation33_spill] sm:$0xff] %v7396_v26  ;;  %v7409_v55 = vsub.f32 %v7298_v11, %v8738_v39  ;;  %8739 = vst [vmem:[#allocation5_spill] sm:$0xff] %v7412_v30  ;;  %3348 = vmatprep.mubr.f32.mxu1 %v7064_v59  ;;  %v7425_v54 = vsub.f32 %v216_v14, %v7369_v51  ;;  %v7427_v3 = vand.u32 4294901760, %v214_v42  ;;  %v228_v39 = vld [vmem:[%s8086_s3 + $0x390] sm:$0xff]  ;;  %4811 = vmatprep.subr.mxu1 %v3261_v50 }
 0x2e1   :  { %4721 = vmatprep.subr.mxu0 %v8740_v2  ;;  %v8742_v11 = vand.u32 4294901760, %v6856_v38  ;;  %v3282_v17 = vand.u32 4294901760, %v7380_v58  ;;  %v8743_v2 = vand.u32 4294901760, %v7325_v31  ;;  %v7441_v14 = vsub.f32 %v231_v48, %v7383_v16  ;;  %v212_v59 = vld [vmem:[%s8086_s3 + $0x310] sm:$0xff]  ;;  %4812 = vmatpush3.msra.mxu1 %v3149_v47  ;;  %v227_v48 = vld [vmem:[%s8086_s3 + $0x388] sm:$0xff] }
 0x2e2   :  { %8741 = vst [vmem:[#allocation23_spill] sm:$0xff] %v7425_v54  ;;  %v7443_v62 = vand.u32 4294901760, %v229_v28  ;;  %v3170_v38 = vand.u32 4294901760, %v7393_v45  ;;  %v7452_v50 = vsub.f32 %v215_v53, %v7398_v22  ;;  %v7454_v58 = vand.u32 4294901760, %v213_v60  ;;  %4813 = vmatprep.subr.mxu1 %v3268_v43  ;;  %v211_v53 = vld [vmem:[%s8086_s3 + $0x308] sm:$0xff] }
 0x2e3   :  { %4722 = vmatpush3.msra.mxu0 %v8742_v11  ;;  %v7438_v0 = vsub.f32 %v7325_v31, %v8743_v2  ;;  %v3289_v47 = vand.u32 4294901760, %v7409_v55  ;;  %v7463_v45 = vsub.f32 %v230_v61, %v7414_v6  ;;  %v7465_v2 = vand.u32 4294901760, %v228_v39  ;;  %v226_v31 = vld [vmem:[%s8086_s3 + $0x380] sm:$0xff]  ;;  %4814 = vmatpush3.msra.mxu1 %v3156_v33 }
 0x2e4   :  { %2873 = vmatmul.mubr.f32.vlgmr.msra.gmra.mxu0 %v8721_v7  ;;  %8744 = vst [vmem:[#allocation18_spill] sm:$0xff] %v7452_v50  ;;  %4767 = vmatprep.subr.mxu0 %v7077_v29  ;;  %v8747_v11 = vand.u32 4294901760, %v7367_v41  ;;  %v7477_v7 = vsub.f32 %v214_v42, %v7427_v3  ;;  %v7479_v61 = vand.u32 4294901760, %v212_v59  ;;  %v7490_v55 = vand.u32 4294901760, %v227_v48  ;;  %v210_v42 = vld [vmem:[%s8086_s3 + $0x300] sm:$0xff] }
 0x2e5   :  { %8745 = vst [vmem:[#allocation34_spill] sm:$0xff] %v7463_v45  ;;  %8746 = vst [vmem:[#allocation31_spill] sm:$0xff] %v7465_v2  ;;  %2878 = vmatprep.mubr.f32.mxu0 %v8725_v49  ;;  %4768 = vmatpush3.msra.mxu0 %v7094_v8  ;;  %v3177_v49 = vand.u32 4294901760, %v7438_v0  ;;  %v8750_v33 = vand.u32 4294901760, %v7396_v26  ;;  %v7501_v63 = vsub.f32 %v213_v60, %v7454_v58  ;;  %v8751_v34 = vand.u32 4294901760, %v7412_v30 }
 0x2e6   :  { %v3295_v43 = vsub.f32 %v7367_v41, %v8747_v11  ;;  %8748 = vst [vmem:[#allocation17_spill] sm:$0xff] %v7479_v61  ;;  %4769 = vmatprep.subr.mxu0 %v7102_v15  ;;  %v7488_v11 = vsub.f32 %v229_v28, %v7443_v62  ;;  %4815 = vmatprep.subr.mxu1 %v3275_v44  ;;  %v7503_v28 = vand.u32 4294901760, %v211_v53  ;;  %v8753_v60 = vand.u32 4294901760, %v7425_v54 }
 0x2e7   :  { %4770 = vmatpush3.msra.mxu0 %v7113_v24  ;;  %v3183_v41 = vsub.f32 %v7396_v26, %v8750_v33  ;;  %4816 = vmatpush3.msra.mxu1 %v3163_v12  ;;  %v3302_v44 = vsub.f32 %v7412_v30, %v8751_v34  ;;  %v7511_v32 = vsub.f32 %v228_v39, %v7465_v2  ;;  %v7513_v33 = vand.u32 4294901760, %v226_v31 }
 0x2e8   :  { %8749 = vst [vmem:[#allocation29_spill] sm:$0xff] %v7488_v11  ;;  %2880 = vmatmul.mubr.f32.gmra.mxu0 %v8733_v20  ;;  %4771 = vmatprep.subr.mxu0 %v7121_v19  ;;  %v3190_v12 = vsub.f32 %v7425_v54, %v8753_v60  ;;  %v7521_v0 = vsub.f32 %v212_v59, %v7479_v61  ;;  %v7523_v34 = vand.u32 4294901760, %v210_v42  ;;  %v8754_v39 = vand.u32 4294901760, %v7175_v13 }
 0x2e9   :  { %8752 = vst [vmem:[#allocation30_spill] sm:$0xff] %v7511_v32  ;;  %4817 = vmatprep.subr.mxu1 %v3282_v17  ;;  %4772 = vmatpush3.msra.mxu0 %v7133_v23  ;;  %v3296_v25 = vand.u32 4294901760, %v3295_v43  ;;  %v8755_v30 = vand.u32 4294901760, %v7441_v14  ;;  %v8357_v26 = vand.u32 4294901760, %v7488_v11  ;;  %v7533_v60 = vsub.f32 %v227_v48, %v7490_v55 }
 0x2ea   :  { %3097 = vmatprep.mubr.f32.mxu0 %v8754_v39  ;;  %4818 = vmatpush3.msra.mxu1 %v3170_v38  ;;  %v3184_v59 = vand.u32 4294901760, %v3183_v41  ;;  %v8756_v20 = vand.u32 4294901760, %v7452_v50  ;;  %v7541_v43 = vsub.f32 %v211_v53, %v7503_v28  ;;  %v8757_v48 = vand.u32 4294901760, %v7463_v45 }
 0x2eb   :  { %v3309_v17 = vsub.f32 %v7441_v14, %v8755_v30  ;;  %4773 = vmatprep.subr.mxu0 %v7144_v27  ;;  %4819 = vmatprep.subr.mxu1 %v3289_v47  ;;  %v3303_v30 = vand.u32 4294901760, %v3302_v44  ;;  %v7549_v41 = vsub.f32 %v226_v31, %v7513_v33  ;;  %v8758_v53 = vand.u32 4294901760, %v7477_v7 }
 0x2ec   :  { %v3197_v54 = vsub.f32 %v7452_v50, %v8756_v20  ;;  %4774 = vmatpush3.msra.mxu0 %v7156_v5  ;;  %v3316_v38 = vsub.f32 %v7463_v45, %v8757_v48  ;;  %4820 = vmatpush3.msra.mxu1 %v3177_v49  ;;  %v3191_v20 = vand.u32 4294901760, %v3190_v12  ;;  %v7557_v44 = vsub.f32 %v210_v42, %v7523_v34  ;;  %v88_v48 = vld [vmem:[%s8087_s2 + $0x30] sm:$0xff] }
 0x2ed   :  { %4775 = vmatprep.subr.mxu0 %v7167_v18  ;;  %v3204_v47 = vsub.f32 %v7477_v7, %v8758_v53  ;;  %4821 = vmatprep.subr.mxu1 %v3296_v25  ;;  %v3310_v31 = vand.u32 4294901760, %v3309_v17  ;;  %v3323_v49 = vsub.f32 %v7488_v11, %v8357_v26  ;;  %v8759_v42 = vand.u32 4294901760, %v7501_v63 }
 0x2ee   :  { %4776 = vmatpush3.msra.mxu0 %v7184_v1  ;;  %4822 = vmatpush3.msra.mxu1 %v3184_v59  ;;  %v3198_v53 = vand.u32 4294901760, %v3197_v54  ;;  %v3317_v25 = vand.u32 4294901760, %v3316_v38  ;;  %v8760_v17 = vand.u32 4294901760, %v7511_v32  ;;  %v97_v54 = vld [vmem:[%s8087_s2 + $0x78] sm:$0xff]  ;;  %v8761_v59 = vld [vmem:[#allocation22_spill] sm:$0xff]  ;;  %v8362_v39 = vand.u32 4294901760, %v7557_v44 }
 0x2ef   :  { %4777 = vmatprep.subr.mxu0 %v7196_v40  ;;  %v3211_v13 = vsub.f32 %v7501_v63, %v8759_v42  ;;  %4823 = vmatprep.subr.mxu1 %v3303_v30  ;;  %v104_v11 = vmul.f32 %v8761_v59, %v88_v48  ;;  %v3205_v42 = vand.u32 4294901760, %v3204_v47  ;;  %v8762_v30 = vand.u32 4294901760, %v7521_v0  ;;  %v8765_v59 = vld [vmem:[#allocation26_spill] sm:$0xff] }
 0x2f0   :  { %4778 = vmatpush3.msra.mxu0 %v7211_v46  ;;  %v3330_v26 = vsub.f32 %v7511_v32, %v8760_v17  ;;  %4824 = vmatpush3.msra.mxu1 %v3191_v20  ;;  %v3324_v17 = vand.u32 4294901760, %v3323_v49  ;;  %v8763_v12 = vand.u32 4294901760, %v7533_v60  ;;  %v8764_v47 = vand.u32 4294901760, %v7541_v43 }
 0x2f1   :  { %4779 = vmatprep.subr.mxu0 %v7223_v10  ;;  %v3218_v38 = vsub.f32 %v7521_v0, %v8762_v30  ;;  %4825 = vmatprep.subr.mxu1 %v3310_v31  ;;  %v3212_v20 = vand.u32 4294901760, %v3211_v13  ;;  %v113_v30 = vmul.f32 %v8765_v59, %v97_v54  ;;  %v96_v31 = vld [vmem:[%s8087_s2 + $0x70] sm:$0xff]  ;;  %v3232_v54 = vsub.f32 %v7557_v44, %v8362_v39  ;;  %v8768_v59 = vld [vmem:[#allocation25_spill] sm:$0xff]  ;;  %s5002_s2 = smov 126  }
 0x2f2   :  { %4780 = vmatpush3.msra.mxu0 %v7236_v9  ;;  %v3337_v32 = vsub.f32 %v7533_v60, %v8763_v12  ;;  %4826 = vmatpush3.msra.mxu1 %v3198_v53  ;;  %v3225_v48 = vsub.f32 %v7541_v43, %v8764_v47  ;;  %v3331_v49 = vand.u32 4294901760, %v3330_v26  ;;  %v8766_v12 = vand.u32 4294901760, %v7549_v41 }
 0x2f3   :  { %4781 = vmatprep.subr.mxu0 %v7251_v21  ;;  %4827 = vmatprep.subr.mxu1 %v3317_v25  ;;  %v3219_v13 = vand.u32 4294901760, %v3218_v38  ;;  %v7606_v47 = vand.u32 4294901760, %v104_v11  ;;  %v112_v26 = vmul.f32 %v8768_v59, %v96_v31  ;;  %v3233_v39 = vand.u32 4294901760, %v3232_v54  ;;  %v8772_v59 = vld [vmem:[#allocation14_spill] sm:$0xff] }
 0x2f4   :  { %4782 = vmatpush3.msra.mxu0 %v7273_v57  ;;  %v3344_v53 = vsub.f32 %v7549_v41, %v8766_v12  ;;  %4828 = vmatpush3.msra.mxu1 %v3205_v42  ;;  %v3338_v25 = vand.u32 4294901760, %v3337_v32  ;;  %v3226_v12 = vand.u32 4294901760, %v3225_v48  ;;  %v7611_v42 = vand.u32 4294901760, %v113_v30 }
 0x2f5   :  { %4783 = vmatprep.subr.mxu0 %v7312_v52  ;;  %8767 = vst [vmem:[#allocation36_spill] sm:$0xff] %v7606_v47  ;;  %4829 = vmatprep.subr.mxu1 %v3324_v17  ;;  %v7616_v17 = vsub.f32 %v104_v11, %v7606_v47  ;;  %v7619_v32 = vand.u32 4294901760, %v112_v26 }
 0x2f6   :  { %4784 = vmatpush3.msra.mxu0 %v7339_v37  ;;  %4830 = vmatpush3.msra.mxu1 %v3212_v20  ;;  %8769 = vst [vmem:[#allocation37_spill] sm:$0xff] %v7611_v42  ;;  %v3345_v38 = vand.u32 4294901760, %v3344_v53  ;;  %v7623_v20 = vsub.f32 %v113_v30, %v7611_v42  ;;  %v8771_v53 = vand.u32 4294901760, %v7089_v35 }
 0x2f7   :  { %4785 = vmatprep.subr.mxu0 %v7353_v4  ;;  %4831 = vmatprep.subr.mxu1 %v3331_v49  ;;  %8770 = vst [vmem:[#allocation22_spill] sm:$0xff] %v7619_v32  ;;  %v8365_v11 = vand.u32 4294901760, %v7616_v17  ;;  %v7631_v48 = vsub.f32 %v112_v26, %v7619_v32 }
 0x2f8   :  { %4786 = vmatpush3.msra.mxu0 %v7369_v51  ;;  %4832 = vmatpush3.msra.mxu1 %v3219_v13  ;;  %v8364_v30 = vand.u32 4294901760, %v7623_v20 }
 0x2f9   :  { %4787 = vmatprep.subr.mxu0 %v7383_v16  ;;  %4833 = vmatprep.subr.mxu1 %v3338_v25  ;;  %v8363_v31 = vand.u32 4294901760, %v7631_v48 }
 0x2fa   :  { %4788 = vmatpush3.msra.mxu0 %v7398_v22  ;;  %4834 = vmatpush3.msra.mxu1 %v3226_v12  ;;  %v3110_v49 = vsub.f32 %v7623_v20, %v8364_v30  ;;  %v8773_v12 = vld [vmem:[#allocation7_spill] sm:$0xff] }
 0x2fb   :  { %4789 = vmatprep.subr.mxu0 %v7414_v6  ;;  %4835 = vmatprep.subr.mxu1 %v3345_v38  ;;  %v3116_v54 = vsub.f32 %v7631_v48, %v8363_v31  ;;  %v8774_v38 = vld [vmem:[#allocation8_spill] sm:$0xff]  ;;  %v8783_v31 = vld [vmem:[#allocation10_spill] sm:$0xff]  ;;  %v8784_v30 = vld [vmem:[#allocation27_spill] sm:$0xff] }
 0x2fc   :  { %4790 = vmatpush3.msra.mxu0 %v7427_v3  ;;  %4836 = vmatpush3.msra.mxu1 %v3233_v39  ;;  %v3101_v39 = vsub.f32 %v7616_v17, %v8365_v11  ;;  %v3111_v25 = vand.u32 4294901760, %v3110_v49  ;;  %v8776_v49 = vld [vmem:[#allocation11_spill] sm:$0xff]  ;;  %v8785_v11 = vld [vmem:[#allocation32_spill] sm:$0xff] }
 0x2fd   :  { %4791 = vmatprep.subr.mxu0 %v7443_v62  ;;  %3350 = vmatmul.mubr.f32.vlgmr.msra.gmra.mxu1 %v7606_v47  ;;  %v3117_v26 = vand.u32 4294901760, %v3116_v54  ;;  %v8779_v54 = vld [vmem:[#allocation16_spill] sm:$0xff]  ;;  %v8788_v47 = vld [vmem:[#allocation5_spill] sm:$0xff] }
 0x2fe   :  { %4881 = vmatprep.subr.mxu1 %v7077_v29  ;;  %4792 = vmatpush3.msra.mxu0 %v7454_v58  ;;  %v3102_v13 = vand.u32 4294901760, %v3101_v39  ;;  %v8775_v39 = vld [vmem:[#allocation9_spill] sm:$0xff] }
 0x2ff   :  { %3355 = vmatprep.mubr.f32.mxu1 %v7611_v42  ;;  %4882 = vmatpush3.msra.mxu1 %v7094_v8  ;;  %v8787_v42 = vld [vmem:[#allocation33_spill] sm:$0xff] }
 0x300   :  { %4793 = vmatprep.subr.mxu0 %v7465_v2  ;;  %4883 = vmatprep.subr.mxu1 %v7102_v15 }
 0x301   :  { %4794 = vmatpush3.msra.mxu0 %v7479_v61  ;;  %4884 = vmatpush3.msra.mxu1 %v7113_v24 }
 0x302   :  { %4795 = vmatprep.subr.mxu0 %v7490_v55  ;;  %3357 = vmatmul.mubr.f32.gmra.mxu1 %v7619_v32  ;;  %v8786_v32 = vld [vmem:[#allocation35_spill] sm:$0xff] }
 0x303   :  { %4885 = vmatprep.subr.mxu1 %v7121_v19  ;;  %4796 = vmatpush3.msra.mxu0 %v7503_v28 }
 0x304   :  { %4886 = vmatpush3.msra.mxu1 %v7133_v23  ;;  %3608 = vmatprep.mubr.f32.mxu1 %v8771_v53  ;;  %v8777_v53 = vld [vmem:[#allocation13_spill] sm:$0xff] }
 0x305   :  { %4797 = vmatprep.subr.mxu0 %v7513_v33  ;;  %4887 = vmatprep.subr.mxu1 %v7144_v27 }
 0x306   :  { %4798 = vmatpush3.msra.mxu0 %v7523_v34  ;;  %4888 = vmatpush3.msra.mxu1 %v7156_v5 }
 0x307   :  { %3103 = vmatmul.mubr.f32.vlgmr.msra.gmra.mxu0 %v3102_v13  ;;  %4843 = vmatprep.subr.mxu0 %v7111_v36  ;;  %v8778_v13 = vld [vmem:[#allocation15_spill] sm:$0xff] }
 0x308   :  { %4889 = vmatprep.subr.mxu1 %v7167_v18  ;;  %3112 = vmatprep.mubr.f32.mxu0 %v3111_v25  ;;  %v8780_v25 = vld [vmem:[#allocation20_spill] sm:$0xff] }
 0x309   :  { %4844 = vmatpush3.msra.mxu0 %v7131_v56  ;;  %4890 = vmatpush3.msra.mxu1 %v7184_v1 }
 0x30a   :  { %4845 = vmatprep.subr.mxu0 %v8772_v59  ;;  %4891 = vmatprep.subr.mxu1 %v7196_v40 }
 0x30b   :  { %4846 = vmatpush3.msra.mxu0 %v8773_v12  ;;  %4892 = vmatpush3.msra.mxu1 %v7211_v46 }
 0x30c   :  { %3118 = vmatmul.mubr.f32.gmra.mxu0 %v3117_v26  ;;  %4847 = vmatprep.subr.mxu0 %v8774_v38  ;;  %v8782_v26 = vld [vmem:[#allocation19_spill] sm:$0xff] }
 0x30d   :  { %4893 = vmatprep.subr.mxu1 %v7223_v10  ;;  %4848 = vmatpush3.msra.mxu0 %v8775_v39 }
 0x30e   :  { %3492 = vmatprep.mubr.f32.mxu0 %v7089_v35  ;;  %4894 = vmatpush3.msra.mxu1 %v7236_v9  ;;  %v8781_v35 = vld [vmem:[#allocation4_spill] sm:$0xff] }
 0x30f   :  { %4849 = vmatprep.subr.mxu0 %v8776_v49  ;;  %4895 = vmatprep.subr.mxu1 %v7251_v21 }
 0x310   :  { %4850 = vmatpush3.msra.mxu0 %v8777_v53  ;;  %4896 = vmatpush3.msra.mxu1 %v7273_v57 }
 0x311   :  { %4851 = vmatprep.subr.mxu0 %v8778_v13  ;;  %4897 = vmatprep.subr.mxu1 %v7312_v52 }
 0x312   :  { %4852 = vmatpush3.msra.mxu0 %v8779_v54  ;;  %4898 = vmatpush3.msra.mxu1 %v7339_v37 }
 0x313   :  { %4853 = vmatprep.subr.mxu0 %v8780_v25  ;;  %4899 = vmatprep.subr.mxu1 %v7353_v4 }
 0x314   :  { %4854 = vmatpush3.msra.mxu0 %v8781_v35  ;;  %4900 = vmatpush3.msra.mxu1 %v7369_v51 }
 0x315   :  { %4855 = vmatprep.subr.mxu0 %v8782_v26  ;;  %4901 = vmatprep.subr.mxu1 %v7383_v16 }
 0x316   :  { %4856 = vmatpush3.msra.mxu0 %v8783_v31  ;;  %4902 = vmatpush3.msra.mxu1 %v7398_v22  ;;  %v8789_v22 = vld [vmem:[#allocation23_spill] sm:$0xff] }
 0x317   :  { %4857 = vmatprep.subr.mxu0 %v8784_v30  ;;  %4903 = vmatprep.subr.mxu1 %v7414_v6 }
 0x318   :  { %4858 = vmatpush3.msra.mxu0 %v8785_v11  ;;  %4904 = vmatpush3.msra.mxu1 %v7427_v3 }
 0x319   :  { %4859 = vmatprep.subr.mxu0 %v8786_v32  ;;  %4905 = vmatprep.subr.mxu1 %v7443_v62 }
 0x31a   :  { %4860 = vmatpush3.msra.mxu0 %v8787_v42  ;;  %4906 = vmatpush3.msra.mxu1 %v7454_v58 }
 0x31b   :  { %4861 = vmatprep.subr.mxu0 %v8788_v47  ;;  %4907 = vmatprep.subr.mxu1 %v7465_v2  ;;  %v8790_v2 = vld [vmem:[#allocation29_spill] sm:$0xff] }
 0x31c   :  { %4862 = vmatpush3.msra.mxu0 %v8789_v22  ;;  %4908 = vmatpush3.msra.mxu1 %v7479_v61  ;;  %v8791_v61 = vand.u32 4294901760, %v7616_v17 }
 0x31d   :  { %4863 = vmatprep.subr.mxu0 %v7441_v14  ;;  %4909 = vmatprep.subr.mxu1 %v7490_v55 }
 0x31e   :  { %4864 = vmatpush3.msra.mxu0 %v7452_v50  ;;  %4910 = vmatpush3.msra.mxu1 %v7503_v28  ;;  %v8792_v50 = vand.u32 4294901760, %v7623_v20 }
 0x31f   :  { %4865 = vmatprep.subr.mxu0 %v7463_v45  ;;  %4911 = vmatprep.subr.mxu1 %v7513_v33  ;;  %v8793_v45 = vld [vmem:[#allocation30_spill] sm:$0xff] }
 0x320   :  { %4866 = vmatpush3.msra.mxu0 %v7477_v7  ;;  %4912 = vmatpush3.msra.mxu1 %v7523_v34 }
 0x321   :  { %4867 = vmatprep.subr.mxu0 %v8790_v2  ;;  %3612 = vmatmul.mubr.f32.vlgmr.msra.gmra.mxu1 %v8791_v61  ;;  %v8794_v61 = vand.u32 4294901760, %v7631_v48 }
 0x322   :  { %4957 = vmatprep.subr.mxu1 %v7077_v29  ;;  %4868 = vmatpush3.msra.mxu0 %v7501_v63  ;;  %v3930_v29 = vpop.permute.xlu0 %3929 }
 0x323   :  { %3619 = vmatprep.mubr.f32.mxu1 %v8792_v50  ;;  %4958 = vmatpush3.msra.mxu1 %v7094_v8  ;;  %v8795_v8 = vld [vmem:[#allocation6_spill] sm:$0xff]  ;;  %v8798_v50 = vand.u32 4294901760, %v7131_v56  ;;  %v8803_v56 = vand.u32 4294901760, %v8774_v38 }
 0x324   :  { %4869 = vmatprep.subr.mxu0 %v8793_v45  ;;  %4959 = vmatprep.subr.mxu1 %v7102_v15  ;;  %v8796_v15 = vld [vmem:[#allocation38_spill] sm:$0xff] }
 0x325   :  { %4870 = vmatpush3.msra.mxu0 %v7521_v0  ;;  %4960 = vmatpush3.msra.mxu1 %v7113_v24  ;;  %v3935_v24 = vsub.f32 %v8796_v15, %v3930_v29 }
 0x326   :  { %4871 = vmatprep.subr.mxu0 %v7533_v60  ;;  %3623 = vmatmul.mubr.f32.gmra.mxu1 %v8794_v61  ;;  %v8800_v61 = vand.u32 4294901760, %v8772_v59  ;;  %v8813_v59 = vand.u32 4294901760, %v8783_v31 }
 0x327   :  { %4961 = vmatprep.subr.mxu1 %v7121_v19  ;;  %4872 = vmatpush3.msra.mxu0 %v7541_v43  ;;  %v8797_v19 = vand.u32 4294901760, %v7111_v36  ;;  %v8801_v36 = vand.u32 4294901760, %v8773_v12  ;;  %v8815_v12 = vand.u32 4294901760, %v8784_v30  ;;  %v8819_v30 = vand.u32 4294901760, %v8788_v47  ;;  %v8828_v47 = vld [vmem:[#allocation34_spill] sm:$0xff] }
 0x328   :  { %4962 = vmatpush3.msra.mxu1 %v7133_v23  ;;  %3900 = vmatprep.mubr.f32.mxu1 %v8795_v8  ;;  %v3932_v23 = vpop.permute.xlu1 %3931  ;;  %v7808_v31 = vmul.f32 1.1, %v3935_v24  ;;  %v8829_v38 = vand.u32 4294901760, %v8828_v47 }
 0x329   :  { %4873 = vmatprep.subr.mxu0 %v7549_v41  ;;  %4963 = vmatprep.subr.mxu1 %v7144_v27  ;;  %v7742_v27 = vmul.f32 1.2, %v3935_v24 }
 0x32a   :  { %4874 = vmatpush3.msra.mxu0 %v7557_v44  ;;  %4964 = vmatpush3.msra.mxu1 %v7156_v5  ;;  %v8802_v5 = vld [vmem:[#allocation12_spill] sm:$0xff]  ;;  %8820 = vst [vmem:[#allocation14_spill] sm:$0xff] %v7808_v31 }
 0x32b   :  { %3495 = vmatmul.mubr.f32.vlgmr.msra.gmra.mxu0 %v7616_v17  ;;  %4919 = vmatprep.subr.mxu0 %v8797_v19  ;;  %8799 = vst [vmem:[#allocation26_spill] sm:$0xff] %v7742_v27 }
 0x32c   :  { %4965 = vmatprep.subr.mxu1 %v7167_v18  ;;  %3501 = vmatprep.mubr.f32.mxu0 %v7623_v20  ;;  %v3936_v18 = vsub.f32 %v8802_v5, %v3932_v23  ;;  %v8807_v20 = vand.u32 4294901760, %v8777_v53  ;;  %v8834_v53 = vld [vmem:[#allocation37_spill] sm:$0xff] }
 0x32d   :  { %4920 = vmatpush3.msra.mxu0 %v8798_v50  ;;  %4966 = vmatpush3.msra.mxu1 %v7184_v1  ;;  %v8804_v1 = vand.u32 4294901760, %v8775_v39  ;;  %v3963_v39 = vmul.f32 0.5, %v7808_v31 }
 0x32e   :  { %4921 = vmatprep.subr.mxu0 %v8800_v61  ;;  %4967 = vmatprep.subr.mxu1 %v7196_v40  ;;  %v3951_v40 = vmul.f32 0.5, %v7742_v27  ;;  %v7761_v17 = vmul.f32 1.2, %v3936_v18 }
 0x32f   :  { %4922 = vmatpush3.msra.mxu0 %v8801_v36  ;;  %4968 = vmatpush3.msra.mxu1 %v7211_v46  ;;  %v8806_v46 = vand.u32 4294901760, %v8776_v49  ;;  %v8832_v49 = vld [vmem:[#allocation36_spill] sm:$0xff] }
 0x330   :  { %3941 = vrot.lane.b32.xlu1 %v8796_v15, %s5002_s2  ;;  %3504 = vmatmul.mubr.f32.gmra.mxu0 %v7631_v48  ;;  %8805 = vst [vmem:[#allocation25_spill] sm:$0xff] %v7761_v17  ;;  %v8809_v48 = vand.u32 4294901760, %v8779_v54  ;;  %v7858_v54 = vpop.f32.mrf.mxu0 }
 0x331   :  { %4923 = vmatprep.subr.mxu0 %v8803_v56  ;;  %4969 = vmatprep.subr.mxu1 %v7223_v10  ;;  %v8808_v10 = vand.u32 4294901760, %v8778_v13  ;;  %v8840_v13 = vand.u32 4294901760, %v7549_v41 }
 0x332   :  { %4924 = vmatpush3.msra.mxu0 %v8804_v1  ;;  %3789 = vmatprep.mubr.f32.mxu0 %v8795_v8 }
 0x333   :  { %4970 = vmatpush3.msra.mxu1 %v7236_v9  ;;  %4925 = vmatprep.subr.mxu0 %v8806_v46  ;;  %v3952_v9 = vmul.f32 0.5, %v7761_v17 }
 0x334   :  { %4971 = vmatprep.subr.mxu1 %v7251_v21  ;;  %4926 = vmatpush3.msra.mxu0 %v8807_v20  ;;  %v8810_v21 = vand.u32 4294901760, %v8780_v25  ;;  %v7862_v25 = vpop.f32.mrf.mxu0 }
 0x335   :  { %4972 = vmatpush3.msra.mxu1 %v7273_v57  ;;  %3943 = vrot.lane.b32.xlu1 %v8802_v5, %s5002_s2  ;;  %v8811_v57 = vand.u32 4294901760, %v8781_v35 }
 0x336   :  { %3955 = vrot.lane.b32.xlu0 %v3951_v40, %s5002_s2  ;;  %4927 = vmatprep.subr.mxu0 %v8808_v10 }
 0x337   :  { %4973 = vmatprep.subr.mxu1 %v7312_v52  ;;  %4928 = vmatpush3.msra.mxu0 %v8809_v48  ;;  %v8812_v52 = vand.u32 4294901760, %v8782_v26 }
 0x338   :  { %4974 = vmatpush3.msra.mxu1 %v7339_v37  ;;  %4929 = vmatprep.subr.mxu0 %v8810_v21  ;;  %v8814_v37 = vld [vmem:[#allocation28_spill] sm:$0xff] }
 0x339   :  { %4975 = vmatprep.subr.mxu1 %v7353_v4  ;;  %4930 = vmatpush3.msra.mxu0 %v8811_v57  ;;  %v8816_v4 = vand.u32 4294901760, %v8785_v11  ;;  %v8822_v11 = vand.u32 4294901760, %v8789_v22  ;;  %v8830_v22 = vand.u32 4294901760, %v7477_v7  ;;  %v8836_v7 = vand.u32 4294901760, %v7521_v0  ;;  %v7854_v0 = vpop.f32.mrf.mxu1 }
 0x33a   :  { %4976 = vmatpush3.msra.mxu1 %v7369_v51  ;;  %3957 = vrot.lane.b32.xlu1 %v3952_v9, %s5002_s2  ;;  %v8817_v51 = vand.u32 4294901760, %v8786_v32  ;;  %v8824_v32 = vld [vmem:[#allocation17_spill] sm:$0xff] }
 0x33b   :  { %4931 = vmatprep.subr.mxu0 %v8812_v52  ;;  %4977 = vmatprep.subr.mxu1 %v7383_v16  ;;  %v8818_v16 = vand.u32 4294901760, %v8787_v42  ;;  %v4998_v52 = vld [vmem:[%s8088_s0] sm:$0xff] }
 0x33c   :  { %4932 = vmatpush3.msra.mxu0 %v8813_v59  ;;  %4978 = vmatpush3.msra.mxu1 %v8814_v37 }
 0x33d   :  { %4933 = vmatprep.subr.mxu0 %v8815_v12  ;;  %4979 = vmatprep.subr.mxu1 %v7414_v6  ;;  %v8821_v6 = vld [vmem:[#allocation31_spill] sm:$0xff] }
 0x33e   :  { %4934 = vmatpush3.msra.mxu0 %v8816_v4  ;;  %4980 = vmatpush3.msra.mxu1 %v7427_v3  ;;  %v7813_v3 = vmul.f32 1.1, %v3936_v18 }
 0x33f   :  { %4935 = vmatprep.subr.mxu0 %v8817_v51  ;;  %4981 = vmatprep.subr.mxu1 %v7443_v62  ;;  %v8825_v62 = vand.u32 4294901760, %v7441_v14  ;;  %v8831_v14 = vand.u32 4294901760, %v8790_v2  ;;  %v8837_v2 = vand.u32 4294901760, %v7533_v60  ;;  %v7856_v60 = vpop.f32.mrf.mxu1 }
 0x340   :  { %4936 = vmatpush3.msra.mxu0 %v8818_v16  ;;  %4982 = vmatpush3.msra.mxu1 %v7454_v58  ;;  %8823 = vst [vmem:[#allocation7_spill] sm:$0xff] %v7813_v3  ;;  %v8826_v58 = vld [vmem:[#allocation18_spill] sm:$0xff] }
 0x341   :  { %4937 = vmatprep.subr.mxu0 %v8819_v30  ;;  %4983 = vmatprep.subr.mxu1 %v8821_v6  ;;  %v8827_v42 = vand.u32 4294901760, %v8826_v58 }
 0x342   :  { %4938 = vmatpush3.msra.mxu0 %v8822_v11  ;;  %4984 = vmatpush3.msra.mxu1 %v8824_v32  ;;  %v4999_v11 = vld [vmem:[%s8088_s0 + $0x8] sm:$0xff] }
 0x343   :  { %4939 = vmatprep.subr.mxu0 %v8825_v62  ;;  %4985 = vmatprep.subr.mxu1 %v7490_v55  ;;  %v3964_v55 = vmul.f32 0.5, %v7813_v3  ;;  %v4155_v3 = vadd.f32 %v7856_v60, %v7854_v0 }
 0x344   :  { %4940 = vmatpush3.msra.mxu0 %v8827_v42  ;;  %4986 = vmatpush3.msra.mxu1 %v7503_v28  ;;  %v8833_v28 = vand.u32 4294901760, %v7501_v63  ;;  %v8839_v63 = vand.u32 4294901760, %v7541_v43  ;;  %v7860_v43 = vpop.f32.mrf.mxu1 }
 0x345   :  { %4941 = vmatprep.subr.mxu0 %v8829_v38  ;;  %4987 = vmatprep.subr.mxu1 %v7513_v33  ;;  %v8835_v33 = vand.u32 4294901760, %v8793_v45  ;;  %v8841_v45 = vand.u32 4294901760, %v7557_v44  ;;  %v7866_v44 = vpop.f32.mrf.mxu0 }
 0x346   :  { %4942 = vmatpush3.msra.mxu0 %v8830_v22  ;;  %4988 = vmatpush3.msra.mxu1 %v7523_v34  ;;  %v8838_v34 = vld [vmem:[#allocation22_spill] sm:$0xff]  ;;  %v7864_v41 = vpop.f32.mrf.mxu1 }
 0x347   :  { %4943 = vmatprep.subr.mxu0 %v8831_v14  ;;  %3902 = vmatmul.mubr.f32.vlgmr.msra.gmra.mxu1 %v8832_v49  ;;  %v7870_v26 = vpop.f32.mrf.mxu0 }
 0x348   :  { %4944 = vmatpush3.msra.mxu0 %v8833_v28  ;;  %3907 = vmatprep.mubr.f32.mxu1 %v8834_v53  ;;  %v7868_v35 = vpop.f32.mrf.mxu1 }
 0x349   :  { %4945 = vmatprep.subr.mxu0 %v8835_v33  ;;  %3967 = vrot.lane.b32.xlu0 %v3963_v39, %s5002_s2  ;;  %v7874_v8 = vpop.f32.mrf.mxu0 }
 0x34a   :  { %4946 = vmatpush3.msra.mxu0 %v8836_v7  ;;  %3969 = vrot.lane.b32.xlu1 %v3964_v55, %s5002_s2  ;;  %v7872_v29 = vpop.f32.mrf.mxu1 }
 0x34b   :  { %4947 = vmatprep.subr.mxu0 %v8837_v2  ;;  %3909 = vmatmul.mubr.f32.gmra.mxu1 %v8838_v34  ;;  %v4192_v24 = vpop.f32.mrf.mxu0 }
 0x34c   :  { %4948 = vmatpush3.msra.mxu0 %v8839_v63  ;;  %v7876_v15 = vpop.f32.mrf.mxu1  ;;  %v4193_v31 = vadd.f32 %v4192_v24, %v7874_v8  ;;  %v4231_v8 = vadd.f32 %v7872_v29, %v7868_v35 }
 0x34d   :  { %4949 = vmatprep.subr.mxu0 %v8840_v13  ;;  %v7880_v23 = vpop.f32.mrf.mxu0 }
 0x34e   :  { %4950 = vmatpush3.msra.mxu0 %v8841_v45  ;;  %v7878_v19 = vpop.f32.mrf.mxu1 }
 0x34f   :  { %3791 = vmatmul.mubr.f32.vlgmr.msra.gmra.mxu0 %v8832_v49  ;;  %v7884_v61 = vpop.f32.mrf.mxu0 }
 0x350   :  { %3796 = vmatprep.mubr.f32.mxu0 %v8834_v53  ;;  %v7882_v50 = vpop.f32.mrf.mxu1 }
 0x351   :  { %v7888_v5 = vpop.f32.mrf.mxu0 }
 0x352   :  { %v7886_v36 = vpop.f32.mrf.mxu1 }
 0x353   :  { %3798 = vmatmul.mubr.f32.gmra.mxu0 %v8838_v34  ;;  %v7892_v56 = vpop.f32.mrf.mxu0  ;;  %v4307_v35 = vadd.f32 %v7886_v36, %v7882_v50 }
 0x354   :  { %v7890_v18 = vpop.f32.mrf.mxu1 }
 0x355   :  { %v7896_v40 = vpop.f32.mrf.mxu0 }
 0x356   :  { %v7894_v1 = vpop.f32.mrf.mxu1 }
 0x357   :  { %v7900_v20 = vpop.f32.mrf.mxu0 }
 0x358   :  { %v7898_v46 = vpop.f32.mrf.mxu1 }
 0x359   :  { %v7904_v9 = vpop.f32.mrf.mxu0 }
 0x35a   :  { %v7902_v10 = vpop.f32.mrf.mxu1 }
 0x35b   :  { %v7908_v21 = vpop.f32.mrf.mxu0  ;;  %v4383_v50 = vadd.f32 %v7902_v10, %v7898_v46 }
 0x35c   :  { %v7906_v48 = vpop.f32.mrf.mxu1 }
 0x35d   :  { %v7915_v12 = vpop.f32.mrf.mxu0 }
 0x35e   :  { %v7913_v37 = vpop.f32.mrf.mxu1 }
 0x35f   :  { %v7921_v6 = vpop.f32.mrf.mxu0 }
 0x360   :  { %v7919_v51 = vpop.f32.mrf.mxu1 }
 0x361   :  { %v7929_v42 = vpop.f32.mrf.mxu0 }
 0x362   :  { %v7927_v58 = vpop.f32.mrf.mxu1 }
 0x363   :  { %v4420_v14 = vpop.f32.mrf.mxu0 }
 0x364   :  { %v7935_v39 = vpop.f32.mrf.mxu1 }
 0x365   :  { %v4422_v49 = vpop.f32.mrf.mxu0 }
 0x366   :  { %v7938_v55 = vpop.f32.mrf.mxu1 }
 0x367   :  { %v4423_v53 = vpop.f32.mrf.mxu0 }
 0x368   :  { %v7940_v28 = vpop.f32.mrf.mxu1 }
 0x369   :  { %v7944_v7 = vpop.f32.mrf.mxu0 }
 0x36a   :  { %v7942_v33 = vpop.f32.mrf.mxu1 }
 0x36b   :  { %v4496_v34 = vpop.f32.mrf.mxu0 }
 0x36c   :  { %v7946_v2 = vpop.f32.mrf.mxu1  ;;  %v4497_v46 = vadd.f32 %v4496_v34, %v7944_v7 }
 0x36d   :  { %v7950_v13 = vpop.f32.mrf.mxu0 }
 0x36e   :  { %v7948_v63 = vpop.f32.mrf.mxu1 }
 0x370   :  { %v7952_v45 = vpop.f32.mrf.mxu1 }
 0x3a2   :  { %v3942_v57 = vpop.permute.xlu1 %3941 }
 0x3a3   :  { %v3947_v59 = vadd.f32 %v4998_v52, %v3942_v57  ;;  %v7954_v57 = vpop.f32.mrf.mxu0  ;;  %v7956_v52 = vpop.f32.mrf.mxu1 }
 0x3a5   :  { %v7917_v4 = vmul.f32 0.5, %v3947_v59  ;;  %v7958_v59 = vpop.f32.mrf.mxu0 }
 0x3a7   :  { %8842 = vst [vmem:[#allocation8_spill] sm:$0xff] %v7917_v4  ;;  %v3944_v16 = vpop.permute.xlu1 %3943 }
 0x3a8   :  { %v3956_v30 = vpop.permute.xlu0 %3955  ;;  %v3948_v32 = vadd.f32 %v4999_v11, %v3944_v16  ;;  %v7960_v16 = vpop.f32.mrf.mxu1 }
 0x3a9   :  { %v3961_v62 = vsub.f32 %v7917_v4, %v3956_v30  ;;  %v7962_v30 = vpop.f32.mrf.mxu0  ;;  %v4120_v4 = vadd.f32 %v7870_v26, %v7866_v44 }
 0x3aa   :  { %v7931_v47 = vmul.f32 0.5, %v3948_v32  ;;  %v7964_v11 = vpop.f32.mrf.mxu1 }
 0x3ab   :  { %3995 = vrot.lane.b32.xlu0 %v3961_v62, %s5001_s24  ;;  %8844 = vst [vmem:[#allocation11_spill] sm:$0xff] %v7964_v11  ;;  %v7966_v32 = vpop.f32.mrf.mxu0 }
 0x3ac   :  { %8843 = vst [vmem:[#allocation9_spill] sm:$0xff] %v7931_v47  ;;  %v3958_v38 = vpop.permute.xlu1 %3957  ;;  %v7968_v62 = vpop.f32.mrf.mxu1 }
 0x3ad   :  { %v3962_v22 = vsub.f32 %v7931_v47, %v3958_v38  ;;  %8845 = vst [vmem:[#allocation13_spill] sm:$0xff] %v7968_v62  ;;  %v4117_v38 = vadd.f32 %v7862_v25, %v7858_v54  ;;  %v4158_v62 = vadd.f32 %v7864_v41, %v7860_v43  ;;  %v4196_v54 = vadd.f32 %v7884_v61, %v7880_v23 }
 0x3ae   :  { %v7977_v17 = vpop.f32.mrf.mxu1  ;;  %v4272_v41 = vadd.f32 %v7900_v20, %v7896_v40  ;;  %v4345_v61 = vadd.f32 %v7908_v21, %v7904_v9  ;;  %v4348_v40 = vadd.f32 %v7921_v6, %v7915_v12  ;;  %v4421_v20 = vadd.f32 %v4420_v14, %v7929_v42 }
 0x3af   :  { %3997 = vrot.lane.b32.xlu1 %v3962_v22, %s5001_s24  ;;  %v7972_v22 = vpop.f32.mrf.mxu0  ;;  %v598_v47 = vadd.f32 %v4155_v3, %v4117_v38  ;;  %v605_v60 = vadd.f32 %v4158_v62, %v4120_v4  ;;  %v4269_v3 = vadd.f32 %v7892_v56, %v7888_v5  ;;  %v4459_v12 = vadd.f32 %v7927_v58, %v7919_v51 }
 0x3b0   :  { %v7987_v25 = vpop.f32.mrf.mxu1  ;;  %v4573_v58 = vadd.f32 %v7962_v30, %v7958_v59 }
 0x3b1   :  { %v7979_v27 = vpop.f32.mrf.mxu0  ;;  %v743_v11 = vadd.f32 %v4193_v31, %v598_v47  ;;  %v752_v24 = vadd.f32 %v4196_v54, %v605_v60  ;;  %v4234_v31 = vadd.f32 %v7878_v19, %v7876_v15  ;;  %v4310_v15 = vadd.f32 %v7894_v1, %v7890_v18 }
 0x3b2   :  { %v7993_v44 = vpop.f32.mrf.mxu1  ;;  %v4386_v60 = vadd.f32 %v7913_v37, %v7906_v48  ;;  %v4424_v18 = vadd.f32 %v4423_v53, %v4422_v49  ;;  %v4500_v48 = vadd.f32 %v7954_v57, %v7950_v13  ;;  %v4535_v53 = vadd.f32 %v7942_v33, %v7940_v28 }
 0x3b3   :  { %v4648_v0 = vpop.f32.mrf.mxu0  ;;  %v860_v38 = vadd.f32 %v4231_v8, %v743_v11  ;;  %v871_v29 = vadd.f32 %v4234_v31, %v752_v24  ;;  %v4576_v13 = vadd.f32 %v7972_v22, %v7966_v32  ;;  %v4611_v57 = vadd.f32 %v7956_v52, %v7952_v45 }
 0x3b4   :  { %v7999_v23 = vpop.f32.mrf.mxu1  ;;  %v4649_v28 = vadd.f32 %v4648_v0, %v7979_v27  ;;  %v4690_v0 = vadd.f32 %v7993_v44, %v7987_v25 }
 0x3b5   :  { %v4650_v26 = vpop.f32.mrf.mxu0  ;;  %v1039_v43 = vadd.f32 %v4269_v3, %v860_v38  ;;  %v1046_v56 = vadd.f32 %v4272_v41, %v871_v29  ;;  %v4462_v38 = vadd.f32 %v7938_v55, %v7935_v39  ;;  %v4538_v39 = vadd.f32 %v7948_v63, %v7946_v2 }
 0x3b6   :  { %v8005_v47 = vpop.f32.mrf.mxu1 }
 0x3b7   :  { %v4651_v5 = vpop.f32.mrf.mxu0  ;;  %v1150_v4 = vadd.f32 %v4307_v35, %v1039_v43  ;;  %v1157_v36 = vadd.f32 %v4310_v15, %v1046_v56  ;;  %v8846_v56 = vld [vmem:[#allocation11_spill] sm:$0xff] }
 0x3b8   :  { %v8014_v9 = vpop.f32.mrf.mxu1  ;;  %v4652_v2 = vadd.f32 %v4651_v5, %v4650_v26 }
 0x3b9   :  { %v4723_v11 = vpop.f32.mrf.mxu0  ;;  %v1269_v19 = vadd.f32 %v4345_v61, %v1150_v4  ;;  %v1284_v62 = vadd.f32 %v4348_v40, %v1157_v36  ;;  %v4614_v4 = vadd.f32 %v8846_v56, %v7960_v16  ;;  %v4763_v16 = vadd.f32 %v8005_v47, %v7999_v23 }
 0x3ba   :  { %v4765_v1 = vpop.f32.mrf.mxu1 }
 0x3bb   :  { %v4724_v21 = vpop.f32.mrf.mxu0  ;;  %v1516_v54 = vadd.f32 %v4383_v50, %v1269_v19  ;;  %v1523_v6 = vadd.f32 %v4386_v60, %v1284_v62  ;;  %v8847_v19 = vld [vmem:[#allocation13_spill] sm:$0xff] }
 0x3bc   :  { %v4687_v32 = vadd.f32 %v7977_v17, %v8847_v19  ;;  %v4725_v40 = vadd.f32 %v4724_v21, %v4723_v11  ;;  %v8848_v60 = vld [vmem:[#allocation21_spill] sm:$0xff] }
 0x3bd   :  { %v1661_v8 = vadd.f32 %v4421_v20, %v1516_v54  ;;  %v4726_v3 = vpop.f32.mrf.mxu0  ;;  %v4837_v10 = vpop.f32.mrf.mxu1  ;;  %v1670_v42 = vadd.f32 %v4424_v18, %v1523_v6  ;;  %v3914_v17 = vcvt.s32.f32 %v8848_v60 }
 0x3bf   :  { %v1778_v14 = vadd.f32 %v4459_v12, %v1661_v8  ;;  %v4727_v24 = vpop.f32.mrf.mxu0  ;;  %v4838_v37 = vpop.f32.mrf.mxu1  ;;  %v1789_v51 = vadd.f32 %v4462_v38, %v1670_v42  ;;  %v4766_v12 = vadd.f32 %v4765_v1, %v8014_v9  ;;  %v3917_v25 = vmul.f32 0.0625, %v3914_v17 }
 0x3c0   :  { %v4728_v20 = vadd.f32 %v4727_v24, %v4726_v3  ;;  %v8849_v3 = vld [vmem:[#allocation24_spill] sm:$0xff] }
 0x3c1   :  { %v1957_v31 = vadd.f32 %v4497_v46, %v1778_v14  ;;  %v1964_v7 = vadd.f32 %v4500_v48, %v1789_v51  ;;  %v3915_v42 = vcvt.s32.f32 %v8849_v3  ;;  %v4839_v14 = vadd.f32 %v4838_v37, %v4837_v10 }
 0x3c2   :  { %v4840_v43 = vpop.f32.mrf.mxu1  ;;  %v3919_v48 = vfloor.f32 %v3917_v25 }
 0x3c3   :  { %v2068_v34 = vadd.f32 %v4535_v53, %v1957_v31  ;;  %v2075_v35 = vadd.f32 %v4538_v39, %v1964_v7  ;;  %v3918_v53 = vmul.f32 0.0625, %v3915_v42 }
 0x3c4   :  { %v4841_v33 = vpop.f32.mrf.mxu1 }
 0x3c5   :  { %v2187_v55 = vadd.f32 %v4573_v58, %v2068_v34  ;;  %v2202_v59 = vadd.f32 %v4576_v13, %v2075_v35  ;;  %v4842_v51 = vadd.f32 %v4841_v33, %v4840_v43  ;;  %v3920_v13 = vfloor.f32 %v3918_v53 }
 0x3c7   :  { %v4799_v49 = vpop.f32.mrf.mxu0  ;;  %v2434_v30 = vadd.f32 %v4611_v57, %v2187_v55  ;;  %v2441_v22 = vadd.f32 %v4614_v4, %v2202_v59  ;;  %v3921_v55 = vmul.f32 16.0, %v3919_v48 }
 0x3c9   :  { %v4800_v41 = vpop.f32.mrf.mxu0  ;;  %v2579_v15 = vadd.f32 %v4649_v28, %v2434_v30  ;;  %v2588_v50 = vadd.f32 %v4652_v2, %v2441_v22  ;;  %v3923_v4 = vsub.f32 %v3914_v17, %v3921_v55  ;;  %v3922_v2 = vmul.f32 16.0, %v3920_v13  ;;  %v8852_v17 = vld [vmem:[#allocation26_spill] sm:$0xff] }
 0x3ca   :  { %v4801_v5 = vadd.f32 %v4800_v41, %v4799_v49 }
 0x3cb   :  { %v2696_v27 = vadd.f32 %v4687_v32, %v2579_v15  ;;  %v2707_v26 = vadd.f32 %v4690_v0, %v2588_v50 }
 0x3cc   :  { %v4802_v29 = vpop.f32.mrf.mxu0 }
 0x3cd   :  { %v2875_v36 = vadd.f32 %v4725_v40, %v2696_v27  ;;  %v2882_v8 = vadd.f32 %v4728_v20, %v2707_v26  ;;  %v3924_v40 = vsub.f32 %v3915_v42, %v3922_v2  ;;  %v8850_v20 = vld [vmem:[#allocation8_spill] sm:$0xff]  ;;  %v8851_v26 = vld [vmem:[#allocation9_spill] sm:$0xff]  ;;  %v8854_v42 = vld [vmem:[#allocation14_spill] sm:$0xff] }
 0x3ce   :  { %v4803_v63 = vpop.f32.mrf.mxu0 }
 0x3cf   :  { %v2986_v11 = vadd.f32 %v4763_v16, %v2875_v36  ;;  %v4804_v46 = vadd.f32 %v4803_v63, %v4802_v29  ;;  %v2993_v24 = vadd.f32 %v4766_v12, %v2882_v8  ;;  %v3968_v36 = vpop.permute.xlu0 %3967  ;;  %v3970_v16 = vpop.permute.xlu1 %3969  ;;  %v3975_v8 = vmul.f32 0.0625, %v8852_v17  ;;  %v8853_v12 = vld [vmem:[#allocation25_spill] sm:$0xff] }
 0x3d1   :  { %v3105_v6 = vadd.f32 %v4801_v5, %v2986_v11  ;;  %v3120_v47 = vadd.f32 %v4804_v46, %v2993_v24  ;;  %v3974_v5 = vsub.f32 %v8851_v26, %v3970_v16 }
 0x3d3   :  { %v3352_v31 = vadd.f32 %v4839_v14, %v3105_v6  ;;  %v3359_v1 = vadd.f32 %v4842_v51, %v3120_v47  ;;  %v3976_v6 = vmul.f32 0.0625, %v8853_v12  ;;  %v3977_v14 = vmul.f32 0.0625, %v8854_v42 }
 0x3e1   :  { %v4913_v61 = vpop.f32.mrf.mxu1 }
 0x3e3   :  { %v4914_v45 = vpop.f32.mrf.mxu1 }
 0x3e4   :  { %v4915_v9 = vadd.f32 %v4914_v45, %v4913_v61 }
 0x3e6   :  { %v4916_v62 = vpop.f32.mrf.mxu1 }
 0x3e8   :  { %v4917_v21 = vpop.f32.mrf.mxu1 }
 0x3e9   :  { %v4918_v28 = vadd.f32 %v4917_v21, %v4916_v62  ;;  %v3973_v62 = vsub.f32 %v8850_v20, %v3968_v36 }
 0x3eb   :  { %v4875_v52 = vpop.f32.mrf.mxu0 }
 0x3ed   :  { %v4876_v54 = vpop.f32.mrf.mxu0 }
 0x3ee   :  { %v4877_v38 = vadd.f32 %v4876_v54, %v4875_v52 }
 0x3f0   :  { %v4878_v18 = vpop.f32.mrf.mxu0  ;;  %v3497_v58 = vadd.f32 %v4877_v38, %v3352_v31  ;;  %v8855_v31 = vld [vmem:[#allocation7_spill] sm:$0xff] }
 0x3f2   :  { %v4879_v23 = vpop.f32.mrf.mxu0  ;;  %v3614_v10 = vadd.f32 %v4915_v9, %v3497_v58 }
 0x3f3   :  { %v4880_v7 = vadd.f32 %v4879_v23, %v4878_v18 }
 0x3f5   :  { %v3506_v57 = vadd.f32 %v4880_v7, %v3359_v1 }
 0x3f7   :  { %v3625_v33 = vadd.f32 %v4918_v28, %v3506_v57 }
 0x407   :  { %v4989_v44 = vpop.f32.mrf.mxu1 }
 0x409   :  { %v4990_v49 = vpop.f32.mrf.mxu1 }
 0x40a   :  { %v4991_v29 = vadd.f32 %v4990_v49, %v4989_v44 }
 0x40b   :  { %v4992_v41 = vpop.f32.mrf.mxu1 }
 0x40d   :  { %v4993_v30 = vpop.f32.mrf.mxu1 }
 0x40e   :  { %v4994_v61 = vadd.f32 %v4993_v30, %v4992_v41 }
 0x40f   :  { %v4951_v34 = vpop.f32.mrf.mxu0 }
 0x411   :  { %v4952_v39 = vpop.f32.mrf.mxu0 }
 0x412   :  { %v4953_v37 = vadd.f32 %v4952_v39, %v4951_v34 }
 0x413   :  { %v4954_v35 = vpop.f32.mrf.mxu0 }
 0x414   :  { %v3793_v59 = vadd.f32 %v4953_v37, %v3614_v10 }
 0x415   :  { %v4955_v56 = vpop.f32.mrf.mxu0 }
 0x416   :  { %v3904_v43 = vadd.f32 %v4991_v29, %v3793_v59  ;;  %v4956_v15 = vadd.f32 %v4955_v56, %v4954_v35  ;;  %v8856_v29 = vld [vmem:[#allocation2_spill] sm:$0xff] }
 0x418   :  { %v3800_v63 = vadd.f32 %v4956_v15, %v3625_v33  ;;  %v3979_v19 = vadd.f32 %v3923_v4, %v3904_v43  ;;  %v4003_v45 = vadd.f32 %v3919_v48, %v3904_v43  ;;  %v3978_v48 = vmul.f32 0.0625, %v8855_v31 }
 0x41a   :  { %v3911_v32 = vadd.f32 %v4994_v61, %v3800_v63  ;;  %v3981_v22 = vadd.f32 0.5, %v3979_v19  ;;  %v4005_v27 = vadd.f32 0.5, %v4003_v45  ;;  %v8857_v63 = vld [vmem:[#allocation3_spill] sm:$0xff] }
 0x41c   :  { %3985 = vrot.lane.b32.xlu0 %v3981_v22, %s5001_s24  ;;  %v3980_v52 = vadd.f32 %v3924_v40, %v3911_v32  ;;  %v4004_v0 = vadd.f32 %v3920_v13, %v3911_v32  ;;  %v4027_v7 = vmul.f32 %v3981_v22, %v3975_v8  ;;  %v4031_v9 = vmul.f32 %v4005_v27, %v3977_v14 }
 0x41d   :  { %v3996_v60 = vpop.permute.xlu0 %3995 }
 0x41e   :  { %v3982_v50 = vadd.f32 0.5, %v3980_v52  ;;  %v4006_v54 = vadd.f32 0.5, %v4004_v0  ;;  %v4029_v1 = vadd.f32 %v4027_v7, %v3996_v60 }
 0x420   :  { %3987 = vrot.lane.b32.xlu1 %v3982_v50, %s5001_s24  ;;  %4009 = vrot.lane.b32.xlu0 %v4005_v27, %s5001_s24  ;;  %v4028_v41 = vmul.f32 %v3982_v50, %v3976_v6  ;;  %v4032_v37 = vmul.f32 %v4006_v54, %v3978_v48 }
 0x421   :  { %v3998_v11 = vpop.permute.xlu1 %3997 }
 0x422   :  { %v4030_v28 = vadd.f32 %v4028_v41, %v3998_v11 }
 0x424   :  { %4011 = vrot.lane.b32.xlu1 %v4006_v54, %s5001_s24  ;;  %4019 = vrot.lane.b32.xlu0 %v3973_v62, %s5001_s24 }
 0x428   :  { %4021 = vrot.lane.b32.xlu1 %v3974_v5, %s5001_s24 }
 0x48e   :  { %v3986_v21 = vpop.permute.xlu0 %3985 }
 0x48f   :  { %v3991_v18 = vmul.f32 %v3986_v21, %v3975_v8 }
 0x491   :  { %v4001_v46 = vadd.f32 %v3996_v60, %v3991_v18 }
 0x492   :  { %v3988_v25 = vpop.permute.xlu1 %3987  ;;  %v4010_v44 = vpop.permute.xlu0 %4009 }
 0x493   :  { %v3992_v3 = vmul.f32 %v3988_v25, %v3976_v6  ;;  %4037 = vrot.lane.b32.xlu0 %v4001_v46, %s5002_s2  ;;  %v4015_v38 = vmul.f32 %v4010_v44, %v3977_v14 }
 0x495   :  { %v4002_v24 = vadd.f32 %v3998_v11, %v3992_v3 }
 0x496   :  { %v4012_v23 = vpop.permute.xlu1 %4011  ;;  %v4020_v47 = vpop.permute.xlu0 %4019 }
 0x497   :  { %v4025_v49 = vadd.f32 %v4020_v47, %v4015_v38  ;;  %4039 = vrot.lane.b32.xlu1 %v4002_v24, %s5002_s2  ;;  %v4016_v53 = vmul.f32 %v4012_v23, %v3978_v48  ;;  %v4033_v13 = vadd.f32 %v4031_v9, %v4020_v47 }
 0x499   :  { %4045 = vrot.lane.b32.xlu0 %v4025_v49, %s5002_s2 }
 0x49a   :  { %v4022_v51 = vpop.permute.xlu1 %4021 }
 0x49b   :  { %v4026_v58 = vadd.f32 %v4022_v51, %v4016_v53  ;;  %v4034_v56 = vadd.f32 %v4032_v37, %v4022_v51 }
 0x49d   :  { %4047 = vrot.lane.b32.xlu1 %v4026_v58, %s5002_s2 }
 0x505   :  { %v4038_v34 = vpop.permute.xlu0 %4037 }
 0x509   :  { %v4040_v39 = vpop.permute.xlu1 %4039 }
 0x50b   :  { %v4046_v55 = vpop.permute.xlu0 %4045 }
 0x50c   :  { %v4052_v57 = vsel %vm4051_vm12, %v4038_v34, %v4046_v55 }
 0x50d   :  { %v4055_v10 = vsel %vm4054_vm13, %v4052_v57, %v4029_v1 }
 0x50e   :  { %v4058_v35 = vsel %vm4057_vm14, %v4055_v10, %v4033_v13 }
 0x50f   :  { %v4061_v59 = vsel %vm4060_vm15, %v4058_v35, %v8856_v29  ;;  %v4048_v30 = vpop.permute.xlu1 %4047 }
 0x510   :  { %v4064_v4 = vsel %vm4063_vm0, %v4061_v59, 0.0  ;;  %v4053_v43 = vsel %vm4051_vm12, %v4040_v39, %v4048_v30 }
 0x511   :  { %v4067_v33 = vsel %vm4066_vm1, %v4064_v4, 0.0  ;;  %v4056_v15 = vsel %vm4054_vm13, %v4053_v43, %v4030_v28 }
 0x512   :  { %v4070_v2 = vsel %vm4069_vm2, %v4067_v33, 0.0  ;;  %v4059_v61 = vsel %vm4057_vm14, %v4056_v15, %v4034_v56 }
 0x513   :  { %4073 = vst.msk [vmem:[%s8089_s4] sm:$0xff] %vm4072_vm3, %v4070_v2  ;;  %v4062_v19 = vsel %vm4060_vm15, %v4059_v61, %v8857_v63 }
 0x514   :  { %v4065_v32 = vsel %vm4063_vm0, %v4062_v19, 0.0 }
 0x515   :  { %v4068_v22 = vsel %vm4066_vm1, %v4065_v32, 0.0 }
 0x516   :  { %v4071_v40 = vsel %vm4069_vm2, %v4068_v22, 0.0 }
 0x517   :  { %4074 = vst.msk [vmem:[%s8089_s4 + $0x8] sm:$0xff] %vm4072_vm3, %v4071_v40 }

</bundles_post_ra>
